<compile_context>
chip_gen: v7x
topology: tpu7x:2x2x1
jax: 0.10.0
libtpu: 0.0.40
codegen_flags: <defaults>
</compile_context>

<pallas_src>
import functools

import jax
import jax.numpy as jnp
import numpy as np
from jax.experimental import pallas as pl
from jax.experimental.pallas import tpu as pltpu


def _dense_capsule_kernel(x_ref, w_ref, out_ref, *, routings):
    """One grid step processes TB batch rows.

    x_ref   : [TB, Din, I]    in_dim_caps in sublanes, in_num_caps in lanes
    w_ref   : [Din, O, E, I]  grid-invariant weight, lane-dense over I
    out_ref : [TB, O*E]       flattened output capsules (lane-dense store)
    """
    x = x_ref[...]                                   # [TB, Din, I] f32
    tb, din, _ = x.shape
    _, num_out, dim_out, _ = w_ref.shape

    # ---- x_hat[t, o, e, i] = sum_d W[d, o, e, i] * x[t, d, i] ---------------
    # Din (=8) unrolled multiply-accumulate on lane-dense [TB, O, E, I] slabs.
    x_hat = w_ref[0][None, :, :, :] * x[:, 0, :][:, None, None, :]
    for d in range(1, din):
        x_hat = x_hat + w_ref[d][None, :, :, :] * x[:, d, :][:, None, None, :]

    def squash(s):
        # s: [TB, O, E]; squash along E with lmd=1: scale = ||s|| / (1 + ||s||^2)
        nrm2 = jnp.sum(s * s, axis=-1, keepdims=True)
        return s * (jnp.sqrt(nrm2) * pl.reciprocal(1.0 + nrm2))

    # ---- routing iteration 0: b == 0  =>  softmax(b) == 1/O exactly ---------
    s = (1.0 / num_out) * jnp.sum(x_hat, axis=3)          # [TB, O, E]
    v = squash(s)
    if routings > 1:
        # agreement update: b = 0 + <v, x_hat> over out_dim_caps (sublane axis)
        b = jnp.sum(v[:, :, :, None] * x_hat, axis=2)      # [TB, O, I]

    for r in range(1, routings):
        # softmax over the out-capsule axis (axis 1), max-stabilized
        bmax = jnp.max(b, axis=1, keepdims=True)
        eb = jnp.exp(b - bmax)
        c = eb * pl.reciprocal(jnp.sum(eb, axis=1, keepdims=True))   # [TB, O, I]
        # weighted sum over input capsules (lane reduction over I)
        s = jnp.sum(c[:, :, None, :] * x_hat, axis=3)                # [TB, O, E]
        v = squash(s)
        if r < routings - 1:
            b = b + jnp.sum(v[:, :, :, None] * x_hat, axis=2)        # [TB, O, I]

    out_ref[...] = v.reshape(tb, num_out * dim_out).astype(out_ref.dtype)


def dense_capsule(x, weight, *, routings=3, block_b=None):
    """x: [B, in_num_caps, in_dim_caps]; weight: [O, I, E, Din] (PyTorch layout)."""
    B, I, Din = x.shape
    O, I_w, E, Din_w = weight.shape
    assert (I, Din) == (I_w, Din_w), "weight/input capsule shape mismatch"
    assert routings > 0, "The 'routings' should be > 0."

    # Batch tile TB. TB sits in the sublane slot of the output block, so it
    # must be a multiple of 8 or equal the full batch.
    if block_b is None:
        block_b = 8 if (B % 8 == 0) else B
    tb = int(block_b)
    assert B % tb == 0 and (tb % 8 == 0 or tb == B), (
        "block_b must divide the batch and be a multiple of 8 (or the full batch)")
    grid = (B // tb,)

    # Lane-dense layouts: in_num_caps (I) goes last everywhere.
    #   x:      [B, I, Din]    -> [B, Din, I]
    #   weight: [O, I, E, Din] -> [Din, O, E, I]
    x_r = jnp.transpose(x.astype(jnp.float32), (0, 2, 1))
    w_r = jnp.transpose(weight.astype(jnp.float32), (3, 0, 2, 1))

    # VMEM footprint estimate (padded to (8,128) tiles). Raise the scoped VMEM
    # limit above the 16/32 MiB defaults when realistic capsule counts need it,
    # capped below v7x's 64 MiB physical VMEM.
    i_pad = pl.cdiv(I, 128) * 128
    e_pad = pl.cdiv(E, 8) * 8
    oe_pad = pl.cdiv(O * E, 128) * 128
    w_bytes = 2 * Din * O * e_pad * i_pad * 4        # double-buffered weight block
    xhat_bytes = tb * O * e_pad * i_pad * 4          # x_hat (+ fused-op temps below)
    x_bytes = 2 * tb * Din * i_pad * 4
    out_bytes = 2 * pl.cdiv(tb, 8) * 8 * oe_pad * 4
    vmem_est = w_bytes + 3 * xhat_bytes + x_bytes + out_bytes
    vmem_limit = int(min(max(vmem_est + vmem_est // 2, 32 * 2**20), 56 * 2**20))

    kernel = functools.partial(_dense_capsule_kernel, routings=routings)

    out_flat = pl.pallas_call(
        kernel,
        out_shape=jax.ShapeDtypeStruct((B, O * E), jnp.float32),
        grid_spec=pltpu.PrefetchScalarGridSpec(
            num_scalar_prefetch=0,
            grid=grid,
            in_specs=[
                pl.BlockSpec((tb, Din, I), lambda g: (g, 0, 0)),
                # Grid-invariant weight: constant index_map -> single DMA that
                # is reused by every grid step (lane-dense, so no 8x padding).
                pl.BlockSpec((Din, O, E, I), lambda g: (0, 0, 0, 0)),
            ],
            out_specs=pl.BlockSpec((tb, O * E), lambda g: (g, 0)),
        ),
        compiler_params=pltpu.CompilerParams(
            dimension_semantics=("parallel",),
            vmem_limit_bytes=vmem_limit,
        ),
    )(x_r, w_r)
    return out_flat.reshape(B, O, E)


def dense_capsule_ref(x, weight, *, routings=3):
    """Pure-JAX reference mirroring the PyTorch forward."""
    x = x.astype(jnp.float32)
    weight = weight.astype(jnp.float32)
    B = x.shape[0]
    O, I, E, Din = weight.shape
    # x_hat[b, o, i, e] = sum_d weight[o, i, e, d] * x[b, i, d]
    x_hat = jnp.einsum("oied,bid->boie", weight, x)
    b = jnp.zeros((B, O, I), dtype=jnp.float32)
    outputs = None
    for r in range(routings):
        c = jax.nn.softmax(b, axis=1)
        s = jnp.sum(c[:, :, :, None] * x_hat, axis=2, keepdims=True)  # [B,O,1,E]
        nrm = jnp.linalg.norm(s, axis=-1, keepdims=True)
        outputs = (nrm / (1.0 + nrm * nrm)) * s
        if r < routings - 1:
            b = b + jnp.sum(outputs * x_hat, axis=-1)
    return outputs[:, :, 0, :]


if __name__ == "__main__":
    key = jax.random.PRNGKey(0)

    # --- small, module-consistent shapes (tb == B path) ---------------------
    batch, in_num_caps, in_dim_caps = 2, 32, 8
    out_num_caps, out_dim_caps, routings = 10, 16, 3

    kx, kw, kx2, kw2 = jax.random.split(key, 4)
    x = jax.random.normal(kx, (batch, in_num_caps, in_dim_caps), dtype=jnp.float32)
    weight = 0.01 * jax.random.normal(
        kw, (out_num_caps, in_num_caps, out_dim_caps, in_dim_caps), dtype=jnp.float32)

    out = jax.block_until_ready(dense_capsule(x, weight, routings=routings))
    ref = jax.block_until_ready(dense_capsule_ref(x, weight, routings=routings))
    np.testing.assert_allclose(np.asarray(out), np.asarray(ref), rtol=1e-4, atol=2e-6)
    assert out.shape == (batch, out_num_caps, out_dim_caps)

    # --- batched-grid path (TB=8, grid=2, lane-aligned I) --------------------
    b2, i2 = 16, 128
    x2 = jax.random.normal(kx2, (b2, i2, in_dim_caps), dtype=jnp.float32)
    w2 = 0.01 * jax.random.normal(
        kw2, (out_num_caps, i2, out_dim_caps, in_dim_caps), dtype=jnp.float32)
    out2 = jax.block_until_ready(dense_capsule(x2, w2, routings=routings))
    ref2 = jax.block_until_ready(dense_capsule_ref(x2, w2, routings=routings))
    np.testing.assert_allclose(np.asarray(out2), np.asarray(ref2), rtol=1e-4, atol=2e-6)

    print("KERNEL_OK")
</pallas_src>

<mosaic_0001>
module attributes {stable_mosaic.version = 11 : i64} {
  func.func @_dense_capsule_kernel(%arg0: i32, %arg1: memref<2x8x32xf32, #tpu.memory_space<vmem>>, %arg2: memref<8x10x16x32xf32, #tpu.memory_space<vmem>>, %arg3: memref<2x160xf32, #tpu.memory_space<vmem>>) attributes {dimension_semantics = [#tpu.dimension_semantics<parallel>], iteration_bounds = array<i64: 1>, scalar_prefetch = 0 : i64, scratch_operands = 0 : i64, tpu.core_type = #tpu.core_type<tc>, window_params = [{transform_indices = @transform_0, window_bounds = array<i64: 2, 8, 32>}, {pipeline_mode = #tpu.pipeline_mode<synchronous>, transform_indices = @transform_1, window_bounds = array<i64: 8, 10, 16, 32>}, {transform_indices = @transform_2, window_bounds = array<i64: 2, 160>}]} {
    %c0 = arith.constant 0 : index
    %c0_0 = arith.constant 0 : index
    %c0_1 = arith.constant 0 : index
    %0 = vector.load %arg1[%c0, %c0_0, %c0_1] : memref<2x8x32xf32, #tpu.memory_space<vmem>>, vector<2x8x32xf32>
    %c0_2 = arith.constant 0 : index
    %c0_3 = arith.constant 0 : index
    %c0_4 = arith.constant 0 : index
    %c0_5 = arith.constant 0 : index
    %1 = vector.load %arg2[%c0_2, %c0_3, %c0_4, %c0_5] : memref<8x10x16x32xf32, #tpu.memory_space<vmem>>, vector<1x10x16x32xf32>
    %2 = vector.shape_cast %1 : vector<1x10x16x32xf32> to vector<10x16x32xf32>
    %3 = vector.shape_cast %2 : vector<10x16x32xf32> to vector<1x10x16x32xf32>
    %4 = vector.extract_strided_slice %0 {offsets = [0, 0, 0], sizes = [2, 1, 32], strides = [1, 1, 1]} : vector<2x8x32xf32> to vector<2x1x32xf32>
    %5 = vector.shape_cast %4 : vector<2x1x32xf32> to vector<2x32xf32>
    %6 = vector.shape_cast %5 : vector<2x32xf32> to vector<2x1x1x32xf32>
    %7 = vector.broadcast %3 : vector<1x10x16x32xf32> to vector<2x10x16x32xf32>
    %8 = vector.broadcast %6 : vector<2x1x1x32xf32> to vector<2x10x16x32xf32>
    %9 = arith.mulf %7, %8 : vector<2x10x16x32xf32>
    %c1 = arith.constant 1 : index
    %c0_6 = arith.constant 0 : index
    %c0_7 = arith.constant 0 : index
    %c0_8 = arith.constant 0 : index
    %10 = vector.load %arg2[%c1, %c0_6, %c0_7, %c0_8] : memref<8x10x16x32xf32, #tpu.memory_space<vmem>>, vector<1x10x16x32xf32>
    %11 = vector.shape_cast %10 : vector<1x10x16x32xf32> to vector<10x16x32xf32>
    %12 = vector.shape_cast %11 : vector<10x16x32xf32> to vector<1x10x16x32xf32>
    %13 = vector.extract_strided_slice %0 {offsets = [0, 1, 0], sizes = [2, 1, 32], strides = [1, 1, 1]} : vector<2x8x32xf32> to vector<2x1x32xf32>
    %14 = vector.shape_cast %13 : vector<2x1x32xf32> to vector<2x32xf32>
    %15 = vector.shape_cast %14 : vector<2x32xf32> to vector<2x1x1x32xf32>
    %16 = vector.broadcast %12 : vector<1x10x16x32xf32> to vector<2x10x16x32xf32>
    %17 = vector.broadcast %15 : vector<2x1x1x32xf32> to vector<2x10x16x32xf32>
    %18 = arith.mulf %16, %17 : vector<2x10x16x32xf32>
    %19 = arith.addf %9, %18 : vector<2x10x16x32xf32>
    %c2 = arith.constant 2 : index
    %c0_9 = arith.constant 0 : index
    %c0_10 = arith.constant 0 : index
    %c0_11 = arith.constant 0 : index
    %20 = vector.load %arg2[%c2, %c0_9, %c0_10, %c0_11] : memref<8x10x16x32xf32, #tpu.memory_space<vmem>>, vector<1x10x16x32xf32>
    %21 = vector.shape_cast %20 : vector<1x10x16x32xf32> to vector<10x16x32xf32>
    %22 = vector.shape_cast %21 : vector<10x16x32xf32> to vector<1x10x16x32xf32>
    %23 = vector.extract_strided_slice %0 {offsets = [0, 2, 0], sizes = [2, 1, 32], strides = [1, 1, 1]} : vector<2x8x32xf32> to vector<2x1x32xf32>
    %24 = vector.shape_cast %23 : vector<2x1x32xf32> to vector<2x32xf32>
    %25 = vector.shape_cast %24 : vector<2x32xf32> to vector<2x1x1x32xf32>
    %26 = vector.broadcast %22 : vector<1x10x16x32xf32> to vector<2x10x16x32xf32>
    %27 = vector.broadcast %25 : vector<2x1x1x32xf32> to vector<2x10x16x32xf32>
    %28 = arith.mulf %26, %27 : vector<2x10x16x32xf32>
    %29 = arith.addf %19, %28 : vector<2x10x16x32xf32>
    %c3 = arith.constant 3 : index
    %c0_12 = arith.constant 0 : index
    %c0_13 = arith.constant 0 : index
    %c0_14 = arith.constant 0 : index
    %30 = vector.load %arg2[%c3, %c0_12, %c0_13, %c0_14] : memref<8x10x16x32xf32, #tpu.memory_space<vmem>>, vector<1x10x16x32xf32>
    %31 = vector.shape_cast %30 : vector<1x10x16x32xf32> to vector<10x16x32xf32>
    %32 = vector.shape_cast %31 : vector<10x16x32xf32> to vector<1x10x16x32xf32>
    %33 = vector.extract_strided_slice %0 {offsets = [0, 3, 0], sizes = [2, 1, 32], strides = [1, 1, 1]} : vector<2x8x32xf32> to vector<2x1x32xf32>
    %34 = vector.shape_cast %33 : vector<2x1x32xf32> to vector<2x32xf32>
    %35 = vector.shape_cast %34 : vector<2x32xf32> to vector<2x1x1x32xf32>
    %36 = vector.broadcast %32 : vector<1x10x16x32xf32> to vector<2x10x16x32xf32>
    %37 = vector.broadcast %35 : vector<2x1x1x32xf32> to vector<2x10x16x32xf32>
    %38 = arith.mulf %36, %37 : vector<2x10x16x32xf32>
    %39 = arith.addf %29, %38 : vector<2x10x16x32xf32>
    %c4 = arith.constant 4 : index
    %c0_15 = arith.constant 0 : index
    %c0_16 = arith.constant 0 : index
    %c0_17 = arith.constant 0 : index
    %40 = vector.load %arg2[%c4, %c0_15, %c0_16, %c0_17] : memref<8x10x16x32xf32, #tpu.memory_space<vmem>>, vector<1x10x16x32xf32>
    %41 = vector.shape_cast %40 : vector<1x10x16x32xf32> to vector<10x16x32xf32>
    %42 = vector.shape_cast %41 : vector<10x16x32xf32> to vector<1x10x16x32xf32>
    %43 = vector.extract_strided_slice %0 {offsets = [0, 4, 0], sizes = [2, 1, 32], strides = [1, 1, 1]} : vector<2x8x32xf32> to vector<2x1x32xf32>
    %44 = vector.shape_cast %43 : vector<2x1x32xf32> to vector<2x32xf32>
    %45 = vector.shape_cast %44 : vector<2x32xf32> to vector<2x1x1x32xf32>
    %46 = vector.broadcast %42 : vector<1x10x16x32xf32> to vector<2x10x16x32xf32>
    %47 = vector.broadcast %45 : vector<2x1x1x32xf32> to vector<2x10x16x32xf32>
    %48 = arith.mulf %46, %47 : vector<2x10x16x32xf32>
    %49 = arith.addf %39, %48 : vector<2x10x16x32xf32>
    %c5 = arith.constant 5 : index
    %c0_18 = arith.constant 0 : index
    %c0_19 = arith.constant 0 : index
    %c0_20 = arith.constant 0 : index
    %50 = vector.load %arg2[%c5, %c0_18, %c0_19, %c0_20] : memref<8x10x16x32xf32, #tpu.memory_space<vmem>>, vector<1x10x16x32xf32>
    %51 = vector.shape_cast %50 : vector<1x10x16x32xf32> to vector<10x16x32xf32>
    %52 = vector.shape_cast %51 : vector<10x16x32xf32> to vector<1x10x16x32xf32>
    %53 = vector.extract_strided_slice %0 {offsets = [0, 5, 0], sizes = [2, 1, 32], strides = [1, 1, 1]} : vector<2x8x32xf32> to vector<2x1x32xf32>
    %54 = vector.shape_cast %53 : vector<2x1x32xf32> to vector<2x32xf32>
    %55 = vector.shape_cast %54 : vector<2x32xf32> to vector<2x1x1x32xf32>
    %56 = vector.broadcast %52 : vector<1x10x16x32xf32> to vector<2x10x16x32xf32>
    %57 = vector.broadcast %55 : vector<2x1x1x32xf32> to vector<2x10x16x32xf32>
    %58 = arith.mulf %56, %57 : vector<2x10x16x32xf32>
    %59 = arith.addf %49, %58 : vector<2x10x16x32xf32>
    %c6 = arith.constant 6 : index
    %c0_21 = arith.constant 0 : index
    %c0_22 = arith.constant 0 : index
    %c0_23 = arith.constant 0 : index
    %60 = vector.load %arg2[%c6, %c0_21, %c0_22, %c0_23] : memref<8x10x16x32xf32, #tpu.memory_space<vmem>>, vector<1x10x16x32xf32>
    %61 = vector.shape_cast %60 : vector<1x10x16x32xf32> to vector<10x16x32xf32>
    %62 = vector.shape_cast %61 : vector<10x16x32xf32> to vector<1x10x16x32xf32>
    %63 = vector.extract_strided_slice %0 {offsets = [0, 6, 0], sizes = [2, 1, 32], strides = [1, 1, 1]} : vector<2x8x32xf32> to vector<2x1x32xf32>
    %64 = vector.shape_cast %63 : vector<2x1x32xf32> to vector<2x32xf32>
    %65 = vector.shape_cast %64 : vector<2x32xf32> to vector<2x1x1x32xf32>
    %66 = vector.broadcast %62 : vector<1x10x16x32xf32> to vector<2x10x16x32xf32>
    %67 = vector.broadcast %65 : vector<2x1x1x32xf32> to vector<2x10x16x32xf32>
    %68 = arith.mulf %66, %67 : vector<2x10x16x32xf32>
    %69 = arith.addf %59, %68 : vector<2x10x16x32xf32>
    %c7 = arith.constant 7 : index
    %c0_24 = arith.constant 0 : index
    %c0_25 = arith.constant 0 : index
    %c0_26 = arith.constant 0 : index
    %70 = vector.load %arg2[%c7, %c0_24, %c0_25, %c0_26] : memref<8x10x16x32xf32, #tpu.memory_space<vmem>>, vector<1x10x16x32xf32>
    %71 = vector.shape_cast %70 : vector<1x10x16x32xf32> to vector<10x16x32xf32>
    %72 = vector.shape_cast %71 : vector<10x16x32xf32> to vector<1x10x16x32xf32>
    %73 = vector.extract_strided_slice %0 {offsets = [0, 7, 0], sizes = [2, 1, 32], strides = [1, 1, 1]} : vector<2x8x32xf32> to vector<2x1x32xf32>
    %74 = vector.shape_cast %73 : vector<2x1x32xf32> to vector<2x32xf32>
    %75 = vector.shape_cast %74 : vector<2x32xf32> to vector<2x1x1x32xf32>
    %76 = vector.broadcast %72 : vector<1x10x16x32xf32> to vector<2x10x16x32xf32>
    %77 = vector.broadcast %75 : vector<2x1x1x32xf32> to vector<2x10x16x32xf32>
    %78 = arith.mulf %76, %77 : vector<2x10x16x32xf32>
    %79 = arith.addf %69, %78 : vector<2x10x16x32xf32>
    %cst = arith.constant dense<0.000000e+00> : vector<2x10x16xf32>
    %80 = vector.multi_reduction <add>, %79, %cst [3] : vector<2x10x16x32xf32> to vector<2x10x16xf32>
    %cst_27 = arith.constant 1.000000e-01 : f32
    %81 = vector.broadcast %cst_27 : f32 to vector<2x10x16xf32>
    %82 = arith.mulf %81, %80 : vector<2x10x16xf32>
    %83 = arith.mulf %82, %82 : vector<2x10x16xf32>
    %cst_28 = arith.constant dense<0.000000e+00> : vector<2x10xf32>
    %84 = vector.multi_reduction <add>, %83, %cst_28 [2] : vector<2x10x16xf32> to vector<2x10xf32>
    %85 = vector.shape_cast %84 : vector<2x10xf32> to vector<2x10x1xf32>
    %86 = math.sqrt %85 : vector<2x10x1xf32>
    %cst_29 = arith.constant 1.000000e+00 : f32
    %87 = vector.broadcast %cst_29 : f32 to vector<2x10x1xf32>
    %88 = arith.addf %87, %85 : vector<2x10x1xf32>
    %89 = tpu.reciprocal %88 : vector<2x10x1xf32> -> vector<2x10x1xf32>
    %90 = arith.mulf %86, %89 : vector<2x10x1xf32>
    %91 = vector.broadcast %90 : vector<2x10x1xf32> to vector<2x10x16xf32>
    %92 = arith.mulf %82, %91 : vector<2x10x16xf32>
    %93 = vector.shape_cast %92 : vector<2x10x16xf32> to vector<2x10x16x1xf32>
    %94 = vector.broadcast %93 : vector<2x10x16x1xf32> to vector<2x10x16x32xf32>
    %95 = arith.mulf %94, %79 : vector<2x10x16x32xf32>
    %cst_30 = arith.constant dense<0.000000e+00> : vector<2x10x32xf32>
    %96 = vector.multi_reduction <add>, %95, %cst_30 [2] : vector<2x10x16x32xf32> to vector<2x10x32xf32>
    %cst_31 = arith.constant dense<0xFF800000> : vector<2x32xf32>
    %97 = vector.multi_reduction <maximumf>, %96, %cst_31 [1] : vector<2x10x32xf32> to vector<2x32xf32>
    %98 = vector.shape_cast %97 : vector<2x32xf32> to vector<2x1x32xf32>
    %99 = vector.broadcast %98 : vector<2x1x32xf32> to vector<2x10x32xf32>
    %100 = arith.subf %96, %99 : vector<2x10x32xf32>
    %101 = math.exp %100 : vector<2x10x32xf32>
    %cst_32 = arith.constant dense<0.000000e+00> : vector<2x32xf32>
    %102 = vector.multi_reduction <add>, %101, %cst_32 [1] : vector<2x10x32xf32> to vector<2x32xf32>
    %103 = vector.shape_cast %102 : vector<2x32xf32> to vector<2x1x32xf32>
    %104 = tpu.reciprocal %103 : vector<2x1x32xf32> -> vector<2x1x32xf32>
    %105 = vector.broadcast %104 : vector<2x1x32xf32> to vector<2x10x32xf32>
    %106 = arith.mulf %101, %105 : vector<2x10x32xf32>
    %107 = vector.shape_cast %106 : vector<2x10x32xf32> to vector<2x10x1x32xf32>
    %108 = vector.broadcast %107 : vector<2x10x1x32xf32> to vector<2x10x16x32xf32>
    %109 = arith.mulf %108, %79 : vector<2x10x16x32xf32>
    %cst_33 = arith.constant dense<0.000000e+00> : vector<2x10x16xf32>
    %110 = vector.multi_reduction <add>, %109, %cst_33 [3] : vector<2x10x16x32xf32> to vector<2x10x16xf32>
    %111 = arith.mulf %110, %110 : vector<2x10x16xf32>
    %cst_34 = arith.constant dense<0.000000e+00> : vector<2x10xf32>
    %112 = vector.multi_reduction <add>, %111, %cst_34 [2] : vector<2x10x16xf32> to vector<2x10xf32>
    %113 = vector.shape_cast %112 : vector<2x10xf32> to vector<2x10x1xf32>
    %114 = math.sqrt %113 : vector<2x10x1xf32>
    %cst_35 = arith.constant 1.000000e+00 : f32
    %115 = vector.broadcast %cst_35 : f32 to vector<2x10x1xf32>
    %116 = arith.addf %115, %113 : vector<2x10x1xf32>
    %117 = tpu.reciprocal %116 : vector<2x10x1xf32> -> vector<2x10x1xf32>
    %118 = arith.mulf %114, %117 : vector<2x10x1xf32>
    %119 = vector.broadcast %118 : vector<2x10x1xf32> to vector<2x10x16xf32>
    %120 = arith.mulf %110, %119 : vector<2x10x16xf32>
    %121 = vector.shape_cast %120 : vector<2x10x16xf32> to vector<2x10x16x1xf32>
    %122 = vector.broadcast %121 : vector<2x10x16x1xf32> to vector<2x10x16x32xf32>
    %123 = arith.mulf %122, %79 : vector<2x10x16x32xf32>
    %cst_36 = arith.constant dense<0.000000e+00> : vector<2x10x32xf32>
    %124 = vector.multi_reduction <add>, %123, %cst_36 [2] : vector<2x10x16x32xf32> to vector<2x10x32xf32>
    %125 = arith.addf %96, %124 : vector<2x10x32xf32>
    %cst_37 = arith.constant dense<0xFF800000> : vector<2x32xf32>
    %126 = vector.multi_reduction <maximumf>, %125, %cst_37 [1] : vector<2x10x32xf32> to vector<2x32xf32>
    %127 = vector.shape_cast %126 : vector<2x32xf32> to vector<2x1x32xf32>
    %128 = vector.broadcast %127 : vector<2x1x32xf32> to vector<2x10x32xf32>
    %129 = arith.subf %125, %128 : vector<2x10x32xf32>
    %130 = math.exp %129 : vector<2x10x32xf32>
    %cst_38 = arith.constant dense<0.000000e+00> : vector<2x32xf32>
    %131 = vector.multi_reduction <add>, %130, %cst_38 [1] : vector<2x10x32xf32> to vector<2x32xf32>
    %132 = vector.shape_cast %131 : vector<2x32xf32> to vector<2x1x32xf32>
    %133 = tpu.reciprocal %132 : vector<2x1x32xf32> -> vector<2x1x32xf32>
    %134 = vector.broadcast %133 : vector<2x1x32xf32> to vector<2x10x32xf32>
    %135 = arith.mulf %130, %134 : vector<2x10x32xf32>
    %136 = vector.shape_cast %135 : vector<2x10x32xf32> to vector<2x10x1x32xf32>
    %137 = vector.broadcast %136 : vector<2x10x1x32xf32> to vector<2x10x16x32xf32>
    %138 = arith.mulf %137, %79 : vector<2x10x16x32xf32>
    %cst_39 = arith.constant dense<0.000000e+00> : vector<2x10x16xf32>
    %139 = vector.multi_reduction <add>, %138, %cst_39 [3] : vector<2x10x16x32xf32> to vector<2x10x16xf32>
    %140 = arith.mulf %139, %139 : vector<2x10x16xf32>
    %cst_40 = arith.constant dense<0.000000e+00> : vector<2x10xf32>
    %141 = vector.multi_reduction <add>, %140, %cst_40 [2] : vector<2x10x16xf32> to vector<2x10xf32>
    %142 = vector.shape_cast %141 : vector<2x10xf32> to vector<2x10x1xf32>
    %143 = math.sqrt %142 : vector<2x10x1xf32>
    %cst_41 = arith.constant 1.000000e+00 : f32
    %144 = vector.broadcast %cst_41 : f32 to vector<2x10x1xf32>
    %145 = arith.addf %144, %142 : vector<2x10x1xf32>
    %146 = tpu.reciprocal %145 : vector<2x10x1xf32> -> vector<2x10x1xf32>
    %147 = arith.mulf %143, %146 : vector<2x10x1xf32>
    %148 = vector.broadcast %147 : vector<2x10x1xf32> to vector<2x10x16xf32>
    %149 = arith.mulf %139, %148 : vector<2x10x16xf32>
    %150 = vector.shape_cast %149 : vector<2x10x16xf32> to vector<2x160xf32>
    %c0_42 = arith.constant 0 : index
    %c0_43 = arith.constant 0 : index
    %151 = vector.load %arg3[%c0_42, %c0_43] : memref<2x160xf32, #tpu.memory_space<vmem>>, vector<2x160xf32>
    tpu.vector_store %arg3[%c0_42, %c0_43], %150 {strides = array<i32>} : memref<2x160xf32, #tpu.memory_space<vmem>>, vector<2x160xf32>,
    return
  }
  func.func @transform_0(%arg0: i32) -> (i32, i32, i32) {
    %c0_i32 = arith.constant 0 : i32
    %c0_i32_0 = arith.constant 0 : i32
    %c0_i32_1 = arith.constant 0 : i32
    return %arg0, %c0_i32, %c0_i32_0 : i32, i32, i32
  }
  func.func @transform_1(%arg0: i32) -> (i32, i32, i32, i32) {
    %c0_i32 = arith.constant 0 : i32
    %c0_i32_0 = arith.constant 0 : i32
    %c0_i32_1 = arith.constant 0 : i32
    %c0_i32_2 = arith.constant 0 : i32
    %c0_i32_3 = arith.constant 0 : i32
    return %c0_i32, %c0_i32_0, %c0_i32_1, %c0_i32_2 : i32, i32, i32, i32
  }
  func.func @transform_2(%arg0: i32) -> (i32, i32) {
    %c0_i32 = arith.constant 0 : i32
    %c0_i32_0 = arith.constant 0 : i32
    return %arg0, %c0_i32 : i32, i32
  }
}

</mosaic_0001>

<bundles_post_ra>
// kernel: tpu_custom_call.1
= control target key start
LH: loop header
LB: loop body
LE: loop exit
PB: predicated region body
PF: predicated region fallthrough
CT: control target
= control target key end

     0   :  { %7 = vsyncpa [#allocation3], 0  ;;  %s7859_s0 = inlined_call_operand.hbm [shape: f32[2,8,32], index: 0, kind: input, shape index: {}]   ;;  %s7860_s1 = inlined_call_operand.hbm [shape: f32[8,10,16,32], index: 1, kind: input, shape index: {}]   ;;  %s7861_s2 = inlined_call_operand.hbm [shape: f32[2,160], index: 2, kind: output, shape index: {}]  }
   0x1   :  { %8 = vsyncpa [#allocation6], 0 }
   0x2   :  { %9 = vsyncpa [#allocation4], 0  ;;  %s4957_s9 = smov [#allocation2]   ;;  %s4885_s13 = scalar_lea.hbm %s7859_s0, 256 }
   0x3   :  { %s15_s10 = sshll.u32 %s4957_s9, 4  ;;  %p4886_p0 = scmp.ne.s32.totalorder %s7859_s0, %s4885_s13  ;;  %s16_s10 = int_to_ptr.vmem [resolvable:$true] %s15_s10 }
   0x4   :  { %p4889_p1 = scmp.lt.u32.totalorder %s4885_s13, %s7859_s0 }
   0x6   :  { %p4891_p2 = pnand %p4889_p1, %p4886_p0 }
   0x8   :  { %4894 = shalt.err (!%p4891_p2)
}
   0x9   :  { %s4895_s18 = scalar_lea.vmem %s16_s10, 256  ;;  %p4900_p4 = scmp.lt.s32.totalorder %s16_s10, %s16_s10 }
   0xa   :  { %p4896_p3 = scmp.ne.s32.totalorder %s16_s10, %s4895_s18  ;;  %p4901_p5 = scmp.lt.s32.totalorder %s4895_s18, %s4895_s18 }
   0xc   :  { %p4902_p6 = por %p4901_p5, %p4900_p4 }
   0xe   :  { %p4903_p7 = pnand %p4902_p6, %p4896_p3 }
  0x10   :  { %4906 = shalt.err (!%p4903_p7)
}
  0x11   :  { %s4958_s19 = smov 128   ;;  %s4959_s20 = smov 8  }
  0x12   :  { %21 = dma.hbm_to_vmem [thread:$0]  %s7859_s0, 256, %s16_s10, [#allocation3], %s4958_s19, %s4958_s19, %s4959_s20  }
  0x13   :  { %s4960_s23 = smov [#allocation5]   ;;  %s4907_s27 = scalar_lea.hbm %s7860_s1, 20480 }
  0x14   :  { %s27_s24 = sshll.u32 %s4960_s23, 4  ;;  %p4908_p8 = scmp.ne.s32.totalorder %s7860_s1, %s4907_s27  ;;  %s28_s24 = int_to_ptr.vmem [resolvable:$true] %s27_s24 }
  0x15   :  { %p4911_p9 = scmp.lt.u32.totalorder %s4907_s27, %s7860_s1 }
  0x17   :  { %p4913_p10 = pnand %p4911_p9, %p4908_p8 }
  0x19   :  { %4916 = shalt.err (!%p4913_p10)
}
  0x1a   :  { %s4917_s4 = scalar_lea.vmem %s28_s24, 20480  ;;  %p4922_p12 = scmp.lt.s32.totalorder %s28_s24, %s28_s24 }
  0x1b   :  { %p4918_p11 = scmp.ne.s32.totalorder %s28_s24, %s4917_s4  ;;  %p4923_p13 = scmp.lt.s32.totalorder %s4917_s4, %s4917_s4 }
  0x1d   :  { %p4924_p0 = por %p4923_p13, %p4922_p12 }
  0x1f   :  { %p4925_p1 = pnand %p4924_p0, %p4918_p11 }
  0x21   :  { %4928 = shalt.err (!%p4925_p1)
}
  0x22   :  { %33 = dma.hbm_to_vmem [thread:$0]  %s7860_s1, 20480, %s28_s24, [#allocation6], %s4958_s19, %s4958_s19, %s4959_s20  }
  0x23   :  { %4951 = dma.done.wait [#allocation3], 256  }
  0x24   :  { %4952 = vsyncadd [#allocation3], 4294967040 }
  0x25   :  { %4953 = dma.done.wait [#allocation6], 20480  }
  0x26   :  { %4954 = vsyncadd [#allocation6], 4294946816  ;;  %v7862_v0 = vlaneseq  ;;  %v40_v10 = vld [vmem:[#allocation2] sm:$0xff]  ;;  %v5085_v30 = vld [vmem:[#allocation5] sm:$0xff]  ;;  %vm873_vm0 = vcmask 261120   ;;  %vm1125_vm1 = vcmask 130112  }
  0x27   :  { %v5039_v11 = vld [vmem:[#allocation5 + $0x10] sm:$0xff]  ;;  %v5087_v31 = vld [vmem:[#allocation5 + $0xa0] sm:$0xff]  ;;  %v5113_v45 = vld [vmem:[#allocation5 + $0x18] sm:$0xff]  ;;  %vm1298_vm2 = vcmask 1041409   ;;  %vm1300_vm3 = vcmask 1042434   ;;  %vm1302_vm4 = vcmask 1043459  }
  0x28   :  { %v5013_v1 = vshrl.u32 %v7862_v0, 7  ;;  %8066 = vst [vmem:[#allocation19_spill] sm:$0xff] %v5039_v11  ;;  %v5041_v12 = vld [vmem:[#allocation5 + $0xb0] sm:$0xff]  ;;  %v5089_v32 = vld [vmem:[#allocation5 + $0x140] sm:$0xff]  ;;  %v5123_v50 = vld [vmem:[#allocation5 + $0xb8] sm:$0xff]  ;;  %vm1304_vm5 = vcmask 1044484  }
  0x29   :  { %8067 = vst [vmem:[#allocation20_spill] sm:$0xff] %v5041_v12  ;;  %v5049_v15 = vld [vmem:[#allocation5 + $0x150] sm:$0xff]  ;;  %v5097_v36 = vld [vmem:[#allocation5 + $0x1e0] sm:$0xff]  ;;  %v5125_v51 = vld [vmem:[#allocation5 + $0x158] sm:$0xff]  ;;  %vm1306_vm6 = vcmask 1045509   ;;  %vm1308_vm7 = vcmask 1046534  }
  0x2a   :  { %8058 = vst [vmem:[#allocation11_spill] sm:$0xff] %v5013_v1  ;;  %v5016_v2 = vsub.s32 0, %v5013_v1  ;;  %v5019_v3 = vsub.s32 1, %v5013_v1  ;;  %v5022_v4 = vsub.s32 2, %v5013_v1  ;;  %v5025_v5 = vsub.s32 3, %v5013_v1  ;;  %8070 = vst [vmem:[#allocation23_spill] sm:$0xff] %v5049_v15 }
  0x2b   :  { %v5028_v6 = vsub.s32 4, %v5013_v1  ;;  %v5031_v7 = vsub.s32 5, %v5013_v1  ;;  %v5034_v8 = vsub.s32 6, %v5013_v1  ;;  %v5037_v9 = vsub.s32 7, %v5013_v1  ;;  %v5054_v17 = vld [vmem:[#allocation5 + $0x1f0] sm:$0xff]  ;;  %v5099_v37 = vld [vmem:[#allocation5 + $0x280] sm:$0xff] }
  0x2c   :  { %8059 = vst [vmem:[#allocation12_spill] sm:$0xff] %v5019_v3  ;;  %8060 = vst [vmem:[#allocation13_spill] sm:$0xff] %v5022_v4  ;;  %v5044_v13 = vrot.slane %v40_v10, %v5016_v2  ;;  %v5047_v14 = vrot.slane %v40_v10, %v5019_v3  ;;  %v5052_v16 = vrot.slane %v40_v10, %v5022_v4  ;;  %v5059_v19 = vld [vmem:[#allocation5 + $0x290] sm:$0xff]  ;;  %v5101_v38 = vld [vmem:[#allocation5 + $0x320] sm:$0xff]  ;;  %vm1310_vm8 = vcmask 1047559   ;;  %s4965_s1 = smov 32  }
  0x2d   :  { %8061 = vst [vmem:[#allocation14_spill] sm:$0xff] %v5025_v5  ;;  %8062 = vst [vmem:[#allocation15_spill] sm:$0xff] %v5028_v6  ;;  %v5057_v18 = vrot.slane %v40_v10, %v5025_v5  ;;  %v5062_v20 = vrot.slane %v40_v10, %v5028_v6  ;;  %v5064_v21 = vld [vmem:[#allocation5 + $0x330] sm:$0xff]  ;;  %v5067_v22 = vrot.slane %v40_v10, %v5031_v7  ;;  %v5109_v43 = vld [vmem:[#allocation5 + $0x3c0] sm:$0xff]  ;;  %vm1325_vm9 = vcmask 130048   ;;  %s4966_s6 = smov 16  }
  0x2e   :  { %8063 = vst [vmem:[#allocation16_spill] sm:$0xff] %v5031_v7  ;;  %8064 = vst [vmem:[#allocation17_spill] sm:$0xff] %v5034_v8  ;;  %v5069_v23 = vld [vmem:[#allocation5 + $0x3d0] sm:$0xff]  ;;  %v5072_v24 = vrot.slane %v40_v10, %v5034_v8  ;;  %v5077_v26 = vrot.slane %v40_v10, %v5037_v9  ;;  %v72_v27 = vmul.f32 %v5044_v13, %v5039_v11  ;;  %v5111_v44 = vld [vmem:[#allocation5 + $0x460] sm:$0xff]  ;;  %vm1329_vm10 = vcmask 123904   ;;  %s4967_s7 = smov 64  }
  0x2f   :  { %8065 = vst [vmem:[#allocation18_spill] sm:$0xff] %v5037_v9  ;;  %8068 = vst [vmem:[#allocation21_spill] sm:$0xff] %v5044_v13  ;;  %v5074_v25 = vld [vmem:[#allocation5 + $0x470] sm:$0xff]  ;;  %v141_v28 = vmul.f32 %v5047_v14, %v5041_v12  ;;  %v250_v29 = vmul.f32 %v5052_v16, %v5049_v15  ;;  %v359_v33 = vmul.f32 %v5057_v18, %v5054_v17  ;;  %v5127_v52 = vld [vmem:[#allocation5 + $0x1f8] sm:$0xff]  ;;  %s4968_s8 = smov 48   ;;  %s4969_s9 = smov 96  }
  0x30   :  { %8069 = vst [vmem:[#allocation22_spill] sm:$0xff] %v5047_v14  ;;  %8071 = vst [vmem:[#allocation24_spill] sm:$0xff] %v5052_v16  ;;  %v468_v34 = vmul.f32 %v5062_v20, %v5059_v19  ;;  %v577_v35 = vmul.f32 %v5067_v22, %v5064_v21  ;;  %v686_v40 = vmul.f32 %v5072_v24, %v5069_v23  ;;  %v5133_v57 = vld [vmem:[#allocation5 + $0x298] sm:$0xff]  ;;  %v221_v0 = vld [vmem:[#allocation5 + $0x148] sm:$0xff]  ;;  %s4970_s10 = smov 80   ;;  %s4971_s11 = smov 112  }
  0x31   :  { %8072 = vst [vmem:[#allocation25_spill] sm:$0xff] %v5054_v17  ;;  %8073 = vst [vmem:[#allocation26_spill] sm:$0xff] %v5057_v18  ;;  %v181_v39 = vadd.f32 %v141_v28, %v72_v27  ;;  %v70_v41 = vmul.f32 %v5044_v13, %v5085_v30  ;;  %v139_v42 = vmul.f32 %v5047_v14, %v5087_v31  ;;  %v5135_v58 = vld [vmem:[#allocation5 + $0x338] sm:$0xff]  ;;  %v43_v27 = vld [vmem:[#allocation5 + $0x8] sm:$0xff]  ;;  %s4972_s12 = smov [#allocation7]  }
  0x32   :  { %8074 = vst [vmem:[#allocation27_spill] sm:$0xff] %v5059_v19  ;;  %8075 = vst [vmem:[#allocation28_spill] sm:$0xff] %v5064_v21  ;;  %v795_v46 = vmul.f32 %v5077_v26, %v5074_v25  ;;  %v248_v47 = vmul.f32 %v5052_v16, %v5089_v32  ;;  %v357_v48 = vmul.f32 %v5057_v18, %v5097_v36  ;;  %v5137_v59 = vld [vmem:[#allocation5 + $0x3d8] sm:$0xff]  ;;  %v112_v28 = vld [vmem:[#allocation5 + $0xa8] sm:$0xff]  ;;  %s4721_s13 = sshll.u32 %s4972_s12, 4  ;;  %s4722_s13 = int_to_ptr.vmem [resolvable:$true] %s4721_s13 }
  0x33   :  { %8076 = vst [vmem:[#allocation29_spill] sm:$0xff] %v5069_v23  ;;  %8077 = vst [vmem:[#allocation30_spill] sm:$0xff] %v5074_v25  ;;  %v466_v49 = vmul.f32 %v5062_v20, %v5099_v37  ;;  %v290_v53 = vadd.f32 %v250_v29, %v181_v39  ;;  %v179_v54 = vadd.f32 %v139_v42, %v70_v41  ;;  %v5147_v10 = vld [vmem:[#allocation5 + $0x478] sm:$0xff]  ;;  %v330_v1 = vld [vmem:[#allocation5 + $0x1e8] sm:$0xff]  ;;  %s4929_s14 = scalar_lea.vmem %s4722_s13, 64  ;;  %p4934_p3 = scmp.lt.s32.totalorder %s4722_s13, %s4722_s13 }
  0x34   :  { %8078 = vst [vmem:[#allocation31_spill] sm:$0xff] %v5111_v44  ;;  %v575_v55 = vmul.f32 %v5067_v22, %v5101_v38  ;;  %v684_v56 = vmul.f32 %v5072_v24, %v5109_v43  ;;  %8079 = vst [vmem:[#allocation32_spill] sm:$0xff] %v5133_v57  ;;  %v793_v60 = vmul.f32 %v5077_v26, %v5111_v44  ;;  %v439_v25 = vld [vmem:[#allocation5 + $0x288] sm:$0xff]  ;;  %v41_v12 = vld [vmem:[#allocation2 + $0x8] sm:$0xff]  ;;  %p4930_p2 = scmp.ne.s32.totalorder %s4722_s13, %s4929_s14  ;;  %p4935_p4 = scmp.lt.s32.totalorder %s4929_s14, %s4929_s14 }
  0x35   :  { %8080 = vst [vmem:[#allocation33_spill] sm:$0xff] %v5135_v58  ;;  %8081 = vst [vmem:[#allocation34_spill] sm:$0xff] %v5137_v59  ;;  %v73_v61 = vmul.f32 %v5044_v13, %v5113_v45  ;;  %v142_v62 = vmul.f32 %v5047_v14, %v5123_v50  ;;  %v251_v63 = vmul.f32 %v5052_v16, %v5125_v51  ;;  %v657_v15 = vld [vmem:[#allocation5 + $0x3c8] sm:$0xff] }
  0x36   :  { %v399_v29 = vadd.f32 %v359_v33, %v290_v53  ;;  %v288_v39 = vadd.f32 %v248_v47, %v179_v54  ;;  %v360_v41 = vmul.f32 %v5057_v18, %v5127_v52  ;;  %v469_v42 = vmul.f32 %v5062_v20, %v5133_v57  ;;  %v548_v33 = vld [vmem:[#allocation5 + $0x328] sm:$0xff]  ;;  %p4936_p5 = por %p4935_p4, %p4934_p3 }
  0x37   :  { %v182_v23 = vadd.f32 %v142_v62, %v73_v61  ;;  %v578_v21 = vmul.f32 %v5067_v22, %v5135_v58  ;;  %v687_v19 = vmul.f32 %v5072_v24, %v5137_v59  ;;  %v71_v17 = vmul.f32 %v5044_v13, %v43_v27 }
  0x38   :  { %v508_v47 = vadd.f32 %v468_v34, %v399_v29  ;;  %v397_v53 = vadd.f32 %v357_v48, %v288_v39  ;;  %v140_v54 = vmul.f32 %v5047_v14, %v112_v28  ;;  %v249_v44 = vmul.f32 %v5052_v16, %v221_v0  ;;  %p4937_p6 = pnand %p4936_p5, %p4930_p2 }
  0x39   :  { %v291_v11 = vadd.f32 %v251_v63, %v182_v23  ;;  %v796_v61 = vmul.f32 %v5077_v26, %v5147_v10  ;;  %v358_v62 = vmul.f32 %v5057_v18, %v330_v1  ;;  %v467_v58 = vmul.f32 %v5062_v20, %v439_v25 }
  0x3a   :  { %v617_v59 = vadd.f32 %v577_v35, %v508_v47  ;;  %v506_v57 = vadd.f32 %v466_v49, %v397_v53  ;;  %v180_v13 = vadd.f32 %v140_v54, %v71_v17  ;;  %v576_v34 = vmul.f32 %v5067_v22, %v548_v33 }
  0x3b   :  { %v400_v48 = vadd.f32 %v360_v41, %v291_v11  ;;  %v685_v29 = vmul.f32 %v5072_v24, %v657_v15  ;;  %v5167_v39 = vrot.slane %v41_v12, %v5016_v2  ;;  %v5170_v23 = vrot.slane %v41_v12, %v5019_v3 }
  0x3c   :  { %v726_v63 = vadd.f32 %v686_v40, %v617_v59  ;;  %v615_v16 = vadd.f32 %v575_v55, %v506_v57  ;;  %v289_v14 = vadd.f32 %v249_v44, %v180_v13  ;;  %v5173_v18 = vrot.slane %v41_v12, %v5022_v4  ;;  %v766_v55 = vld [vmem:[#allocation5 + $0x468] sm:$0xff] }
  0x3d   :  { %v509_v35 = vadd.f32 %v469_v42, %v400_v48  ;;  %v91_v17 = vmul.f32 %v5167_v39, %v43_v27  ;;  %v160_v49 = vmul.f32 %v5170_v23, %v112_v28  ;;  %v5178_v11 = vrot.slane %v41_v12, %v5025_v5 }
  0x3e   :  { %v5180_v41 = vadd.f32 %v795_v46, %v726_v63  ;;  %v724_v47 = vadd.f32 %v684_v56, %v615_v16  ;;  %v398_v53 = vadd.f32 %v358_v62, %v289_v14  ;;  %v269_v54 = vmul.f32 %v5173_v18, %v221_v0 }
  0x3f   :  { %v618_v40 = vadd.f32 %v578_v21, %v509_v35  ;;  %v200_v13 = vadd.f32 %v160_v49, %v91_v17  ;;  %v378_v44 = vmul.f32 %v5178_v11, %v330_v1  ;;  %v5185_v57 = vrot.slane %v41_v12, %v5028_v6  ;;  %v5675_v6 = vld [vmem:[#allocation5 + $0x458] sm:$0xff] }
  0x40   :  { %8082 = vst [vmem:[#allocation35_spill] sm:$0xff] %v5180_v41  ;;  %v880_v59 = vsel %vm873_vm0, %v5180_v41, 0.0  ;;  %v5189_v27 = vadd.f32 %v793_v60, %v724_v47  ;;  %v507_v28 = vadd.f32 %v467_v58, %v398_v53  ;;  %v5192_v46 = vrot.slane %v41_v12, %v5031_v7  ;;  %v5659_v7 = vld [vmem:[#allocation5 + $0x130] sm:$0xff] }
  0x41   :  { %881 = vadd.xlane.f32.xlu1 %v880_v59  ;;  %v727_v14 = vadd.f32 %v687_v19, %v618_v40  ;;  %v309_v0 = vadd.f32 %v269_v54, %v200_v13  ;;  %v487_v16 = vmul.f32 %v5185_v57, %v439_v25  ;;  %v5196_v21 = vrot.slane %v41_v12, %v5034_v8 }
  0x42   :  { %8083 = vst [vmem:[#allocation36_spill] sm:$0xff] %v5189_v27  ;;  %v874_v1 = vsel %vm873_vm0, %v5189_v27, 0.0  ;;  %v616_v56 = vadd.f32 %v576_v34, %v507_v28  ;;  %v794_v42 = vmul.f32 %v5077_v26, %v766_v55  ;;  %v596_v60 = vmul.f32 %v5192_v46, %v548_v33 }
  0x43   :  { %875 = vadd.xlane.f32.xlu0 %v874_v1  ;;  %v5202_v58 = vadd.f32 %v796_v61, %v727_v14  ;;  %v418_v62 = vadd.f32 %v378_v44, %v309_v0  ;;  %v5205_v19 = vrot.slane %v41_v12, %v5037_v9  ;;  %v90_v25 = vmul.f32 %v5167_v39, %v5085_v30  ;;  %v8086_v44 = vld [vmem:[#allocation32_spill] sm:$0xff] }
  0x44   :  { %v725_v48 = vadd.f32 %v685_v29, %v616_v56  ;;  %v159_v63 = vmul.f32 %v5170_v23, %v5087_v31  ;;  %v268_v34 = vmul.f32 %v5173_v18, %v5089_v32  ;;  %v705_v61 = vmul.f32 %v5196_v21, %v657_v15  ;;  %v8089_v0 = vld [vmem:[#allocation20_spill] sm:$0xff] }
  0x45   :  { %8084 = vst [vmem:[#allocation37_spill] sm:$0xff] %v5202_v58  ;;  %v883_v33 = vsel %vm873_vm0, %v5202_v58, 0.0  ;;  %v527_v35 = vadd.f32 %v487_v16, %v418_v62  ;;  %v377_v30 = vmul.f32 %v5178_v11, %v5097_v36  ;;  %v814_v49 = vmul.f32 %v5205_v19, %v766_v55  ;;  %v8090_v16 = vld [vmem:[#allocation23_spill] sm:$0xff]  ;;  %v8092_v62 = vld [vmem:[#allocation33_spill] sm:$0xff] }
  0x46   :  { %884 = vadd.xlane.f32.xlu1 %v883_v33  ;;  %v5216_v17 = vadd.f32 %v794_v42, %v725_v48  ;;  %v199_v12 = vadd.f32 %v159_v63, %v90_v25  ;;  %v93_v31 = vmul.f32 %v5167_v39, %v5113_v45  ;;  %v162_v32 = vmul.f32 %v5170_v23, %v5123_v50  ;;  %v116_v56 = vld [vmem:[#allocation5 + $0xc8] sm:$0xff]  ;;  %v8093_v48 = vld [vmem:[#allocation34_spill] sm:$0xff] }
  0x47   :  { %v636_v29 = vadd.f32 %v596_v60, %v527_v35  ;;  %v486_v53 = vmul.f32 %v5185_v57, %v5099_v37  ;;  %v271_v54 = vmul.f32 %v5173_v18, %v5125_v51  ;;  %v595_v40 = vmul.f32 %v5192_v46, %v5101_v38  ;;  %v8087_v37 = vld [vmem:[#allocation19_spill] sm:$0xff] }
  0x48   :  { %8085 = vst [vmem:[#allocation38_spill] sm:$0xff] %v5216_v17  ;;  %v877_v47 = vsel %vm873_vm0, %v5216_v17, 0.0  ;;  %v308_v15 = vadd.f32 %v268_v34, %v199_v12  ;;  %v202_v55 = vadd.f32 %v162_v32, %v93_v31  ;;  %v380_v45 = vmul.f32 %v5178_v11, %v5127_v52  ;;  %v47_v52 = vld [vmem:[#allocation5 + $0x28] sm:$0xff]  ;;  %v8094_v12 = vld [vmem:[#allocation25_spill] sm:$0xff] }
  0x49   :  { %878 = vadd.xlane.f32.xlu0 %v877_v47  ;;  %v745_v36 = vadd.f32 %v705_v61, %v636_v29  ;;  %v704_v13 = vmul.f32 %v5196_v21, %v5109_v43  ;;  %v489_v59 = vmul.f32 %v5185_v57, %v8086_v44  ;;  %v92_v28 = vmul.f32 %v5167_v39, %v8087_v37  ;;  %v8091_v60 = vld [vmem:[#allocation31_spill] sm:$0xff]  ;;  %v8095_v32 = vld [vmem:[#allocation21_spill] sm:$0xff]  ;;  %v8098_v44 = vld [vmem:[#allocation24_spill] sm:$0xff] }
  0x4a   :  { %v417_v50 = vadd.f32 %v377_v30, %v308_v15  ;;  %v311_v14 = vadd.f32 %v271_v54, %v202_v55  ;;  %v161_v38 = vmul.f32 %v5170_v23, %v8089_v0  ;;  %v270_v1 = vmul.f32 %v5173_v18, %v8090_v16  ;;  %v225_v34 = vld [vmem:[#allocation5 + $0x168] sm:$0xff]  ;;  %v8096_v15 = vld [vmem:[#allocation22_spill] sm:$0xff] }
  0x4b   :  { %v5241_v51 = vadd.f32 %v814_v49, %v745_v36  ;;  %v813_v43 = vmul.f32 %v5205_v19, %v8091_v60  ;;  %v598_v25 = vmul.f32 %v5192_v46, %v8092_v62  ;;  %v707_v63 = vmul.f32 %v5196_v21, %v8093_v48  ;;  %v5257_v29 = vld [vmem:[#allocation5 + $0x208] sm:$0xff]  ;;  %v224_v62 = vld [vmem:[#allocation5 + $0x160] sm:$0xff] }
  0x4c   :  { %v526_v42 = vadd.f32 %v486_v53, %v417_v50  ;;  %v420_v35 = vadd.f32 %v380_v45, %v311_v14  ;;  %v201_v61 = vadd.f32 %v161_v38, %v92_v28  ;;  %v379_v30 = vmul.f32 %v5178_v11, %v8094_v12  ;;  %v443_v54 = vld [vmem:[#allocation5 + $0x2a8] sm:$0xff]  ;;  %v46_v28 = vld [vmem:[#allocation5 + $0x20] sm:$0xff] }
  0x4d   :  { %8088 = vst [vmem:[#allocation32_spill] sm:$0xff] %v5241_v51  ;;  %v937_v33 = vsel %vm873_vm0, %v5241_v51, 0.0  ;;  %v816_v31 = vmul.f32 %v5205_v19, %v5147_v10  ;;  %v75_v47 = vmul.f32 %v8095_v32, %v47_v52  ;;  %v144_v53 = vmul.f32 %v8096_v15, %v116_v56  ;;  %v8097_v50 = vld [vmem:[#allocation27_spill] sm:$0xff]  ;;  %v8099_v38 = vld [vmem:[#allocation28_spill] sm:$0xff]  ;;  %v8100_v10 = vld [vmem:[#allocation26_spill] sm:$0xff] }
  0x4e   :  { %938 = vadd.xlane.f32.xlu1 %v937_v33  ;;  %v635_v49 = vadd.f32 %v595_v40, %v526_v42  ;;  %v529_v36 = vadd.f32 %v489_v59, %v420_v35  ;;  %v310_v55 = vadd.f32 %v270_v1, %v201_v61  ;;  %v488_v45 = vmul.f32 %v5185_v57, %v8097_v50  ;;  %v115_v14 = vld [vmem:[#allocation5 + $0xc0] sm:$0xff]  ;;  %v552_v60 = vld [vmem:[#allocation5 + $0x348] sm:$0xff]  ;;  %v8101_v1 = vld [vmem:[#allocation29_spill] sm:$0xff] }
  0x4f   :  { %v253_v37 = vmul.f32 %v8098_v44, %v225_v34  ;;  %v597_v40 = vmul.f32 %v5192_v46, %v8099_v38  ;;  %v184_v16 = vadd.f32 %v144_v53, %v75_v47  ;;  %v362_v42 = vmul.f32 %v8100_v10, %v5257_v29  ;;  %v333_v61 = vld [vmem:[#allocation5 + $0x200] sm:$0xff] }
  0x50   :  { %v744_v0 = vadd.f32 %v704_v13, %v635_v49  ;;  %v638_v48 = vadd.f32 %v598_v25, %v529_v36  ;;  %v419_v59 = vadd.f32 %v379_v30, %v310_v55  ;;  %v706_v33 = vmul.f32 %v5196_v21, %v8101_v1  ;;  %v661_v49 = vld [vmem:[#allocation5 + $0x3e8] sm:$0xff]  ;;  %v442_v30 = vld [vmem:[#allocation5 + $0x2a0] sm:$0xff] }
  0x51   :  { %v471_v35 = vmul.f32 %v5062_v20, %v443_v54  ;;  %v293_v13 = vadd.f32 %v253_v37, %v184_v16  ;;  %v74_v50 = vmul.f32 %v8095_v32, %v46_v28  ;;  %v143_v47 = vmul.f32 %v8096_v15, %v115_v14  ;;  %v8104_v16 = vld [vmem:[#allocation30_spill] sm:$0xff] }
  0x52   :  { %v5273_v12 = vadd.f32 %v813_v43, %v744_v0  ;;  %v747_v53 = vadd.f32 %v707_v63, %v638_v48  ;;  %v528_v38 = vadd.f32 %v488_v45, %v419_v59  ;;  %v580_v51 = vmul.f32 %v5067_v22, %v552_v60  ;;  %v770_v48 = vld [vmem:[#allocation5 + $0x488] sm:$0xff]  ;;  %v551_v59 = vld [vmem:[#allocation5 + $0x340] sm:$0xff] }
  0x53   :  { %v252_v25 = vmul.f32 %v8098_v44, %v224_v62  ;;  %v402_v55 = vadd.f32 %v362_v42, %v293_v13  ;;  %v183_v1 = vadd.f32 %v143_v47, %v74_v50  ;;  %v361_v43 = vmul.f32 %v8100_v10, %v333_v61 }
  0x54   :  { %8102 = vst [vmem:[#allocation19_spill] sm:$0xff] %v5273_v12  ;;  %v934_v36 = vsel %vm873_vm0, %v5273_v12, 0.0  ;;  %v5282_v37 = vadd.f32 %v816_v31, %v747_v53  ;;  %v637_v0 = vadd.f32 %v597_v40, %v528_v38  ;;  %v815_v63 = vmul.f32 %v5205_v19, %v8104_v16  ;;  %v660_v12 = vld [vmem:[#allocation5 + $0x3e0] sm:$0xff]  ;;  %v49_v16 = vld [vmem:[#allocation5 + $0x38] sm:$0xff] }
  0x55   :  { %935 = vadd.xlane.f32.xlu0 %v934_v36  ;;  %v689_v45 = vmul.f32 %v5072_v24, %v661_v49  ;;  %v511_v41 = vadd.f32 %v471_v35, %v402_v55  ;;  %v292_v58 = vadd.f32 %v252_v25, %v183_v1  ;;  %v470_v17 = vmul.f32 %v5062_v20, %v442_v30 }
  0x56   :  { %8103 = vst [vmem:[#allocation20_spill] sm:$0xff] %v5282_v37  ;;  %v95_v42 = vmul.f32 %v5167_v39, %v47_v52  ;;  %v943_v13 = vsel %vm873_vm0, %v5282_v37, 0.0  ;;  %v746_v31 = vadd.f32 %v706_v33, %v637_v0  ;;  %v164_v40 = vmul.f32 %v5170_v23, %v116_v56  ;;  %v769_v52 = vld [vmem:[#allocation5 + $0x480] sm:$0xff] }
  0x57   :  { %v273_v50 = vmul.f32 %v5173_v18, %v225_v34  ;;  %944 = vadd.xlane.f32.xlu1 %v943_v13  ;;  %v620_v47 = vadd.f32 %v580_v51, %v511_v41  ;;  %v798_v53 = vmul.f32 %v5077_v26, %v770_v48  ;;  %v401_v38 = vadd.f32 %v361_v43, %v292_v58 }
  0x58   :  { %v579_v35 = vmul.f32 %v5067_v22, %v551_v59  ;;  %v5295_v25 = vadd.f32 %v815_v63, %v746_v31  ;;  %v688_v36 = vmul.f32 %v5072_v24, %v660_v12  ;;  %v204_v55 = vadd.f32 %v164_v40, %v95_v42 }
  0x59   :  { %v382_v33 = vmul.f32 %v5178_v11, %v5257_v29  ;;  %v729_v1 = vadd.f32 %v689_v45, %v620_v47  ;;  %v510_v56 = vadd.f32 %v470_v17, %v401_v38  ;;  %v491_v34 = vmul.f32 %v5185_v57, %v443_v54  ;;  %v118_v54 = vld [vmem:[#allocation5 + $0xd8] sm:$0xff] }
  0x5a   :  { %8105 = vst [vmem:[#allocation23_spill] sm:$0xff] %v5295_v25  ;;  %v94_v41 = vmul.f32 %v5167_v39, %v46_v28  ;;  %v940_v58 = vsel %vm873_vm0, %v5295_v25, 0.0  ;;  %v313_v51 = vadd.f32 %v273_v50, %v204_v55  ;;  %v163_v43 = vmul.f32 %v5170_v23, %v115_v14  ;;  %v227_v45 = vld [vmem:[#allocation5 + $0x178] sm:$0xff] }
  0x5b   :  { %v272_v0 = vmul.f32 %v5173_v18, %v224_v62  ;;  %941 = vadd.xlane.f32.xlu0 %v940_v58  ;;  %v5306_v63 = vadd.f32 %v798_v53, %v729_v1  ;;  %v619_v42 = vadd.f32 %v579_v35, %v510_v56  ;;  %v797_v29 = vmul.f32 %v5077_v26, %v769_v52  ;;  %v336_v53 = vld [vmem:[#allocation5 + $0x218] sm:$0xff]  ;;  %v117_v1 = vld [vmem:[#allocation5 + $0xd0] sm:$0xff] }
  0x5c   :  { %v600_v17 = vmul.f32 %v5192_v46, %v552_v60  ;;  %v422_v28 = vadd.f32 %v382_v33, %v313_v51  ;;  %v709_v13 = vmul.f32 %v5196_v21, %v661_v49  ;;  %v203_v31 = vadd.f32 %v163_v43, %v94_v41  ;;  %v445_v49 = vld [vmem:[#allocation5 + $0x2b8] sm:$0xff]  ;;  %v48_v33 = vld [vmem:[#allocation5 + $0x30] sm:$0xff] }
  0x5d   :  { %8106 = vst [vmem:[#allocation31_spill] sm:$0xff] %v5306_v63  ;;  %v381_v40 = vmul.f32 %v5178_v11, %v333_v61  ;;  %v889_v14 = vsel %vm873_vm0, %v5306_v63, 0.0  ;;  %v728_v62 = vadd.f32 %v688_v36, %v619_v42  ;;  %v490_v50 = vmul.f32 %v5185_v57, %v442_v30  ;;  %v226_v41 = vld [vmem:[#allocation5 + $0x170] sm:$0xff] }
  0x5e   :  { %v77_v47 = vmul.f32 %v8095_v32, %v49_v16  ;;  %890 = vadd.xlane.f32.xlu1 %v889_v14  ;;  %v531_v38 = vadd.f32 %v491_v34, %v422_v28  ;;  %v312_v60 = vadd.f32 %v272_v0, %v203_v31  ;;  %v146_v35 = vmul.f32 %v8096_v15, %v118_v54  ;;  %v554_v0 = vld [vmem:[#allocation5 + $0x358] sm:$0xff]  ;;  %v335_v42 = vld [vmem:[#allocation5 + $0x210] sm:$0xff] }
  0x5f   :  { %v255_v55 = vmul.f32 %v8098_v44, %v227_v45  ;;  %v5318_v61 = vadd.f32 %v797_v29, %v728_v62  ;;  %v818_v56 = vmul.f32 %v5205_v19, %v770_v48  ;;  %v599_v36 = vmul.f32 %v5192_v46, %v551_v59  ;;  %v663_v31 = vld [vmem:[#allocation5 + $0x3f8] sm:$0xff]  ;;  %v444_v62 = vld [vmem:[#allocation5 + $0x2b0] sm:$0xff] }
  0x60   :  { %v708_v30 = vmul.f32 %v5196_v21, %v660_v12  ;;  %v640_v58 = vadd.f32 %v600_v17, %v531_v38  ;;  %v421_v51 = vadd.f32 %v381_v40, %v312_v60  ;;  %v186_v34 = vadd.f32 %v146_v35, %v77_v47 }
  0x61   :  { %8107 = vst [vmem:[#allocation33_spill] sm:$0xff] %v5318_v61  ;;  %v364_v43 = vmul.f32 %v8100_v10, %v336_v53  ;;  %v886_v28 = vsel %vm873_vm0, %v5318_v61, 0.0  ;;  %v473_v29 = vmul.f32 %v5062_v20, %v445_v49  ;;  %v76_v48 = vmul.f32 %v8095_v32, %v48_v33 }
  0x62   :  { %v145_v59 = vmul.f32 %v8096_v15, %v117_v1  ;;  %887 = vadd.xlane.f32.xlu0 %v886_v28  ;;  %v749_v12 = vadd.f32 %v709_v13, %v640_v58  ;;  %v530_v14 = vadd.f32 %v490_v50, %v421_v51  ;;  %v295_v17 = vadd.f32 %v255_v55, %v186_v34  ;;  %v553_v28 = vld [vmem:[#allocation5 + $0x350] sm:$0xff]  ;;  %v772_v13 = vld [vmem:[#allocation5 + $0x498] sm:$0xff] }
  0x63   :  { %v254_v40 = vmul.f32 %v8098_v44, %v226_v41  ;;  %v817_v47 = vmul.f32 %v5205_v19, %v769_v52  ;;  %v582_v38 = vmul.f32 %v5067_v22, %v554_v0  ;;  %v363_v35 = vmul.f32 %v8100_v10, %v335_v42  ;;  %v662_v58 = vld [vmem:[#allocation5 + $0x3f0] sm:$0xff] }
  0x64   :  { %v185_v60 = vadd.f32 %v145_v59, %v76_v48  ;;  %v5333_v25 = vadd.f32 %v818_v56, %v749_v12  ;;  %v639_v37 = vadd.f32 %v599_v36, %v530_v14  ;;  %v404_v61 = vadd.f32 %v364_v43, %v295_v17 }
  0x65   :  { %v691_v63 = vmul.f32 %v5072_v24, %v663_v31  ;;  %v472_v55 = vmul.f32 %v5062_v20, %v444_v62  ;;  %v97_v51 = vmul.f32 %v5167_v39, %v49_v16  ;;  %v166_v52 = vmul.f32 %v5170_v23, %v118_v54 }
  0x66   :  { %8108 = vst [vmem:[#allocation34_spill] sm:$0xff] %v5333_v25  ;;  %v294_v50 = vadd.f32 %v254_v40, %v185_v60  ;;  %v949_v34 = vsel %vm873_vm0, %v5333_v25, 0.0  ;;  %v748_v48 = vadd.f32 %v708_v30, %v639_v37  ;;  %v513_v56 = vadd.f32 %v473_v29, %v404_v61  ;;  %v771_v60 = vld [vmem:[#allocation5 + $0x490] sm:$0xff] }
  0x67   :  { %v275_v36 = vmul.f32 %v5173_v18, %v227_v45  ;;  %950 = vadd.xlane.f32.xlu1 %v949_v34  ;;  %v581_v59 = vmul.f32 %v5067_v22, %v553_v28  ;;  %v206_v12 = vadd.f32 %v166_v52, %v97_v51  ;;  %v384_v14 = vmul.f32 %v5178_v11, %v336_v53  ;;  %v120_v52 = vld [vmem:[#allocation5 + $0xe8] sm:$0xff] }
  0x68   :  { %v403_v43 = vadd.f32 %v363_v35, %v294_v50  ;;  %v5344_v17 = vadd.f32 %v817_v47, %v748_v48  ;;  %v622_v40 = vadd.f32 %v582_v38, %v513_v56  ;;  %v800_v16 = vmul.f32 %v5077_v26, %v772_v13  ;;  %v51_v38 = vld [vmem:[#allocation5 + $0x48] sm:$0xff] }
  0x69   :  { %v690_v54 = vmul.f32 %v5072_v24, %v662_v58  ;;  %v315_v37 = vadd.f32 %v275_v36, %v206_v12  ;;  %v493_v61 = vmul.f32 %v5185_v57, %v445_v49  ;;  %v96_v45 = vmul.f32 %v5167_v39, %v48_v33  ;;  %v229_v49 = vld [vmem:[#allocation5 + $0x188] sm:$0xff] }
  0x6a   :  { %8109 = vst [vmem:[#allocation25_spill] sm:$0xff] %v5344_v17  ;;  %v512_v25 = vadd.f32 %v472_v55, %v403_v43  ;;  %v946_v30 = vsel %vm873_vm0, %v5344_v17, 0.0  ;;  %v731_v29 = vadd.f32 %v691_v63, %v622_v40  ;;  %v165_v53 = vmul.f32 %v5170_v23, %v117_v1  ;;  %v338_v36 = vld [vmem:[#allocation5 + $0x228] sm:$0xff] }
  0x6b   :  { %v274_v47 = vmul.f32 %v5173_v18, %v226_v41  ;;  %947 = vadd.xlane.f32.xlu0 %v946_v30  ;;  %v799_v50 = vmul.f32 %v5077_v26, %v771_v60  ;;  %v424_v51 = vadd.f32 %v384_v14, %v315_v37  ;;  %v602_v55 = vmul.f32 %v5192_v46, %v554_v0  ;;  %v447_v14 = vld [vmem:[#allocation5 + $0x2c8] sm:$0xff]  ;;  %v228_v37 = vld [vmem:[#allocation5 + $0x180] sm:$0xff] }
  0x6c   :  { %v621_v35 = vadd.f32 %v581_v59, %v512_v25  ;;  %v5356_v34 = vadd.f32 %v800_v16, %v731_v29  ;;  %v711_v33 = vmul.f32 %v5196_v21, %v663_v31  ;;  %v205_v48 = vadd.f32 %v165_v53, %v96_v45  ;;  %v50_v31 = vld [vmem:[#allocation5 + $0x40] sm:$0xff]  ;;  %v556_v53 = vld [vmem:[#allocation5 + $0x368] sm:$0xff] }
  0x6d   :  { %v383_v63 = vmul.f32 %v5178_v11, %v335_v42  ;;  %v533_v56 = vadd.f32 %v493_v61, %v424_v51  ;;  %v492_v41 = vmul.f32 %v5185_v57, %v444_v62  ;;  %v79_v25 = vmul.f32 %v8095_v32, %v51_v38 }
  0x6e   :  { %8110 = vst [vmem:[#allocation21_spill] sm:$0xff] %v5356_v34  ;;  %v730_v1 = vadd.f32 %v690_v54, %v621_v35  ;;  %v895_v43 = vsel %vm873_vm0, %v5356_v34, 0.0  ;;  %v314_v0 = vadd.f32 %v274_v47, %v205_v48  ;;  %v148_v59 = vmul.f32 %v8096_v15, %v120_v52  ;;  %v119_v54 = vld [vmem:[#allocation5 + $0xe0] sm:$0xff]  ;;  %v665_v47 = vld [vmem:[#allocation5 + $0x408] sm:$0xff] }
  0x6f   :  { %v257_v12 = vmul.f32 %v8098_v44, %v229_v49  ;;  %896 = vadd.xlane.f32.xlu1 %v895_v43  ;;  %v642_v42 = vadd.f32 %v602_v55, %v533_v56  ;;  %v820_v16 = vmul.f32 %v5205_v19, %v772_v13  ;;  %v601_v62 = vmul.f32 %v5192_v46, %v553_v28  ;;  %v337_v55 = vld [vmem:[#allocation5 + $0x220] sm:$0xff] }
  0x70   :  { %v5366_v40 = vadd.f32 %v799_v50, %v730_v1  ;;  %v423_v61 = vadd.f32 %v383_v63, %v314_v0  ;;  %v710_v45 = vmul.f32 %v5196_v21, %v662_v58  ;;  %v188_v30 = vadd.f32 %v148_v59, %v79_v25  ;;  %v446_v1 = vld [vmem:[#allocation5 + $0x2c0] sm:$0xff] }
  0x71   :  { %v366_v29 = vmul.f32 %v8100_v10, %v338_v36  ;;  %v751_v50 = vadd.f32 %v711_v33, %v642_v42  ;;  %v475_v51 = vmul.f32 %v5062_v20, %v447_v14  ;;  %v78_v13 = vmul.f32 %v8095_v32, %v50_v31  ;;  %v774_v42 = vld [vmem:[#allocation5 + $0x4a8] sm:$0xff] }
  0x72   :  { %8111 = vst [vmem:[#allocation22_spill] sm:$0xff] %v5366_v40  ;;  %v892_v35 = vsel %vm873_vm0, %v5366_v40, 0.0  ;;  %v532_v28 = vadd.f32 %v492_v41, %v423_v61  ;;  %v297_v48 = vadd.f32 %v257_v12, %v188_v30  ;;  %v147_v63 = vmul.f32 %v8096_v15, %v119_v54  ;;  %v555_v12 = vld [vmem:[#allocation5 + $0x360] sm:$0xff] }
  0x73   :  { %893 = vadd.xlane.f32.xlu0 %v892_v35  ;;  %v256_v58 = vmul.f32 %v8098_v44, %v228_v37  ;;  %v5378_v56 = vadd.f32 %v820_v16, %v751_v50  ;;  %v819_v25 = vmul.f32 %v5205_v19, %v771_v60  ;;  %v584_v43 = vmul.f32 %v5067_v22, %v556_v53  ;;  %v664_v16 = vld [vmem:[#allocation5 + $0x400] sm:$0xff] }
  0x74   :  { %v693_v33 = vmul.f32 %v5072_v24, %v665_v47  ;;  %v641_v0 = vadd.f32 %v601_v62, %v532_v28  ;;  %v406_v59 = vadd.f32 %v366_v29, %v297_v48  ;;  %v187_v17 = vadd.f32 %v147_v63, %v78_v13 }
  0x75   :  { %8112 = vst [vmem:[#allocation27_spill] sm:$0xff] %v5378_v56  ;;  %v365_v41 = vmul.f32 %v8100_v10, %v337_v55  ;;  %v955_v61 = vsel %vm873_vm0, %v5378_v56, 0.0  ;;  %v474_v30 = vmul.f32 %v5062_v20, %v446_v1  ;;  %v99_v35 = vmul.f32 %v5167_v39, %v51_v38 }
  0x76   :  { %v168_v60 = vmul.f32 %v5170_v23, %v120_v52  ;;  %956 = vadd.xlane.f32.xlu1 %v955_v61  ;;  %v750_v50 = vadd.f32 %v710_v45, %v641_v0  ;;  %v515_v40 = vadd.f32 %v475_v51, %v406_v59  ;;  %v296_v62 = vadd.f32 %v256_v58, %v187_v17  ;;  %v773_v52 = vld [vmem:[#allocation5 + $0x4a0] sm:$0xff] }
  0x77   :  { %v277_v29 = vmul.f32 %v5173_v18, %v229_v49  ;;  %v802_v13 = vmul.f32 %v5077_v26, %v774_v42  ;;  %v583_v28 = vmul.f32 %v5067_v22, %v555_v12  ;;  %v386_v63 = vmul.f32 %v5178_v11, %v338_v36 }
  0x78   :  { %v208_v48 = vadd.f32 %v168_v60, %v99_v35  ;;  %v5393_v56 = vadd.f32 %v819_v25, %v750_v50  ;;  %v624_v34 = vadd.f32 %v584_v43, %v515_v40  ;;  %v405_v27 = vadd.f32 %v365_v41, %v296_v62  ;;  %v53_v25 = vld [vmem:[#allocation5 + $0x58] sm:$0xff] }
  0x79   :  { %v692_v38 = vmul.f32 %v5072_v24, %v664_v16  ;;  %v495_v45 = vmul.f32 %v5185_v57, %v447_v14  ;;  %v98_v17 = vmul.f32 %v5167_v39, %v50_v31  ;;  %v167_v49 = vmul.f32 %v5170_v23, %v119_v54  ;;  %v122_v14 = vld [vmem:[#allocation5 + $0xf8] sm:$0xff] }
  0x7a   :  { %8113 = vst [vmem:[#allocation24_spill] sm:$0xff] %v5393_v56  ;;  %v317_v61 = vadd.f32 %v277_v29, %v208_v48  ;;  %v952_v51 = vsel %vm873_vm0, %v5393_v56, 0.0  ;;  %v733_v58 = vadd.f32 %v693_v33, %v624_v34  ;;  %v514_v0 = vadd.f32 %v474_v30, %v405_v27  ;;  %v231_v35 = vld [vmem:[#allocation5 + $0x198] sm:$0xff]  ;;  %v775_v56 = vld [vmem:[#allocation5 + $0x4b0] sm:$0xff] }
  0x7b   :  { %v276_v36 = vmul.f32 %v5173_v18, %v228_v37  ;;  %953 = vadd.xlane.f32.xlu0 %v952_v51  ;;  %v604_v43 = vmul.f32 %v5192_v46, %v556_v53  ;;  %v207_v59 = vadd.f32 %v167_v49, %v98_v17  ;;  %v385_v41 = vmul.f32 %v5178_v11, %v337_v55  ;;  %v340_v50 = vld [vmem:[#allocation5 + $0x238] sm:$0xff] }
  0x7c   :  { %v426_v40 = vadd.f32 %v386_v63, %v317_v61  ;;  %v5404_v31 = vadd.f32 %v802_v13, %v733_v58  ;;  %v623_v54 = vadd.f32 %v583_v28, %v514_v0  ;;  %v801_v60 = vmul.f32 %v5077_v26, %v773_v52  ;;  %v449_v13 = vld [vmem:[#allocation5 + $0x2d8] sm:$0xff]  ;;  %v52_v28 = vld [vmem:[#allocation5 + $0x50] sm:$0xff] }
  0x7d   :  { %v713_v34 = vmul.f32 %v5196_v21, %v665_v47  ;;  %v316_v33 = vadd.f32 %v276_v36, %v207_v59  ;;  %v494_v37 = vmul.f32 %v5185_v57, %v446_v1  ;;  %v81_v30 = vmul.f32 %v8095_v32, %v53_v25  ;;  %v121_v61 = vld [vmem:[#allocation5 + $0xf0] sm:$0xff]  ;;  %v558_v58 = vld [vmem:[#allocation5 + $0x378] sm:$0xff] }
  0x7e   :  { %8114 = vst [vmem:[#allocation28_spill] sm:$0xff] %v5404_v31  ;;  %v535_v27 = vadd.f32 %v495_v45, %v426_v40  ;;  %v901_v53 = vsel %vm873_vm0, %v5404_v31, 0.0  ;;  %v732_v55 = vadd.f32 %v692_v38, %v623_v54  ;;  %v150_v62 = vmul.f32 %v8096_v15, %v122_v14  ;;  %v230_v45 = vld [vmem:[#allocation5 + $0x190] sm:$0xff] }
  0x7f   :  { %v259_v29 = vmul.f32 %v8098_v44, %v231_v35  ;;  %902 = vadd.xlane.f32.xlu1 %v901_v53  ;;  %v822_v47 = vmul.f32 %v5205_v19, %v774_v42  ;;  %v425_v63 = vadd.f32 %v385_v41, %v316_v33  ;;  %v603_v1 = vmul.f32 %v5192_v46, %v555_v12  ;;  %v339_v59 = vld [vmem:[#allocation5 + $0x230] sm:$0xff] }
  0x80   :  { %v644_v48 = vadd.f32 %v604_v43, %v535_v27  ;;  %v5416_v17 = vadd.f32 %v801_v60, %v732_v55  ;;  %v712_v49 = vmul.f32 %v5196_v21, %v664_v16  ;;  %v190_v38 = vadd.f32 %v150_v62, %v81_v30  ;;  %v667_v43 = vld [vmem:[#allocation5 + $0x418] sm:$0xff]  ;;  %v448_v60 = vld [vmem:[#allocation5 + $0x2d0] sm:$0xff] }
  0x81   :  { %v368_v51 = vmul.f32 %v8100_v10, %v340_v50  ;;  %v534_v36 = vadd.f32 %v494_v37, %v425_v63  ;;  %v477_v40 = vmul.f32 %v5062_v20, %v449_v13  ;;  %v80_v42 = vmul.f32 %v8095_v32, %v52_v28  ;;  %v5431_v55 = vld [vmem:[#allocation5 + $0x4b8] sm:$0xff]  ;;  %v666_v63 = vld [vmem:[#allocation5 + $0x410] sm:$0xff] }
  0x82   :  { %8115 = vst [vmem:[#allocation26_spill] sm:$0xff] %v5416_v17  ;;  %v753_v0 = vadd.f32 %v713_v34, %v644_v48  ;;  %v898_v12 = vsel %vm873_vm0, %v5416_v17, 0.0  ;;  %v299_v41 = vadd.f32 %v259_v29, %v190_v38  ;;  %v149_v54 = vmul.f32 %v8096_v15, %v121_v61  ;;  %v557_v48 = vld [vmem:[#allocation5 + $0x370] sm:$0xff] }
  0x83   :  { %v258_v16 = vmul.f32 %v8098_v44, %v230_v45  ;;  %899 = vadd.xlane.f32.xlu0 %v898_v12  ;;  %v643_v34 = vadd.f32 %v603_v1, %v534_v36  ;;  %v821_v33 = vmul.f32 %v5205_v19, %v773_v52  ;;  %v586_v37 = vmul.f32 %v5067_v22, %v558_v58 }
  0x84   :  { %v5426_v27 = vadd.f32 %v822_v47, %v753_v0  ;;  %v408_v30 = vadd.f32 %v368_v51, %v299_v41  ;;  %v695_v53 = vmul.f32 %v5072_v24, %v667_v43  ;;  %v189_v62 = vadd.f32 %v149_v54, %v80_v42 }
  0x85   :  { %v367_v29 = vmul.f32 %v8100_v10, %v339_v59  ;;  %v752_v47 = vadd.f32 %v712_v49, %v643_v34  ;;  %v476_v1 = vmul.f32 %v5062_v20, %v448_v60  ;;  %v101_v52 = vmul.f32 %v5167_v39, %v53_v25 }
  0x86   :  { %8116 = vst [vmem:[#allocation29_spill] sm:$0xff] %v5426_v27  ;;  %v961_v38 = vsel %vm873_vm0, %v5426_v27, 0.0  ;;  %v517_v0 = vadd.f32 %v477_v40, %v408_v30  ;;  %v298_v51 = vadd.f32 %v258_v16, %v189_v62  ;;  %v170_v36 = vmul.f32 %v5170_v23, %v122_v14 }
  0x87   :  { %962 = vadd.xlane.f32.xlu1 %v961_v38  ;;  %v279_v12 = vmul.f32 %v5173_v18, %v231_v35  ;;  %v5440_v42 = vadd.f32 %v821_v33, %v752_v47  ;;  %v804_v41 = vmul.f32 %v5077_v26, %v5431_v55  ;;  %v585_v54 = vmul.f32 %v5067_v22, %v557_v48  ;;  %v124_v47 = vld [vmem:[#allocation5 + $0x108] sm:$0xff] }
  0x88   :  { %v694_v49 = vmul.f32 %v5072_v24, %v666_v63  ;;  %v626_v34 = vadd.f32 %v586_v37, %v517_v0  ;;  %v407_v27 = vadd.f32 %v367_v29, %v298_v51  ;;  %v210_v25 = vadd.f32 %v170_v36, %v101_v52  ;;  %v55_v29 = vld [vmem:[#allocation5 + $0x68] sm:$0xff] }
  0x89   :  { %8117 = vst [vmem:[#allocation30_spill] sm:$0xff] %v5440_v42  ;;  %v388_v40 = vmul.f32 %v5178_v11, %v340_v50  ;;  %v958_v14 = vsel %vm873_vm0, %v5440_v42, 0.0  ;;  %v497_v35 = vmul.f32 %v5185_v57, %v449_v13  ;;  %v100_v16 = vmul.f32 %v5167_v39, %v52_v28  ;;  %v233_v13 = vld [vmem:[#allocation5 + $0x1a8] sm:$0xff] }
  0x8a   :  { %v169_v33 = vmul.f32 %v5170_v23, %v121_v61  ;;  %959 = vadd.xlane.f32.xlu0 %v958_v14  ;;  %v735_v30 = vadd.f32 %v695_v53, %v626_v34  ;;  %v516_v62 = vadd.f32 %v476_v1, %v407_v27  ;;  %v319_v38 = vadd.f32 %v279_v12, %v210_v25  ;;  %v5459_v27 = vld [vmem:[#allocation5 + $0x248] sm:$0xff] }
  0x8b   :  { %v278_v37 = vmul.f32 %v5173_v18, %v230_v45  ;;  %v803_v52 = vmul.f32 %v5077_v26, %v775_v56  ;;  %v606_v50 = vmul.f32 %v5192_v46, %v558_v58  ;;  %v387_v51 = vmul.f32 %v5178_v11, %v339_v59 }
  0x8c   :  { %v209_v0 = vadd.f32 %v169_v33, %v100_v16  ;;  %v5456_v36 = vadd.f32 %v804_v41, %v735_v30  ;;  %v625_v28 = vadd.f32 %v585_v54, %v516_v62  ;;  %v428_v61 = vadd.f32 %v388_v40, %v319_v38  ;;  %v451_v54 = vld [vmem:[#allocation5 + $0x2e8] sm:$0xff]  ;;  %v54_v40 = vld [vmem:[#allocation5 + $0x60] sm:$0xff] }
  0x8d   :  { %v715_v53 = vmul.f32 %v5196_v21, %v667_v43  ;;  %v496_v45 = vmul.f32 %v5185_v57, %v448_v60  ;;  %v83_v12 = vmul.f32 %v8095_v32, %v55_v29  ;;  %v152_v34 = vmul.f32 %v8096_v15, %v124_v47  ;;  %v123_v33 = vld [vmem:[#allocation5 + $0x100] sm:$0xff] }
  0x8e   :  { %8118 = vst [vmem:[#allocation39_spill] sm:$0xff] %v5456_v36  ;;  %v318_v1 = vadd.f32 %v278_v37, %v209_v0  ;;  %v907_v58 = vsel %vm873_vm0, %v5456_v36, 0.0  ;;  %v734_v59 = vadd.f32 %v694_v49, %v625_v28  ;;  %v537_v25 = vadd.f32 %v497_v35, %v428_v61  ;;  %v232_v30 = vld [vmem:[#allocation5 + $0x1a0] sm:$0xff]  ;;  %v560_v37 = vld [vmem:[#allocation5 + $0x388] sm:$0xff] }
  0x8f   :  { %v261_v41 = vmul.f32 %v8098_v44, %v233_v13  ;;  %908 = vadd.xlane.f32.xlu1 %v907_v58  ;;  %v605_v14 = vmul.f32 %v5192_v46, %v557_v48  ;;  %v192_v16 = vadd.f32 %v152_v34, %v83_v12  ;;  %v370_v60 = vmul.f32 %v8100_v10, %v5459_v27  ;;  %v669_v48 = vld [vmem:[#allocation5 + $0x428] sm:$0xff] }
  0x90   :  { %v427_v43 = vadd.f32 %v387_v51, %v318_v1  ;;  %v5470_v62 = vadd.f32 %v803_v52, %v734_v59  ;;  %v646_v38 = vadd.f32 %v606_v50, %v537_v25  ;;  %v824_v49 = vmul.f32 %v5205_v19, %v5431_v55  ;;  %v341_v1 = vld [vmem:[#allocation5 + $0x240] sm:$0xff] }
  0x91   :  { %v714_v35 = vmul.f32 %v5196_v21, %v666_v63  ;;  %v301_v28 = vadd.f32 %v261_v41, %v192_v16  ;;  %v479_v51 = vmul.f32 %v5062_v20, %v451_v54  ;;  %v82_v61 = vmul.f32 %v8095_v32, %v54_v40  ;;  %v450_v55 = vld [vmem:[#allocation5 + $0x2e0] sm:$0xff] }
  0x92   :  { %8119 = vst [vmem:[#allocation40_spill] sm:$0xff] %v5470_v62  ;;  %v536_v0 = vadd.f32 %v496_v45, %v427_v43  ;;  %v904_v12 = vsel %vm873_vm0, %v5470_v62, 0.0  ;;  %v755_v52 = vadd.f32 %v715_v53, %v646_v38  ;;  %v151_v50 = vmul.f32 %v8096_v15, %v123_v33  ;;  %v778_v43 = vld [vmem:[#allocation5 + $0x4c8] sm:$0xff]  ;;  %v559_v38 = vld [vmem:[#allocation5 + $0x380] sm:$0xff] }
  0x93   :  { %v260_v34 = vmul.f32 %v8098_v44, %v232_v30  ;;  %905 = vadd.xlane.f32.xlu0 %v904_v12  ;;  %v823_v45 = vmul.f32 %v5205_v19, %v775_v56  ;;  %v410_v58 = vadd.f32 %v370_v60, %v301_v28  ;;  %v588_v59 = vmul.f32 %v5067_v22, %v560_v37  ;;  %v668_v12 = vld [vmem:[#allocation5 + $0x420] sm:$0xff] }
  0x94   :  { %v645_v63 = vadd.f32 %v605_v14, %v536_v0  ;;  %v5483_v25 = vadd.f32 %v824_v49, %v755_v52  ;;  %v697_v41 = vmul.f32 %v5072_v24, %v669_v48  ;;  %v191_v16 = vadd.f32 %v151_v50, %v82_v61 }
  0x95   :  { %v369_v53 = vmul.f32 %v8100_v10, %v341_v1  ;;  %v519_v62 = vadd.f32 %v479_v51, %v410_v58  ;;  %v478_v36 = vmul.f32 %v5062_v20, %v450_v55  ;;  %v103_v14 = vmul.f32 %v5167_v39, %v55_v29  ;;  %v5498_v29 = vld [vmem:[#allocation5 + $0x4c0] sm:$0xff] }
  0x96   :  { %8120 = vst [vmem:[#allocation41_spill] sm:$0xff] %v5483_v25  ;;  %v754_v42 = vadd.f32 %v714_v35, %v645_v63  ;;  %v967_v56 = vsel %vm873_vm0, %v5483_v25, 0.0  ;;  %v300_v60 = vadd.f32 %v260_v34, %v191_v16  ;;  %v172_v49 = vmul.f32 %v5170_v23, %v124_v47 }
  0x97   :  { %v281_v0 = vmul.f32 %v5173_v18, %v233_v13  ;;  %968 = vadd.xlane.f32.xlu1 %v967_v56  ;;  %v628_v61 = vadd.f32 %v588_v59, %v519_v62  ;;  %v806_v35 = vmul.f32 %v5077_v26, %v778_v43  ;;  %v587_v51 = vmul.f32 %v5067_v22, %v559_v38 }
  0x98   :  { %v5493_v28 = vadd.f32 %v823_v45, %v754_v42  ;;  %v409_v52 = vadd.f32 %v369_v53, %v300_v60  ;;  %v696_v50 = vmul.f32 %v5072_v24, %v668_v12  ;;  %v212_v63 = vadd.f32 %v172_v49, %v103_v14  ;;  %v57_v53 = vld [vmem:[#allocation5 + $0x78] sm:$0xff] }
  0x99   :  { %v390_v34 = vmul.f32 %v5178_v11, %v5459_v27  ;;  %v737_v13 = vadd.f32 %v697_v41, %v628_v61  ;;  %v499_v42 = vmul.f32 %v5185_v57, %v451_v54  ;;  %v102_v62 = vmul.f32 %v5167_v39, %v54_v40  ;;  %v126_v14 = vld [vmem:[#allocation5 + $0x118] sm:$0xff] }
  0x9a   :  { %8121 = vst [vmem:[#allocation42_spill] sm:$0xff] %v5493_v28  ;;  %v964_v47 = vsel %vm873_vm0, %v5493_v28, 0.0  ;;  %v518_v45 = vadd.f32 %v478_v36, %v409_v52  ;;  %v321_v58 = vadd.f32 %v281_v0, %v212_v63  ;;  %v171_v59 = vmul.f32 %v5170_v23, %v123_v33  ;;  %v235_v60 = vld [vmem:[#allocation5 + $0x1b8] sm:$0xff] }
  0x9b   :  { %965 = vadd.xlane.f32.xlu0 %v964_v47  ;;  %v280_v16 = vmul.f32 %v5173_v18, %v232_v30  ;;  %v5508_v56 = vadd.f32 %v806_v35, %v737_v13  ;;  %v805_v27 = vmul.f32 %v5077_v26, %v5498_v29  ;;  %v608_v41 = vmul.f32 %v5192_v46, %v560_v37  ;;  %v5515_v33 = vld [vmem:[#allocation5 + $0x258] sm:$0xff]  ;;  %v56_v47 = vld [vmem:[#allocation5 + $0x70] sm:$0xff] }
  0x9c   :  { %v717_v54 = vmul.f32 %v5196_v21, %v669_v48  ;;  %v627_v40 = vadd.f32 %v587_v51, %v518_v45  ;;  %v430_v49 = vadd.f32 %v390_v34, %v321_v58  ;;  %v211_v36 = vadd.f32 %v171_v59, %v102_v62  ;;  %v453_v34 = vld [vmem:[#allocation5 + $0x2f8] sm:$0xff]  ;;  %v234_v58 = vld [vmem:[#allocation5 + $0x1b0] sm:$0xff] }
  0x9d   :  { %8122 = vst [vmem:[#allocation43_spill] sm:$0xff] %v5508_v56  ;;  %v389_v0 = vmul.f32 %v5178_v11, %v341_v1  ;;  %v913_v30 = vsel %vm873_vm0, %v5508_v56, 0.0  ;;  %v498_v61 = vmul.f32 %v5185_v57, %v450_v55  ;;  %v85_v35 = vmul.f32 %v8095_v32, %v57_v53  ;;  %v125_v1 = vld [vmem:[#allocation5 + $0x110] sm:$0xff]  ;;  %v671_v56 = vld [vmem:[#allocation5 + $0x438] sm:$0xff] }
  0x9e   :  { %v154_v52 = vmul.f32 %v8096_v15, %v126_v14  ;;  %914 = vadd.xlane.f32.xlu1 %v913_v30  ;;  %v736_v37 = vadd.f32 %v696_v50, %v627_v40  ;;  %v539_v48 = vadd.f32 %v499_v42, %v430_v49  ;;  %v320_v63 = vadd.f32 %v280_v16, %v211_v36  ;;  %v562_v16 = vld [vmem:[#allocation5 + $0x398] sm:$0xff]  ;;  %v343_v40 = vld [vmem:[#allocation5 + $0x250] sm:$0xff] }
  0x9f   :  { %v263_v51 = vmul.f32 %v8098_v44, %v235_v60  ;;  %v826_v13 = vmul.f32 %v5205_v19, %v778_v43  ;;  %v607_v62 = vmul.f32 %v5192_v46, %v559_v38  ;;  %v372_v55 = vmul.f32 %v8100_v10, %v5515_v33 }
  0xa0   :  { %v194_v45 = vadd.f32 %v154_v52, %v85_v35  ;;  %v5527_v59 = vadd.f32 %v805_v27, %v736_v37  ;;  %v648_v30 = vadd.f32 %v608_v41, %v539_v48  ;;  %v429_v50 = vadd.f32 %v389_v0, %v320_v63  ;;  %v452_v0 = vld [vmem:[#allocation5 + $0x2f0] sm:$0xff] }
  0xa1   :  { %v716_v42 = vmul.f32 %v5196_v21, %v668_v12  ;;  %v481_v36 = vmul.f32 %v5062_v20, %v453_v34  ;;  %v84_v43 = vmul.f32 %v8095_v32, %v56_v47  ;;  %v153_v38 = vmul.f32 %v8096_v15, %v125_v1 }
  0xa2   :  { %8123 = vst [vmem:[#allocation44_spill] sm:$0xff] %v5527_v59  ;;  %v303_v49 = vadd.f32 %v263_v51, %v194_v45  ;;  %v910_v35 = vsel %vm873_vm0, %v5527_v59, 0.0  ;;  %v757_v52 = vadd.f32 %v717_v54, %v648_v30  ;;  %v538_v27 = vadd.f32 %v498_v61, %v429_v50  ;;  %v780_v54 = vld [vmem:[#allocation5 + $0x4d8] sm:$0xff]  ;;  %v561_v61 = vld [vmem:[#allocation5 + $0x390] sm:$0xff] }
  0xa3   :  { %v262_v41 = vmul.f32 %v8098_v44, %v234_v58  ;;  %911 = vadd.xlane.f32.xlu0 %v910_v35  ;;  %v590_v37 = vmul.f32 %v5067_v22, %v562_v16  ;;  %v193_v48 = vadd.f32 %v153_v38, %v84_v43  ;;  %v371_v63 = vmul.f32 %v8100_v10, %v343_v40 }
  0xa4   :  { %v412_v12 = vadd.f32 %v372_v55, %v303_v49  ;;  %v5538_v51 = vadd.f32 %v826_v13, %v757_v52  ;;  %v647_v45 = vadd.f32 %v607_v62, %v538_v27  ;;  %v825_v28 = vmul.f32 %v5205_v19, %v5498_v29  ;;  %v670_v55 = vld [vmem:[#allocation5 + $0x430] sm:$0xff] }
  0xa5   :  { %v699_v59 = vmul.f32 %v5072_v24, %v671_v56  ;;  %v302_v50 = vadd.f32 %v262_v41, %v193_v48  ;;  %v480_v35 = vmul.f32 %v5062_v20, %v452_v0  ;;  %v105_v49 = vmul.f32 %v5167_v39, %v57_v53  ;;  %v779_v53 = vld [vmem:[#allocation5 + $0x4d0] sm:$0xff] }
  0xa6   :  { %8124 = vst [vmem:[#allocation45_spill] sm:$0xff] %v5538_v51  ;;  %v521_v30 = vadd.f32 %v481_v36, %v412_v12  ;;  %v973_v43 = vsel %vm873_vm0, %v5538_v51, 0.0  ;;  %v756_v13 = vadd.f32 %v716_v42, %v647_v45  ;;  %v174_v62 = vmul.f32 %v5170_v23, %v126_v14 }
  0xa7   :  { %v283_v38 = vmul.f32 %v5173_v18, %v235_v60  ;;  %974 = vadd.xlane.f32.xlu1 %v973_v43  ;;  %v808_v52 = vmul.f32 %v5077_v26, %v780_v54  ;;  %v411_v27 = vadd.f32 %v371_v63, %v302_v50  ;;  %v589_v36 = vmul.f32 %v5067_v22, %v561_v61  ;;  %v5562_v43 = vld [vmem:[#allocation5 + $0x88] sm:$0xff] }
  0xa8   :  { %v630_v29 = vadd.f32 %v590_v37, %v521_v30  ;;  %v5551_v41 = vadd.f32 %v825_v28, %v756_v13  ;;  %v698_v12 = vmul.f32 %v5072_v24, %v670_v55  ;;  %v214_v48 = vadd.f32 %v174_v62, %v105_v49 }
  0xa9   :  { %v392_v42 = vmul.f32 %v5178_v11, %v5515_v33  ;;  %v520_v14 = vadd.f32 %v480_v35, %v411_v27  ;;  %v501_v60 = vmul.f32 %v5185_v57, %v453_v34  ;;  %v104_v37 = vmul.f32 %v5167_v39, %v56_v47  ;;  %v5568_v35 = vld [vmem:[#allocation5 + $0x128] sm:$0xff] }
  0xaa   :  { %8125 = vst [vmem:[#allocation46_spill] sm:$0xff] %v5551_v41  ;;  %v739_v45 = vadd.f32 %v699_v59, %v630_v29  ;;  %v970_v63 = vsel %vm873_vm0, %v5551_v41, 0.0  ;;  %v323_v30 = vadd.f32 %v283_v38, %v214_v48  ;;  %v173_v28 = vmul.f32 %v5170_v23, %v125_v1  ;;  %v5570_v47 = vld [vmem:[#allocation5 + $0x1c8] sm:$0xff] }
  0xab   :  { %v282_v50 = vmul.f32 %v5173_v18, %v234_v58  ;;  %971 = vadd.xlane.f32.xlu0 %v970_v63  ;;  %v629_v33 = vadd.f32 %v589_v36, %v520_v14  ;;  %v807_v59 = vmul.f32 %v5077_v26, %v779_v53  ;;  %v610_v34 = vmul.f32 %v5192_v46, %v562_v16  ;;  %v5579_v16 = vld [vmem:[#allocation5 + $0x268] sm:$0xff]  ;;  %v5596_v63 = vld [vmem:[#allocation5 + $0x1c0] sm:$0xff] }
  0xac   :  { %v5564_v49 = vadd.f32 %v808_v52, %v739_v45  ;;  %v432_v13 = vadd.f32 %v392_v42, %v323_v30  ;;  %v719_v62 = vmul.f32 %v5196_v21, %v671_v56  ;;  %v213_v1 = vadd.f32 %v173_v28, %v104_v37  ;;  %v5585_v42 = vld [vmem:[#allocation5 + $0x308] sm:$0xff]  ;;  %v5587_v45 = vld [vmem:[#allocation5 + $0x80] sm:$0xff] }
  0xad   :  { %v391_v58 = vmul.f32 %v5178_v11, %v343_v40  ;;  %v738_v29 = vadd.f32 %v698_v12, %v629_v33  ;;  %v500_v52 = vmul.f32 %v5185_v57, %v452_v0  ;;  %v87_v27 = vmul.f32 %v8095_v32, %v5562_v43  ;;  %v5589_v12 = vld [vmem:[#allocation5 + $0x120] sm:$0xff] }
  0xae   :  { %8126 = vst [vmem:[#allocation47_spill] sm:$0xff] %v5564_v49  ;;  %v919_v38 = vsel %vm873_vm0, %v5564_v49, 0.0  ;;  %v541_v36 = vadd.f32 %v501_v60, %v432_v13  ;;  %v322_v48 = vadd.f32 %v282_v50, %v213_v1  ;;  %v156_v56 = vmul.f32 %v8096_v15, %v5568_v35  ;;  %v5600_v13 = vld [vmem:[#allocation5 + $0x3a8] sm:$0xff]  ;;  %v5602_v1 = vld [vmem:[#allocation5 + $0x260] sm:$0xff]  ;;  %v5635_v49 = vld [vmem:[#allocation5 + $0x278] sm:$0xff] }
  0xaf   :  { %920 = vadd.xlane.f32.xlu1 %v919_v38  ;;  %v265_v40 = vmul.f32 %v8098_v44, %v5570_v47  ;;  %v5591_v0 = vadd.f32 %v807_v59, %v738_v29  ;;  %v828_v14 = vmul.f32 %v5205_v19, %v780_v54  ;;  %v609_v37 = vmul.f32 %v5192_v46, %v561_v61  ;;  %v5608_v61 = vld [vmem:[#allocation5 + $0x448] sm:$0xff] }
  0xb0   :  { %v718_v60 = vmul.f32 %v5196_v21, %v670_v55  ;;  %v650_v30 = vadd.f32 %v610_v34, %v541_v36  ;;  %v431_v28 = vadd.f32 %v391_v58, %v322_v48  ;;  %v196_v50 = vadd.f32 %v156_v56, %v87_v27  ;;  %v5616_v36 = vld [vmem:[#allocation5 + $0x300] sm:$0xff]  ;;  %v5618_v48 = vld [vmem:[#allocation5 + $0x98] sm:$0xff] }
  0xb1   :  { %8127 = vst [vmem:[#allocation48_spill] sm:$0xff] %v5591_v0  ;;  %v374_v33 = vmul.f32 %v8100_v10, %v5579_v16  ;;  %v916_v59 = vsel %vm873_vm0, %v5591_v0, 0.0  ;;  %v483_v54 = vmul.f32 %v5062_v20, %v5585_v42  ;;  %v86_v55 = vmul.f32 %v8095_v32, %v5587_v45  ;;  %v5620_v56 = vld [vmem:[#allocation5 + $0x138] sm:$0xff] }
  0xb2   :  { %v155_v34 = vmul.f32 %v8096_v15, %v5589_v12  ;;  %917 = vadd.xlane.f32.xlu0 %v916_v59  ;;  %v759_v58 = vadd.f32 %v719_v62, %v650_v30  ;;  %v540_v38 = vadd.f32 %v500_v52, %v431_v28  ;;  %v305_v29 = vadd.f32 %v265_v40, %v196_v50  ;;  %v5627_v52 = vld [vmem:[#allocation5 + $0x1d8] sm:$0xff]  ;;  %v5633_v59 = vld [vmem:[#allocation5 + $0x3a0] sm:$0xff] }
  0xb3   :  { %v264_v27 = vmul.f32 %v8098_v44, %v5596_v63  ;;  %v827_v41 = vmul.f32 %v5205_v19, %v779_v53  ;;  %v592_v51 = vmul.f32 %v5067_v22, %v5600_v13  ;;  %v373_v62 = vmul.f32 %v8100_v10, %v5602_v1  ;;  %v5637_v53 = vld [vmem:[#allocation5 + $0x4e8] sm:$0xff] }
  0xb4   :  { %v195_v0 = vadd.f32 %v155_v34, %v86_v55  ;;  %v5629_v40 = vadd.f32 %v828_v14, %v759_v58  ;;  %v649_v30 = vadd.f32 %v609_v37, %v540_v38  ;;  %v414_v28 = vadd.f32 %v374_v33, %v305_v29  ;;  %v5641_v34 = vld [vmem:[#allocation5 + $0x440] sm:$0xff] }
  0xb5   :  { %v701_v50 = vmul.f32 %v5072_v24, %v5608_v61  ;;  %v482_v55 = vmul.f32 %v5062_v20, %v5616_v36  ;;  %v89_v14 = vmul.f32 %v8095_v32, %v5618_v48  ;;  %v158_v37 = vmul.f32 %v8096_v15, %v5620_v56 }
  0xb6   :  { %8128 = vst [vmem:[#allocation49_spill] sm:$0xff] %v5629_v40  ;;  %v304_v25 = vadd.f32 %v264_v27, %v195_v0  ;;  %v979_v33 = vsel %vm873_vm0, %v5629_v40, 0.0  ;;  %v758_v58 = vadd.f32 %v718_v60, %v649_v30  ;;  %v523_v38 = vadd.f32 %v483_v54, %v414_v28  ;;  %v5651_v0 = vld [vmem:[#allocation5 + $0x318] sm:$0xff]  ;;  %v5653_v27 = vld [vmem:[#allocation5 + $0x90] sm:$0xff] }
  0xb7   :  { %v267_v29 = vmul.f32 %v8098_v44, %v5627_v52  ;;  %980 = vadd.xlane.f32.xlu1 %v979_v33  ;;  %v591_v31 = vmul.f32 %v5067_v22, %v5633_v59  ;;  %v198_v9 = vadd.f32 %v158_v37, %v89_v14  ;;  %v376_v8 = vmul.f32 %v8100_v10, %v5635_v49  ;;  %v5661_v60 = vld [vmem:[#allocation5 + $0x1d0] sm:$0xff]  ;;  %v5671_v33 = vld [vmem:[#allocation5 + $0x3b8] sm:$0xff] }
  0xb8   :  { %v413_v17 = vadd.f32 %v373_v62, %v304_v25  ;;  %v5663_v54 = vadd.f32 %v827_v41, %v758_v58  ;;  %v632_v30 = vadd.f32 %v592_v51, %v523_v38  ;;  %v810_v28 = vmul.f32 %v5077_v26, %v5637_v53  ;;  %v5669_v62 = vld [vmem:[#allocation5 + $0x4e0] sm:$0xff]  ;;  %v5679_v41 = vld [vmem:[#allocation5 + $0x270] sm:$0xff] }
  0xb9   :  { %v700_v25 = vmul.f32 %v5072_v24, %v5641_v34  ;;  %v307_v37 = vadd.f32 %v267_v29, %v198_v9  ;;  %v485_v40 = vmul.f32 %v5062_v20, %v5651_v0  ;;  %v88_v51 = vmul.f32 %v8095_v32, %v5653_v27 }
  0xba   :  { %8129 = vst [vmem:[#allocation50_spill] sm:$0xff] %v5663_v54  ;;  %v522_v14 = vadd.f32 %v482_v55, %v413_v17  ;;  %v976_v58 = vsel %vm873_vm0, %v5663_v54, 0.0  ;;  %v741_v38 = vadd.f32 %v701_v50, %v632_v30  ;;  %v157_v5 = vmul.f32 %v8096_v15, %v5659_v7  ;;  %v5687_v17 = vld [vmem:[#allocation5 + $0x310] sm:$0xff]  ;;  %v5697_v15 = vld [vmem:[#allocation5 + $0x4f8] sm:$0xff] }
  0xbb   :  { %v266_v9 = vmul.f32 %v8098_v44, %v5661_v60  ;;  %977 = vadd.xlane.f32.xlu0 %v976_v58  ;;  %v809_v29 = vmul.f32 %v5077_v26, %v5669_v62  ;;  %v416_v32 = vadd.f32 %v376_v8, %v307_v37  ;;  %v594_v4 = vmul.f32 %v5067_v22, %v5671_v33  ;;  %v5701_v58 = vld [vmem:[#allocation5 + $0x3b0] sm:$0xff] }
  0xbc   :  { %v631_v55 = vadd.f32 %v591_v31, %v522_v14  ;;  %v5693_v3 = vadd.f32 %v810_v28, %v741_v38  ;;  %v703_v50 = vmul.f32 %v5072_v24, %v5675_v6  ;;  %v197_v30 = vadd.f32 %v157_v5, %v88_v51  ;;  %v5705_v37 = vld [vmem:[#allocation5 + $0x450] sm:$0xff] }
  0xbd   :  { %v375_v44 = vmul.f32 %v8100_v10, %v5679_v41  ;;  %v525_v14 = vadd.f32 %v485_v40, %v416_v32  ;;  %v484_v8 = vmul.f32 %v5062_v20, %v5687_v17  ;;  %v107_v28 = vmul.f32 %v5167_v39, %v5562_v43 }
  0xbe   :  { %8130 = vst [vmem:[#allocation51_spill] sm:$0xff] %v5693_v3  ;;  %v740_v31 = vadd.f32 %v700_v25, %v631_v55  ;;  %v925_v38 = vsel %vm873_vm0, %v5693_v3, 0.0  ;;  %v306_v54 = vadd.f32 %v266_v9, %v197_v30  ;;  %v176_v5 = vmul.f32 %v5170_v23, %v5568_v35  ;;  %v5723_v55 = vld [vmem:[#allocation5 + $0x4f0] sm:$0xff] }
  0xbf   :  { %v285_v10 = vmul.f32 %v5173_v18, %v5570_v47  ;;  %926 = vadd.xlane.f32.xlu1 %v925_v38  ;;  %v634_v25 = vadd.f32 %v594_v4, %v525_v14  ;;  %v812_v20 = vmul.f32 %v5077_v26, %v5697_v15  ;;  %v593_v43 = vmul.f32 %v5067_v22, %v5701_v58 }
  0xc0   :  { %v5715_v40 = vadd.f32 %v809_v29, %v740_v31  ;;  %v415_v51 = vadd.f32 %v375_v44, %v306_v54  ;;  %v702_v9 = vmul.f32 %v5072_v24, %v5705_v37  ;;  %v216_v35 = vadd.f32 %v176_v5, %v107_v28 }
  0xc1   :  { %v394_v47 = vmul.f32 %v5178_v11, %v5579_v16  ;;  %v743_v4 = vadd.f32 %v703_v50, %v634_v25  ;;  %v503_v32 = vmul.f32 %v5185_v57, %v5585_v42  ;;  %v106_v22 = vmul.f32 %v5167_v39, %v5587_v45 }
  0xc2   :  { %8131 = vst [vmem:[#allocation52_spill] sm:$0xff] %v5715_v40  ;;  %v922_v29 = vsel %vm873_vm0, %v5715_v40, 0.0  ;;  %v524_v54 = vadd.f32 %v484_v8, %v415_v51  ;;  %v325_v30 = vadd.f32 %v285_v10, %v216_v35  ;;  %v175_v24 = vmul.f32 %v5170_v23, %v5589_v12 }
  0xc3   :  { %923 = vadd.xlane.f32.xlu0 %v922_v29  ;;  %v284_v44 = vmul.f32 %v5173_v18, %v5596_v63  ;;  %v5737_v16 = vadd.f32 %v812_v20, %v743_v4  ;;  %v811_v50 = vmul.f32 %v5077_v26, %v5723_v55  ;;  %v612_v42 = vmul.f32 %v5192_v46, %v5600_v13 }
  0xc4   :  { %v721_v45 = vmul.f32 %v5196_v21, %v5608_v61  ;;  %v633_v31 = vadd.f32 %v593_v43, %v524_v54  ;;  %v434_v14 = vadd.f32 %v394_v47, %v325_v30  ;;  %v215_v8 = vadd.f32 %v175_v24, %v106_v22 }
  0xc5   :  { %8132 = vst [vmem:[#allocation53_spill] sm:$0xff] %v5737_v16  ;;  %v393_v12 = vmul.f32 %v5178_v11, %v5602_v1  ;;  %v931_v63 = vsel %vm873_vm0, %v5737_v16, 0.0  ;;  %v502_v28 = vmul.f32 %v5185_v57, %v5616_v36  ;;  %v109_v26 = vmul.f32 %v5167_v39, %v5618_v48 }
  0xc6   :  { %v178_v13 = vmul.f32 %v5170_v23, %v5620_v56  ;;  %932 = vadd.xlane.f32.xlu1 %v931_v63  ;;  %v742_v61 = vadd.f32 %v702_v9, %v633_v31  ;;  %v543_v38 = vadd.f32 %v503_v32, %v434_v14  ;;  %v324_v5 = vadd.f32 %v284_v44, %v215_v8 }
  0xc7   :  { %v287_v10 = vmul.f32 %v5173_v18, %v5627_v52  ;;  %v830_v1 = vmul.f32 %v5205_v19, %v5637_v53  ;;  %v611_v25 = vmul.f32 %v5192_v46, %v5633_v59  ;;  %v396_v48 = vmul.f32 %v5178_v11, %v5635_v49 }
  0xc8   :  { %v218_v36 = vadd.f32 %v178_v13, %v109_v26  ;;  %v5763_v20 = vadd.f32 %v811_v50, %v742_v61  ;;  %v652_v56 = vadd.f32 %v612_v42, %v543_v38  ;;  %v433_v43 = vadd.f32 %v393_v12, %v324_v5 }
  0xc9   :  { %v720_v51 = vmul.f32 %v5196_v21, %v5641_v34  ;;  %v505_v52 = vmul.f32 %v5185_v57, %v5651_v0  ;;  %v108_v53 = vmul.f32 %v5167_v39, %v5653_v27  ;;  %v177_v59 = vmul.f32 %v5170_v23, %v5659_v7 }
  0xca   :  { %8133 = vst [vmem:[#allocation54_spill] sm:$0xff] %v5763_v20  ;;  %v327_v9 = vadd.f32 %v287_v10, %v218_v36  ;;  %v928_v49 = vsel %vm873_vm0, %v5763_v20, 0.0  ;;  %v761_v35 = vadd.f32 %v721_v45, %v652_v56  ;;  %v542_v47 = vadd.f32 %v502_v28, %v433_v43 }
  0xcb   :  { %v286_v29 = vmul.f32 %v5173_v18, %v5661_v60  ;;  %929 = vadd.xlane.f32.xlu0 %v928_v49  ;;  %v614_v4 = vmul.f32 %v5192_v46, %v5671_v33  ;;  %v217_v0 = vadd.f32 %v177_v59, %v108_v53  ;;  %v395_v39 = vmul.f32 %v5178_v11, %v5679_v41 }
  0xcc   :  { %v436_v34 = vadd.f32 %v396_v48, %v327_v9  ;;  %v5781_v27 = vadd.f32 %v830_v1, %v761_v35  ;;  %v651_v7 = vadd.f32 %v611_v25, %v542_v47  ;;  %v829_v23 = vmul.f32 %v5205_v19, %v5669_v62 }
  0xcd   :  { %v723_v22 = vmul.f32 %v5196_v21, %v5675_v6  ;;  %v326_v18 = vadd.f32 %v286_v29, %v217_v0  ;;  %v504_v60 = vmul.f32 %v5185_v57, %v5687_v17  ;;  %v832_v41 = vmul.f32 %v5205_v19, %v5697_v15 }
  0xce   :  { %8134 = vst [vmem:[#allocation55_spill] sm:$0xff] %v5781_v27  ;;  %v545_v32 = vadd.f32 %v505_v52, %v436_v34  ;;  %v985_v33 = vsel %vm873_vm0, %v5781_v27, 0.0  ;;  %v760_v54 = vadd.f32 %v720_v51, %v651_v7  ;;  %v613_v62 = vmul.f32 %v5192_v46, %v5701_v58  ;;  %v8139_v7 = vld [vmem:[#allocation11_spill] sm:$0xff] }
  0xcf   :  { %986 = vadd.xlane.f32.xlu1 %v985_v33  ;;  %v435_v30 = vadd.f32 %v395_v39, %v326_v18  ;;  %v722_v57 = vmul.f32 %v5196_v21, %v5705_v37  ;;  %v831_v15 = vmul.f32 %v5205_v19, %v5723_v55  ;;  %v882_v37 = vpop.xlane.xlu1 %881  ;;  %v8138_v53 = vlaneseq }
  0xd0   :  { %v654_v11 = vadd.f32 %v614_v4, %v545_v32  ;;  %v5795_v24 = vadd.f32 %v829_v23, %v760_v54  ;;  %v876_v31 = vpop.xlane.xlu0 %875  ;;  %v5838_v29 = vmul.f32 0.1, %v882_v37 }
  0xd1   :  { %v544_v44 = vadd.f32 %v504_v60, %v435_v30  ;;  %v1115_v59 = vand.u32 127, %v8138_v53  ;;  %v5849_v32 = vmul.f32 0.1, %v876_v31 }
  0xd2   :  { %8135 = vst [vmem:[#allocation56_spill] sm:$0xff] %v5795_v24  ;;  %v763_v6 = vadd.f32 %v723_v22, %v654_v11  ;;  %v982_v17 = vsel %vm873_vm0, %v5795_v24, 0.0  ;;  %v1036_v30 = vmul.f32 %v5838_v29, %v5838_v29 }
  0xd3   :  { %983 = vadd.xlane.f32.xlu0 %v982_v17  ;;  %v653_v42 = vadd.f32 %v613_v62, %v544_v44  ;;  %v885_v14 = vpop.xlane.xlu1 %884  ;;  %v1120_v35 = vadd.s32 4294967288, %v1115_v59  ;;  %v5847_v23 = vsub.s32 %v1115_v59, %v8139_v7 }
  0xd4   :  { %v5801_v50 = vadd.f32 %v832_v41, %v763_v6  ;;  %v5836_v47 = vmul.f32 0.1, %v885_v14 }
  0xd5   :  { %v762_v58 = vadd.f32 %v722_v57, %v653_v42  ;;  %8140 = vst [vmem:[#allocation59_spill] sm:$0xff] %v5847_v23  ;;  %v5856_v60 = vsub.s32 %v1120_v35, %v8139_v7 }
  0xd6   :  { %8136 = vst [vmem:[#allocation57_spill] sm:$0xff] %v5801_v50  ;;  %v991_v46 = vsel %vm873_vm0, %v5801_v50, 0.0  ;;  %v879_v8 = vpop.xlane.xlu0 %878  ;;  %v1037_v33 = vmul.f32 %v5836_v47, %v5836_v47 }
  0xd7   :  { %992 = vadd.xlane.f32.xlu1 %v991_v46  ;;  %v5807_v45 = vadd.f32 %v831_v15, %v762_v58  ;;  %v5840_v34 = vmul.f32 0.1, %v879_v8  ;;  %8141 = vst [vmem:[#allocation60_spill] sm:$0xff] %v5856_v60  ;;  %v1034_v46 = vmul.f32 %v5849_v32, %v5849_v32 }
  0xd8   :  { %v1134_v37 = vrot.slane %v1037_v33, %v5856_v60 }
  0xd9   :  { %8137 = vst [vmem:[#allocation58_spill] sm:$0xff] %v5807_v45  ;;  %v988_v21 = vsel %vm873_vm0, %v5807_v45, 0.0  ;;  %v1035_v62 = vmul.f32 %v5840_v34, %v5840_v34  ;;  %v1119_v59 = vrot.slane %v1034_v46, %v5847_v23 }
  0xda   :  { %989 = vadd.xlane.f32.xlu0 %v988_v21 }
  0xdb   :  { %v5811_v12 = vpop.xlane.xlu1 %938 }
  0xe2   :  { %v5813_v63 = vpop.xlane.xlu0 %935 }
  0xe4   :  { %v5815_v19 = vpop.xlane.xlu1 %944 }
  0xe8   :  { %v5817_v55 = vpop.xlane.xlu0 %941 }
  0xeb   :  { %v891_v28 = vpop.xlane.xlu1 %890 }
  0xec   :  { %v5842_v4 = vmul.f32 0.1, %v891_v28  ;;  %v1130_v28 = vrot.slane %v1036_v30, %v5847_v23 }
  0xee   :  { %v1039_v57 = vmul.f32 %v5842_v4, %v5842_v4  ;;  %v1135_v33 = vsel %vm1125_vm1, %v1134_v37, %v1130_v28 }
  0xef   :  { %v888_v26 = vpop.xlane.xlu0 %887 }
  0xf0   :  { %v5844_v0 = vmul.f32 0.1, %v888_v26  ;;  %v1124_v26 = vrot.slane %v1035_v62, %v5856_v60 }
  0xf2   :  { %v1038_v17 = vmul.f32 %v5844_v0, %v5844_v0 }
  0xf4   :  { %v5819_v13 = vpop.xlane.xlu1 %950 }
  0xf8   :  { %v5821_v61 = vpop.xlane.xlu0 %947 }
  0xfc   :  { %v897_v38 = vpop.xlane.xlu1 %896 }
  0xfd   :  { %v5851_v22 = vmul.f32 0.1, %v897_v38 }
  0xff   :  { %v1041_v58 = vmul.f32 %v5851_v22, %v5851_v22 }
 0x100   :  { %v894_v5 = vpop.xlane.xlu0 %893 }
 0x101   :  { %v5853_v18 = vmul.f32 0.1, %v894_v5 }
 0x103   :  { %v5823_v10 = vpop.xlane.xlu1 %956  ;;  %v1040_v21 = vmul.f32 %v5853_v18, %v5853_v18 }
 0x105   :  { %v1148_v35 = vrot.slane %v1040_v21, %v5847_v23 }
 0x108   :  { %v5825_v1 = vpop.xlane.xlu0 %953 }
 0x10c   :  { %v903_v25 = vpop.xlane.xlu1 %902 }
 0x10d   :  { %v5860_v54 = vmul.f32 0.1, %v903_v25  ;;  %v1143_v25 = vrot.slane %v1039_v57, %v5856_v60  ;;  %v1126_v57 = vsel %vm1125_vm1, %v1124_v26, %v1119_v59 }
 0x10e   :  { %v1299_v26 = vsel %vm1298_vm2, %v1135_v33, %v1126_v57 }
 0x10f   :  { %v1043_v31 = vmul.f32 %v5860_v54, %v5860_v54 }
 0x110   :  { %v900_v36 = vpop.xlane.xlu0 %899 }
 0x111   :  { %v5862_v11 = vmul.f32 0.1, %v900_v36  ;;  %v1139_v36 = vrot.slane %v1038_v17, %v5847_v23  ;;  %v1161_v30 = vrot.slane %v1043_v31, %v5856_v60 }
 0x113   :  { %v1042_v14 = vmul.f32 %v5862_v11, %v5862_v11 }
 0x114   :  { %v5827_v48 = vpop.xlane.xlu1 %962 }
 0x115   :  { %v1157_v62 = vrot.slane %v1042_v14, %v5847_v23 }
 0x117   :  { %v5829_v56 = vpop.xlane.xlu0 %959 }
 0x11c   :  { %v909_v43 = vpop.xlane.xlu1 %908 }
 0x11d   :  { %v5870_v6 = vmul.f32 0.1, %v909_v43 }
 0x11f   :  { %v1045_v38 = vmul.f32 %v5870_v6, %v5870_v6 }
 0x120   :  { %v906_v51 = vpop.xlane.xlu0 %905 }
 0x121   :  { %v5872_v44 = vmul.f32 0.1, %v906_v51  ;;  %v1170_v17 = vrot.slane %v1045_v38, %v5856_v60  ;;  %v1162_v38 = vsel %vm1125_vm1, %v1161_v30, %v1157_v62 }
 0x123   :  { %v1044_v5 = vmul.f32 %v5872_v44, %v5872_v44 }
 0x124   :  { %v5831_v9 = vpop.xlane.xlu1 %968 }
 0x125   :  { %v1166_v7 = vrot.slane %v1044_v5, %v5847_v23 }
 0x128   :  { %v5833_v52 = vpop.xlane.xlu0 %965 }
 0x129   :  { %v6016_v50 = vmul.f32 0.1, %v5833_v52 }
 0x12b   :  { %v915_v49 = vpop.xlane.xlu1 %914  ;;  %8145 = vst [vmem:[#allocation64_spill] sm:$0xff] %v6016_v50 }
 0x12c   :  { %v5878_v42 = vmul.f32 0.1, %v915_v49  ;;  %v1152_v49 = vrot.slane %v1041_v58, %v5856_v60  ;;  %v1144_v58 = vsel %vm1125_vm1, %v1143_v25, %v1139_v36 }
 0x12d   :  { %v1301_v5 = vsel %vm1300_vm3, %v1144_v58, %v1299_v26  ;;  %v5950_v26 = vmul.f32 0.1, %v5813_v63  ;;  %v5965_v63 = vmul.f32 0.1, %v5815_v19 }
 0x12e   :  { %v1047_v43 = vmul.f32 %v5878_v42, %v5878_v42  ;;  %v1153_v31 = vsel %vm1125_vm1, %v1152_v49, %v1148_v35 }
 0x130   :  { %v912_v39 = vpop.xlane.xlu0 %911  ;;  %v1179_v21 = vrot.slane %v1047_v43, %v5856_v60  ;;  %v1171_v43 = vsel %vm1125_vm1, %v1170_v17, %v1166_v7 }
 0x131   :  { %v5880_v15 = vmul.f32 0.1, %v912_v39 }
 0x133   :  { %8142 = vst [vmem:[#allocation61_spill] sm:$0xff] %v5880_v15  ;;  %v1046_v51 = vmul.f32 %v5880_v15, %v5880_v15 }
 0x134   :  { %v5864_v41 = vpop.xlane.xlu1 %974 }
 0x135   :  { %v1175_v37 = vrot.slane %v1046_v51, %v5847_v23  ;;  %v6019_v24 = vmul.f32 0.1, %v5864_v41 }
 0x137   :  { %v1180_v51 = vsel %vm1125_vm1, %v1179_v21, %v1175_v37 }
 0x138   :  { %v5893_v8 = vpop.xlane.xlu0 %971 }
 0x139   :  { %v6022_v27 = vmul.f32 0.1, %v5893_v8 }
 0x13b   :  { %8146 = vst [vmem:[#allocation65_spill] sm:$0xff] %v6022_v27 }
 0x13c   :  { %v921_v53 = vpop.xlane.xlu1 %920 }
 0x13d   :  { %v5910_v39 = vmul.f32 0.1, %v921_v53  ;;  %v1303_v53 = vsel %vm1302_vm4, %v1153_v31, %v1301_v5  ;;  %v5947_v31 = vmul.f32 0.1, %v5811_v12  ;;  %v1054_v12 = vmul.f32 %v5950_v26, %v5950_v26 }
 0x13e   :  { %v1305_v49 = vsel %vm1304_vm5, %v1162_v38, %v1303_v53  ;;  %v5968_v53 = vmul.f32 0.1, %v5817_v55 }
 0x13f   :  { %v1049_v46 = vmul.f32 %v5910_v39, %v5910_v39  ;;  %v918_v28 = vpop.xlane.xlu0 %917  ;;  %v1307_v35 = vsel %vm1306_vm6, %v1171_v43, %v1305_v49  ;;  %v1055_v43 = vmul.f32 %v5947_v31, %v5947_v31 }
 0x140   :  { %v5924_v14 = vmul.f32 0.1, %v918_v28  ;;  %v1309_v30 = vsel %vm1308_vm7, %v1180_v51, %v1307_v35  ;;  %v5976_v35 = vmul.f32 0.1, %v5821_v61  ;;  %v1211_v61 = vrot.slane %v1054_v12, %v5847_v23 }
 0x141   :  { %v1188_v25 = vrot.slane %v1049_v46, %v5856_v60  ;;  %v6008_v12 = vmul.f32 0.1, %v5829_v56 }
 0x142   :  { %8143 = vst [vmem:[#allocation62_spill] sm:$0xff] %v5924_v14  ;;  %v1048_v36 = vmul.f32 %v5924_v14, %v5924_v14 }
 0x143   :  { %8144 = vst [vmem:[#allocation63_spill] sm:$0xff] %v6008_v12 }
 0x144   :  { %v1184_v59 = vrot.slane %v1048_v36, %v5847_v23  ;;  %v981_v62 = vpop.xlane.xlu1 %980 }
 0x146   :  { %v1189_v33 = vsel %vm1125_vm1, %v1188_v25, %v1184_v59  ;;  %v5971_v59 = vmul.f32 0.1, %v5819_v13 }
 0x147   :  { %v1311_v7 = vsel %vm1310_vm8, %v1189_v33, %v1309_v30  ;;  %v5979_v33 = vmul.f32 0.1, %v5823_v10  ;;  %v5982_v30 = vmul.f32 0.1, %v5825_v1  ;;  %v1057_v10 = vmul.f32 %v5965_v63, %v5965_v63 }
 0x148   :  { %v1326_v57 = vsel %vm1325_vm9, %v1311_v7, 0.0  ;;  %v978_v17 = vpop.xlane.xlu0 %977  ;;  %v1056_v1 = vmul.f32 %v5968_v53, %v5968_v53 }
 0x149   :  { %1327 = vadd.xlane.f32.xlu0 %v1326_v57  ;;  %v1215_v57 = vrot.slane %v1055_v43, %v5856_v60  ;;  %v6005_v43 = vmul.f32 0.1, %v5827_v48  ;;  %v1224_v20 = vrot.slane %v1057_v10, %v5856_v60  ;;  %v6028_v16 = vmul.f32 0.1, %v978_v17 }
 0x14a   :  { %v1220_v52 = vrot.slane %v1056_v1, %v5847_v23  ;;  %v1062_v17 = vmul.f32 %v6008_v12, %v6008_v12 }
 0x14b   :  { %8147 = vst [vmem:[#allocation66_spill] sm:$0xff] %v6028_v16 }
 0x14c   :  { %v927_v46 = vpop.xlane.xlu1 %926  ;;  %v1225_v40 = vsel %vm1125_vm1, %v1224_v20, %v1220_v52  ;;  %v1247_v14 = vrot.slane %v1062_v17, %v5847_v23 }
 0x14d   :  { %v5942_v21 = vmul.f32 0.1, %v927_v46  ;;  %v1059_v46 = vmul.f32 %v5971_v59, %v5971_v59 }
 0x14f   :  { %v1051_v5 = vmul.f32 %v5942_v21, %v5942_v21 }
 0x150   :  { %v924_v58 = vpop.xlane.xlu0 %923 }
 0x151   :  { %v5944_v37 = vmul.f32 0.1, %v924_v58  ;;  %v1197_v19 = vrot.slane %v1051_v5, %v5856_v60  ;;  %v1058_v5 = vmul.f32 %v5976_v35, %v5976_v35 }
 0x153   :  { %v933_v28 = vpop.xlane.xlu1 %932  ;;  %v1050_v25 = vmul.f32 %v5944_v37, %v5944_v37  ;;  %v1229_v8 = vrot.slane %v1058_v5, %v5847_v23  ;;  %v1067_v5 = vmul.f32 %v6019_v24, %v6019_v24 }
 0x154   :  { %v5952_v38 = vmul.f32 0.1, %v933_v28 }
 0x155   :  { %v1193_v7 = vrot.slane %v1050_v25, %v5847_v23  ;;  %v1061_v25 = vmul.f32 %v5979_v33, %v5979_v33  ;;  %v1269_v12 = vrot.slane %v1067_v5, %v5856_v60 }
 0x156   :  { %v1053_v36 = vmul.f32 %v5952_v38, %v5952_v38 }
 0x158   :  { %v930_v51 = vpop.xlane.xlu0 %929  ;;  %v1206_v55 = vrot.slane %v1053_v36, %v5856_v60  ;;  %v1060_v36 = vmul.f32 %v5982_v30, %v5982_v30 }
 0x159   :  { %v5973_v49 = vmul.f32 0.1, %v930_v51  ;;  %v6011_v51 = vmul.f32 0.1, %v5831_v9  ;;  %v6026_v9 = vmul.f32 0.1, %v981_v62  ;;  %v1063_v62 = vmul.f32 %v6005_v43, %v6005_v43 }
 0x15a   :  { %v1238_v1 = vrot.slane %v1060_v36, %v5847_v23  ;;  %v1068_v36 = vmul.f32 %v6028_v16, %v6028_v16 }
 0x15b   :  { %v1052_v13 = vmul.f32 %v5973_v49, %v5973_v49 }
 0x15c   :  { %v987_v28 = vpop.xlane.xlu1 %986  ;;  %v1274_v52 = vrot.slane %v1068_v36, %v5847_v23 }
 0x15d   :  { %v1202_v58 = vrot.slane %v1052_v13, %v5847_v23  ;;  %v1198_v13 = vsel %vm1125_vm1, %v1197_v19, %v1193_v7  ;;  %v1233_v7 = vrot.slane %v1059_v46, %v5856_v60  ;;  %v6033_v41 = vmul.f32 0.1, %v987_v28 }
 0x15e   :  { %v1065_v46 = vmul.f32 %v6011_v51, %v6011_v51 }
 0x15f   :  { %v1207_v45 = vsel %vm1125_vm1, %v1206_v55, %v1202_v58  ;;  %v1064_v58 = vmul.f32 %v6016_v50, %v6016_v50  ;;  %v1234_v3 = vsel %vm1125_vm1, %v1233_v7, %v1229_v8 }
 0x160   :  { %v984_v48 = vpop.xlane.xlu0 %983  ;;  %v1312_v56 = vsel %vm1298_vm2, %v1207_v45, %v1198_v13  ;;  %v1242_v45 = vrot.slane %v1061_v25, %v5856_v60  ;;  %v1066_v25 = vmul.f32 %v6022_v27, %v6022_v27  ;;  %v1069_v13 = vmul.f32 %v6026_v9, %v6026_v9 }
 0x161   :  { %v1330_v19 = vsel %vm1329_vm10, %v1312_v56, 0.0  ;;  %v6035_v55 = vmul.f32 0.1, %v984_v48  ;;  %v1216_v48 = vsel %vm1125_vm1, %v1215_v57, %v1211_v61  ;;  %v1071_v56 = vmul.f32 %v6033_v41, %v6033_v41 }
 0x162   :  { %1331 = vadd.xlane.f32.xlu0 %v1330_v19  ;;  %v1251_v27 = vrot.slane %v1063_v62, %v5856_v60  ;;  %v1243_v57 = vsel %vm1125_vm1, %v1242_v45, %v1238_v1  ;;  %v1260_v61 = vrot.slane %v1065_v46, %v5856_v60  ;;  %v1256_v15 = vrot.slane %v1064_v58, %v5847_v23 }
 0x163   :  { %v1070_v19 = vmul.f32 %v6035_v55, %v6035_v55  ;;  %v1278_v20 = vrot.slane %v1069_v13, %v5856_v60  ;;  %v1287_v7 = vrot.slane %v1071_v56, %v5856_v60 }
 0x164   :  { %v993_v10 = vpop.xlane.xlu1 %992  ;;  %v1252_v17 = vsel %vm1125_vm1, %v1251_v27, %v1247_v14  ;;  %v1261_v58 = vsel %vm1125_vm1, %v1260_v61, %v1256_v15 }
 0x165   :  { %v6048_v28 = vmul.f32 0.1, %v993_v10  ;;  %v1283_v8 = vrot.slane %v1070_v19, %v5847_v23  ;;  %v1279_v56 = vsel %vm1125_vm1, %v1278_v20, %v1274_v52 }
 0x167   :  { %8148 = vst [vmem:[#allocation67_spill] sm:$0xff] %v6048_v28  ;;  %v1073_v10 = vmul.f32 %v6048_v28, %v6048_v28  ;;  %v990_v16 = vpop.xlane.xlu0 %989  ;;  %v1265_v28 = vrot.slane %v1066_v25, %v5847_v23  ;;  %v1288_v13 = vsel %vm1125_vm1, %v1287_v7, %v1283_v8 }
 0x168   :  { %v6072_v50 = vmul.f32 0.1, %v990_v16  ;;  %v1313_v16 = vsel %vm1298_vm2, %v1225_v40, %v1216_v48  ;;  %v4961_v48 = vmov 0  }
 0x169   :  { %v1296_v45 = vrot.slane %v1073_v10, %v5856_v60  ;;  %v1314_v1 = vsel %vm1300_vm3, %v1234_v3, %v1313_v16  ;;  %v1270_v5 = vsel %vm1125_vm1, %v1269_v12, %v1265_v28  ;;  %4748 = vset.pattern.permute.xlu0 %v4961_v48  ;;  %4747 = vset.pattern.permute.xlu1 %v4961_v48 }
 0x16a   :  { %v1072_v62 = vmul.f32 %v6072_v50, %v6072_v50  ;;  %v1315_v25 = vsel %vm1302_vm4, %v1243_v57, %v1314_v1 }
 0x16b   :  { %v1316_v40 = vsel %vm1304_vm5, %v1252_v17, %v1315_v25 }
 0x16c   :  { %v1292_v46 = vrot.slane %v1072_v62, %v5847_v23  ;;  %v1317_v3 = vsel %vm1306_vm6, %v1261_v58, %v1316_v40  ;;  %v8149_v40 = vld [vmem:[#allocation12_spill] sm:$0xff] }
 0x16d   :  { %v1318_v15 = vsel %vm1308_vm7, %v1270_v5, %v1317_v3  ;;  %v8189_v23 = vld [vmem:[#allocation40_spill] sm:$0xff] }
 0x16e   :  { %v1297_v36 = vsel %vm1125_vm1, %v1296_v45, %v1292_v46  ;;  %v1319_v12 = vsel %vm1310_vm8, %v1279_v56, %v1318_v15 }
 0x16f   :  { %v1320_v27 = vsel %vm1298_vm2, %v1297_v36, %v1288_v13  ;;  %v1333_v28 = vsel %vm1325_vm9, %v1319_v12, 0.0 }
 0x170   :  { %v1336_v14 = vsel %vm1329_vm10, %v1320_v27, 0.0 }
 0x171   :  { %1337 = vadd.xlane.f32.xlu1 %v1336_v14 }
 0x175   :  { %1334 = vadd.xlane.f32.xlu1 %v1333_v28 }
 0x1d6   :  { %v1328_v19 = vpop.xlane.xlu0 %1327 }
 0x1d7   :  { %v1367_v7 = vadd.f32 1.0, %v1328_v19  ;;  %vm1341_vm13 = vcmp.eq.f32.partialorder %v1328_v19, inf  ;;  %v1344_v28 = vand.u32 2147483648, %v1328_v19  ;;  %vm1343_vm14 = vcmp.eq.f32.partialorder %v1328_v19, 0.0 }
 0x1ef   :  { %v1332_v10 = vpop.xlane.xlu0 %1331 }
 0x1f0   :  { %4749 = vrsqrt.f32 %v1332_v10  ;;  %v1368_v57 = vadd.f32 1.0, %v1332_v10  ;;  %vm1348_vm11 = vcmp.eq.f32.partialorder %v1332_v10, inf  ;;  %v1351_v52 = vand.u32 2147483648, %v1332_v10 }
 0x1f1   :  { %vm1350_vm12 = vcmp.eq.f32.partialorder %v1332_v10, 0.0 }
 0x1f2   :  { %4751 = vrcp.f32 %v1368_v57 }
 0x1f3   :  { %4753 = vrsqrt.f32 %v1328_v19 }
 0x1fa   :  { %v4750_v61 = vpop.eup %4749 }
 0x1fb   :  { %v1347_v20 = vmul.f32 %v4750_v61, %v1332_v10 }
 0x1fc   :  { %v4752_v45 = vpop.eup %4751 }
 0x1fd   :  { %v1349_v8 = vsel %vm1348_vm11, %v1332_v10, %v1347_v20  ;;  %v4754_v1 = vpop.eup %4753 }
 0x1fe   :  { %v1338_v62 = vpop.xlane.xlu1 %1337  ;;  %v1352_v16 = vsel %vm1350_vm12, %v1351_v52, %v1349_v8  ;;  %v1340_v25 = vmul.f32 %v4754_v1, %v1328_v19 }
 0x1ff   :  { %4755 = vrsqrt.f32 %v1338_v62  ;;  %v1376_v17 = vmul.f32 %v4752_v45, %v1352_v16  ;;  %v1370_v46 = vadd.f32 1.0, %v1338_v62  ;;  %vm1362_vm15 = vcmp.eq.f32.partialorder %v1338_v62, inf }
 0x200   :  { %4757 = vrcp.f32 %v1367_v7  ;;  %v1342_v3 = vsel %vm1341_vm13, %v1328_v19, %v1340_v25  ;;  %vm1364_vm11 = vcmp.eq.f32.partialorder %v1338_v62, 0.0 }
 0x201   :  { %v1418_v58 = vrot.slane %v1376_v17, %v5016_v2  ;;  %4759 = vrcp.f32 %v1370_v46  ;;  %v1422_v27 = vrot.slane %v1376_v17, %v8149_v40  ;;  %v1345_v10 = vsel %vm1343_vm14, %v1344_v28, %v1342_v3  ;;  %v8152_v28 = vld [vmem:[#allocation15_spill] sm:$0xff] }
 0x202   :  { %v1335_v5 = vpop.xlane.xlu1 %1334  ;;  %vm2098_vm14 = vcmask 254976  }
 0x203   :  { %4761 = vrsqrt.f32 %v1335_v5  ;;  %v1369_v13 = vadd.f32 1.0, %v1335_v5  ;;  %v1500_v36 = vmul.f32 %v1418_v58, %v5942_v21  ;;  %v1499_v56 = vmul.f32 %v1418_v58, %v5944_v37 }
 0x204   :  { %v1502_v14 = vmul.f32 %v1422_v27, %v5952_v38  ;;  %v1501_v15 = vmul.f32 %v1422_v27, %v5973_v49  ;;  %v1365_v37 = vand.u32 2147483648, %v1338_v62  ;;  %vm1355_vm12 = vcmp.eq.f32.partialorder %v1335_v5, inf  ;;  %v8150_v27 = vld [vmem:[#allocation13_spill] sm:$0xff] }
 0x205   :  { %1610 = vperm.xlu0 %4748, %v1500_v36   ;;  %1605 = vperm.xlu1 %4747, %v1499_v56   ;;  %4763 = vrcp.f32 %v1369_v13  ;;  %v1358_v49 = vand.u32 2147483648, %v1335_v5  ;;  %vm1357_vm13 = vcmp.eq.f32.partialorder %v1335_v5, 0.0 }
 0x209   :  { %v4756_v12 = vpop.eup %4755  ;;  %1620 = vperm.xlu0 %4748, %v1502_v14   ;;  %1615 = vperm.xlu1 %4747, %v1501_v15   ;;  %v8151_v15 = vld [vmem:[#allocation14_spill] sm:$0xff] }
 0x20a   :  { %v1361_v48 = vmul.f32 %v4756_v12, %v1338_v62  ;;  %v4758_v21 = vpop.eup %4757 }
 0x20b   :  { %v4760_v57 = vpop.eup %4759  ;;  %v6106_v7 = vmul.f32 %v4758_v21, %v1345_v10  ;;  %v8153_v10 = vld [vmem:[#allocation16_spill] sm:$0xff] }
 0x20c   :  { %v1363_v61 = vsel %vm1362_vm15, %v1338_v62, %v1361_v48 }
 0x20d   :  { %v4762_v20 = vpop.eup %4761  ;;  %v1366_v52 = vsel %vm1364_vm11, %v1365_v37, %v1363_v61  ;;  %v1386_v58 = vrot.slane %v6106_v7, %v5016_v2  ;;  %v1390_v36 = vrot.slane %v6106_v7, %v8149_v40  ;;  %v1394_v14 = vrot.slane %v6106_v7, %v8150_v27 }
 0x20e   :  { %v1354_v38 = vmul.f32 %v4762_v20, %v1335_v5  ;;  %v6108_v8 = vmul.f32 %v4760_v57, %v1366_v52  ;;  %v1402_v48 = vrot.slane %v6106_v7, %v8152_v28  ;;  %v1398_v21 = vrot.slane %v6106_v7, %v8151_v15  ;;  %v8154_v52 = vld [vmem:[#allocation17_spill] sm:$0xff] }
 0x20f   :  { %v4764_v16 = vpop.eup %4763  ;;  %v1483_v25 = vmul.f32 %v1386_v58, %v5849_v32  ;;  %v1406_v37 = vrot.slane %v6106_v7, %v8153_v10 }
 0x210   :  { %v1356_v19 = vsel %vm1355_vm12, %v1335_v5, %v1354_v38  ;;  %v1458_v45 = vrot.slane %v6108_v8, %v5016_v2  ;;  %v1484_v5 = vmul.f32 %v1386_v58, %v5840_v34  ;;  %v1486_v34 = vmul.f32 %v1390_v36, %v5836_v47 }
 0x211   :  { %v1359_v17 = vsel %vm1357_vm13, %v1358_v49, %v1356_v19  ;;  %v1488_v47 = vmul.f32 %v1394_v14, %v5842_v4  ;;  %v1490_v4 = vmul.f32 %v1398_v21, %v5851_v22  ;;  %v1410_v22 = vrot.slane %v6106_v7, %v8154_v52  ;;  %v8155_v49 = vld [vmem:[#allocation18_spill] sm:$0xff] }
 0x212   :  { %v6112_v1 = vmul.f32 %v4764_v16, %v1359_v17  ;;  %v1520_v62 = vmul.f32 %v1458_v45, %v6033_v41  ;;  %v1519_v46 = vmul.f32 %v1458_v45, %v6035_v55  ;;  %v1485_v55 = vmul.f32 %v1390_v36, %v5838_v29  ;;  %v8156_v16 = vld [vmem:[#allocation67_spill] sm:$0xff] }
 0x213   :  { %v1487_v29 = vmul.f32 %v1394_v14, %v5844_v0  ;;  %v1489_v0 = vmul.f32 %v1398_v21, %v5853_v18  ;;  %v1496_v38 = vmul.f32 %v1410_v22, %v5878_v42  ;;  %v1491_v42 = vmul.f32 %v1402_v48, %v5862_v11  ;;  %v8158_v11 = vld [vmem:[#allocation64_spill] sm:$0xff] }
 0x214   :  { %1710 = vperm.xlu0 %4748, %v1520_v62   ;;  %1705 = vperm.xlu1 %4747, %v1519_v46   ;;  %v1426_v13 = vrot.slane %v6112_v1, %v5016_v2  ;;  %v1430_v56 = vrot.slane %v6112_v1, %v8149_v40  ;;  %v1434_v3 = vrot.slane %v6112_v1, %v8150_v27  ;;  %v8157_v62 = vld [vmem:[#allocation63_spill] sm:$0xff] }
 0x215   :  { %v1438_v12 = vrot.slane %v6112_v1, %v8151_v15  ;;  %v1442_v57 = vrot.slane %v6112_v1, %v8152_v28  ;;  %v1446_v18 = vrot.slane %v6112_v1, %v8153_v10 }
 0x216   :  { %v1504_v41 = vmul.f32 %v1426_v13, %v5947_v31  ;;  %v1506_v32 = vmul.f32 %v1430_v56, %v5965_v63  ;;  %v1508_v31 = vmul.f32 %v1434_v3, %v5971_v59  ;;  %v1492_v59 = vmul.f32 %v1402_v48, %v5860_v54  ;;  %v8163_v48 = vld [vmem:[#allocation51_spill] sm:$0xff] }
 0x217   :  { %v1510_v63 = vmul.f32 %v1438_v12, %v5979_v33  ;;  %v1494_v33 = vmul.f32 %v1406_v37, %v5870_v6  ;;  %v1512_v61 = vmul.f32 %v1442_v57, %v6005_v43  ;;  %v1503_v54 = vmul.f32 %v1426_v13, %v5950_v26 }
 0x218   :  { %1525 = vperm.xlu0 %4748, %v1483_v25   ;;  %1530 = vperm.xlu1 %4747, %v1484_v5   ;;  %v1514_v20 = vmul.f32 %v1446_v18, %v6011_v51  ;;  %v1505_v6 = vmul.f32 %v1430_v56, %v5968_v53  ;;  %v1507_v43 = vmul.f32 %v1434_v3, %v5976_v35 }
 0x219   :  { %v1414_v26 = vrot.slane %v6106_v7, %v8155_v49  ;;  %v1509_v51 = vmul.f32 %v1438_v12, %v5982_v30  ;;  %v1450_v53 = vrot.slane %v6112_v1, %v8154_v52  ;;  %v1454_v35 = vrot.slane %v6112_v1, %v8155_v49  ;;  %v8159_v1 = vld [vmem:[#allocation61_spill] sm:$0xff] }
 0x21a   :  { %v1462_v30 = vrot.slane %v6108_v8, %v8149_v40  ;;  %v1513_v46 = vmul.f32 %v1446_v18, %v8158_v11  ;;  %v1495_v58 = vmul.f32 %v1410_v22, %v8159_v1  ;;  %v8162_v8 = vld [vmem:[#allocation66_spill] sm:$0xff] }
 0x21b   :  { %v1498_v19 = vmul.f32 %v1414_v26, %v5910_v39  ;;  %v1516_v45 = vmul.f32 %v1450_v53, %v6019_v24  ;;  %v1518_v7 = vmul.f32 %v1454_v35, %v6026_v9  ;;  %v1493_v39 = vmul.f32 %v1406_v37, %v5872_v44  ;;  %v8160_v9 = vld [vmem:[#allocation62_spill] sm:$0xff]  ;;  %v8161_v44 = vld [vmem:[#allocation65_spill] sm:$0xff] }
 0x21c   :  { %1630 = vperm.xlu0 %4748, %v1504_v41   ;;  %1535 = vperm.xlu1 %4747, %v1485_v55   ;;  %v1522_v17 = vmul.f32 %v1462_v30, %v8156_v16  ;;  %v1511_v24 = vmul.f32 %v1442_v57, %v8157_v62  ;;  %v1497_v25 = vmul.f32 %v1414_v26, %v8160_v9  ;;  %v8170_v16 = vld [vmem:[#allocation56_spill] sm:$0xff]  ;;  %v8171_v9 = vld [vmem:[#allocation31_spill] sm:$0xff] }
 0x21d   :  { %v1515_v5 = vmul.f32 %v1450_v53, %v8161_v44  ;;  %v1517_v13 = vmul.f32 %v1454_v35, %v8162_v8  ;;  %v1521_v36 = vmul.f32 %v1462_v30, %v6072_v50  ;;  %v8165_v50 = vld [vmem:[#allocation53_spill] sm:$0xff]  ;;  %v8168_v53 = vld [vmem:[#allocation38_spill] sm:$0xff] }
 0x21e   :  { %v8172_v44 = vld [vmem:[#allocation21_spill] sm:$0xff] }
 0x220   :  { %1640 = vperm.xlu0 %4748, %v1506_v32   ;;  %1540 = vperm.xlu1 %4747, %v1486_v34  }
 0x224   :  { %1650 = vperm.xlu0 %4748, %v1508_v31   ;;  %1545 = vperm.xlu1 %4747, %v1487_v29  }
 0x228   :  { %1660 = vperm.xlu0 %4748, %v1510_v63   ;;  %1550 = vperm.xlu1 %4747, %v1488_v47  }
 0x22c   :  { %1570 = vperm.xlu0 %4748, %v1492_v59   ;;  %1555 = vperm.xlu1 %4747, %v1489_v0   ;;  %v8164_v59 = vld [vmem:[#allocation52_spill] sm:$0xff] }
 0x230   :  { %1580 = vperm.xlu0 %4748, %v1494_v33   ;;  %1560 = vperm.xlu1 %4747, %v1490_v4   ;;  %v8166_v33 = vld [vmem:[#allocation54_spill] sm:$0xff] }
 0x234   :  { %1670 = vperm.xlu0 %4748, %v1512_v61   ;;  %1625 = vperm.xlu1 %4747, %v1503_v54  }
 0x238   :  { %1680 = vperm.xlu0 %4748, %v1514_v20   ;;  %1635 = vperm.xlu1 %4747, %v1505_v6  }
 0x23c   :  { %1590 = vperm.xlu0 %4748, %v1496_v38   ;;  %1645 = vperm.xlu1 %4747, %v1507_v43  }
 0x240   :  { %1600 = vperm.xlu0 %4748, %v1498_v19   ;;  %1655 = vperm.xlu1 %4747, %v1509_v51   ;;  %v8167_v19 = vld [vmem:[#allocation36_spill] sm:$0xff] }
 0x244   :  { %1690 = vperm.xlu0 %4748, %v1516_v45   ;;  %1565 = vperm.xlu1 %4747, %v1491_v42  }
 0x248   :  { %1700 = vperm.xlu0 %4748, %v1518_v7   ;;  %1575 = vperm.xlu1 %4747, %v1493_v39   ;;  %v8169_v39 = vld [vmem:[#allocation55_spill] sm:$0xff] }
 0x24c   :  { %1720 = vperm.xlu0 %4748, %v1522_v17   ;;  %1665 = vperm.xlu1 %4747, %v1511_v24  }
 0x250   :  { %1675 = vperm.xlu1 %4747, %v1513_v46  }
 0x254   :  { %1585 = vperm.xlu1 %4747, %v1495_v58  }
 0x258   :  { %1595 = vperm.xlu1 %4747, %v1497_v25  }
 0x25c   :  { %1685 = vperm.xlu1 %4747, %v1515_v5  }
 0x260   :  { %1695 = vperm.xlu1 %4747, %v1517_v13  }
 0x264   :  { %1715 = vperm.xlu1 %4747, %v1521_v36  }
 0x284   :  { %v1611_v41 = vpop.permute.xlu0 %1610  ;;  %v1606_v55 = vpop.permute.xlu1 %1605 }
 0x285   :  { %v1740_v21 = vmul.f32 %v1611_v41, %v8163_v48  ;;  %v1739_v0 = vmul.f32 %v1606_v55, %v8164_v59  ;;  %v8173_v41 = vld [vmem:[#allocation37_spill] sm:$0xff] }
 0x287   :  { %v1836_v54 = vsel %vm873_vm0, %v1740_v21, 0.0  ;;  %v1835_v18 = vsel %vm873_vm0, %v1739_v0, 0.0 }
 0x288   :  { %v1621_v56 = vpop.permute.xlu0 %1620  ;;  %v1616_v32 = vpop.permute.xlu1 %1615  ;;  %v1837_v22 = vadd.f32 %v1836_v54, %v1835_v18 }
 0x289   :  { %v1742_v37 = vmul.f32 %v1621_v56, %v8165_v50  ;;  %v1741_v4 = vmul.f32 %v1616_v32, %v8166_v33  ;;  %v8174_v56 = vld [vmem:[#allocation33_spill] sm:$0xff] }
 0x28a   :  { %v1838_v42 = vrot.slane %v1837_v22, 4  ;;  %v8194_v50 = vld [vmem:[#allocation41_spill] sm:$0xff] }
 0x28b   :  { %v1845_v20 = vsel %vm873_vm0, %v1742_v37, 0.0  ;;  %v1844_v6 = vsel %vm873_vm0, %v1741_v4, 0.0  ;;  %v8176_v4 = vld [vmem:[#allocation35_spill] sm:$0xff] }
 0x28c   :  { %v1846_v38 = vadd.f32 %v1845_v20, %v1844_v6  ;;  %v1839_v46 = vadd.f32 %v1838_v42, %v1837_v22 }
 0x28e   :  { %v1847_v35 = vrot.slane %v1846_v38, 4 }
 0x290   :  { %v1848_v1 = vadd.f32 %v1847_v35, %v1846_v38 }
 0x293   :  { %v1711_v34 = vpop.permute.xlu0 %1710  ;;  %v1706_v3 = vpop.permute.xlu1 %1705 }
 0x294   :  { %v1760_v30 = vmul.f32 %v1711_v34, %v8169_v39  ;;  %v1759_v17 = vmul.f32 %v1706_v3, %v8170_v16  ;;  %v8175_v34 = vld [vmem:[#allocation22_spill] sm:$0xff] }
 0x296   :  { %v1926_v8 = vsel %vm873_vm0, %v1760_v30, 0.0  ;;  %v1925_v13 = vsel %vm873_vm0, %v1759_v17, 0.0 }
 0x297   :  { %v1526_v14 = vpop.permute.xlu0 %1525  ;;  %v1531_v31 = vpop.permute.xlu1 %1530  ;;  %v1927_v37 = vadd.f32 %v1926_v8, %v1925_v13  ;;  %v8177_v13 = vld [vmem:[#allocation19_spill] sm:$0xff] }
 0x298   :  { %v1723_v51 = vmul.f32 %v1526_v14, %v8167_v19  ;;  %v1724_v45 = vmul.f32 %v1531_v31, %v8168_v53  ;;  %v1840_v14 = vrot.slane %v1839_v46, 2  ;;  %v1849_v31 = vrot.slane %v1848_v1, 2 }
 0x299   :  { %v1928_v35 = vrot.slane %v1927_v37, 4 }
 0x29a   :  { %v1763_v24 = vsel %vm873_vm0, %v1723_v51, 0.0  ;;  %v1764_v11 = vsel %vm873_vm0, %v1724_v45, 0.0  ;;  %v1841_v38 = vadd.f32 %v1840_v14, %v1839_v46  ;;  %v1850_v42 = vadd.f32 %v1849_v31, %v1848_v1 }
 0x29b   :  { %v6184_v29 = vpop.permute.xlu0 %1630  ;;  %v1536_v12 = vpop.permute.xlu1 %1535  ;;  %v1765_v36 = vadd.f32 %v1764_v11, %v1763_v24  ;;  %v1929_v8 = vadd.f32 %v1928_v35, %v1927_v37  ;;  %v8181_v37 = vld [vmem:[#allocation20_spill] sm:$0xff]  ;;  %v8182_v35 = vld [vmem:[#allocation23_spill] sm:$0xff] }
 0x29c   :  { %v1725_v54 = vmul.f32 %v1536_v12, %v8176_v4  ;;  %v1842_v24 = vrot.slane %v1841_v38, 1 }
 0x29d   :  { %v1766_v6 = vrot.slane %v1765_v36, 4 }
 0x29e   :  { %v6223_v1 = vadd.f32 %v1842_v24, %v1841_v38  ;;  %v8183_v38 = vld [vmem:[#allocation28_spill] sm:$0xff] }
 0x29f   :  { %v6186_v63 = vpop.permute.xlu0 %1640  ;;  %v1541_v47 = vpop.permute.xlu1 %1540  ;;  %v1767_v12 = vadd.f32 %v1766_v6, %v1765_v36  ;;  %v1930_v6 = vrot.slane %v1929_v8, 2 }
 0x2a0   :  { %v1726_v55 = vmul.f32 %v1541_v47, %v8173_v41  ;;  %8179 = vst [vmem:[#allocation67_spill] sm:$0xff] %v6223_v1 }
 0x2a2   :  { %v1773_v22 = vsel %vm873_vm0, %v1726_v55, 0.0 }
 0x2a3   :  { %v6192_v57 = vpop.permute.xlu0 %1650  ;;  %v1546_v61 = vpop.permute.xlu1 %1545 }
 0x2a4   :  { %v1727_v32 = vmul.f32 %v1546_v61, %v8174_v56 }
 0x2a6   :  { %v1781_v47 = vsel %vm873_vm0, %v1727_v32, 0.0  ;;  %v1768_v32 = vrot.slane %v1767_v12, 2 }
 0x2a7   :  { %v6198_v43 = vpop.permute.xlu0 %1660  ;;  %v1551_v26 = vpop.permute.xlu1 %1550 }
 0x2a8   :  { %v1728_v25 = vmul.f32 %v1551_v26, %v8171_v9 }
 0x2aa   :  { %v1782_v18 = vsel %vm873_vm0, %v1728_v25, 0.0 }
 0x2ab   :  { %v1556_v7 = vpop.permute.xlu1 %1555  ;;  %v1571_v62 = vpop.permute.xlu0 %1570  ;;  %v1783_v26 = vadd.f32 %v1782_v18, %v1781_v47  ;;  %v1769_v47 = vadd.f32 %v1768_v32, %v1767_v12 }
 0x2ac   :  { %v1729_v3 = vmul.f32 %v1556_v7, %v8175_v34  ;;  %v1772_v7 = vsel %vm873_vm0, %v1725_v54, 0.0  ;;  %v1732_v24 = vmul.f32 %v1571_v62, %v8183_v38  ;;  %v8186_v62 = vld [vmem:[#allocation26_spill] sm:$0xff] }
 0x2ad   :  { %v1774_v30 = vadd.f32 %v1773_v22, %v1772_v7  ;;  %v1784_v11 = vrot.slane %v1783_v26, 4 }
 0x2ae   :  { %v1790_v61 = vsel %vm873_vm0, %v1729_v3, 0.0  ;;  %v8178_v3 = vld [vmem:[#allocation32_spill] sm:$0xff] }
 0x2af   :  { %v1561_v58 = vpop.permute.xlu1 %1560  ;;  %v1581_v21 = vpop.permute.xlu0 %1580  ;;  %v1775_v46 = vrot.slane %v1774_v30, 4  ;;  %v1744_v14 = vmul.f32 %v6184_v29, %v8178_v3  ;;  %v1785_v31 = vadd.f32 %v1784_v11, %v1783_v26  ;;  %v8184_v26 = vld [vmem:[#allocation25_spill] sm:$0xff] }
 0x2b0   :  { %v1730_v5 = vmul.f32 %v1561_v58, %v8172_v44 }
 0x2b1   :  { %v1854_v29 = vsel %vm873_vm0, %v1744_v14, 0.0  ;;  %v1786_v11 = vrot.slane %v1785_v31, 2 }
 0x2b2   :  { %v1791_v20 = vsel %vm873_vm0, %v1730_v5, 0.0  ;;  %v1851_v5 = vrot.slane %v1850_v42, 1 }
 0x2b3   :  { %v1626_v0 = vpop.permute.xlu1 %1625  ;;  %v1792_v51 = vadd.f32 %v1791_v20, %v1790_v61  ;;  %v1671_v17 = vpop.permute.xlu0 %1670  ;;  %v1776_v61 = vadd.f32 %v1775_v46, %v1774_v30  ;;  %v6242_v30 = vadd.f32 %v1930_v6, %v1929_v8  ;;  %v1787_v6 = vadd.f32 %v1786_v11, %v1785_v31 }
 0x2b4   :  { %v1743_v55 = vmul.f32 %v1626_v0, %v8177_v13  ;;  %v6225_v20 = vadd.f32 %v1851_v5, %v1850_v42  ;;  %v1746_v0 = vmul.f32 %v6186_v63, %v8181_v37  ;;  %v6236_v42 = vsel %vm873_vm0, %v6223_v1, -inf }
 0x2b5   :  { %v1793_v58 = vrot.slane %v1792_v51, 4  ;;  %v1777_v14 = vrot.slane %v1776_v61, 2 }
 0x2b6   :  { %8180 = vst [vmem:[#allocation63_spill] sm:$0xff] %v6225_v20  ;;  %v1853_v22 = vsel %vm873_vm0, %v1743_v55, 0.0  ;;  %v6240_v63 = vsel %vm873_vm0, %v6225_v20, -inf  ;;  %v1863_v46 = vsel %vm873_vm0, %v1746_v0, 0.0  ;;  %v8188_v0 = vld [vmem:[#allocation27_spill] sm:$0xff] }
 0x2b7   :  { %v1636_v45 = vpop.permute.xlu1 %1635  ;;  %v1794_v54 = vadd.f32 %v1793_v58, %v1792_v51  ;;  %v1681_v36 = vpop.permute.xlu0 %1680  ;;  %v1855_v5 = vadd.f32 %v1854_v29, %v1853_v22  ;;  %v1800_v22 = vsel %vm873_vm0, %v1732_v24, 0.0  ;;  %v8187_v29 = vld [vmem:[#allocation39_spill] sm:$0xff]  ;;  %v1750_v60 = vmul.f32 %v6198_v43, %v8188_v0 }
 0x2b8   :  { %v1745_v7 = vmul.f32 %v1636_v45, %v8182_v35  ;;  %v8185_v45 = vld [vmem:[#allocation34_spill] sm:$0xff]  ;;  %v1734_v10 = vmul.f32 %v1581_v21, %v8187_v29  ;;  %v1778_v21 = vadd.f32 %v1777_v14, %v1776_v61  ;;  %v1754_v59 = vmul.f32 %v1681_v36, %v8194_v50 }
 0x2b9   :  { %v1795_v58 = vrot.slane %v1794_v54, 2  ;;  %v1748_v55 = vmul.f32 %v6192_v57, %v8185_v45  ;;  %v1856_v57 = vrot.slane %v1855_v5, 4  ;;  %v1881_v61 = vsel %vm873_vm0, %v1750_v60, 0.0  ;;  %v8197_v29 = vld [vmem:[#allocation42_spill] sm:$0xff] }
 0x2ba   :  { %v1862_v49 = vsel %vm873_vm0, %v1745_v7, 0.0  ;;  %v1809_v31 = vsel %vm873_vm0, %v1734_v10, 0.0  ;;  %v1779_v14 = vrot.slane %v1778_v21, 1 }
 0x2bb   :  { %v1646_v25 = vpop.permute.xlu1 %1645  ;;  %v1591_v52 = vpop.permute.xlu0 %1590  ;;  %v1796_v15 = vadd.f32 %v1795_v58, %v1794_v54  ;;  %v1872_v40 = vsel %vm873_vm0, %v1748_v55, 0.0  ;;  %v1864_v7 = vadd.f32 %v1863_v46, %v1862_v49  ;;  %v8191_v54 = vld [vmem:[#allocation29_spill] sm:$0xff]  ;;  %v1788_v55 = vrot.slane %v1787_v6, 1 }
 0x2bc   :  { %v1747_v51 = vmul.f32 %v1646_v25, %v8184_v26  ;;  %v1770_v25 = vrot.slane %v1769_v47, 1  ;;  %v1752_v11 = vmul.f32 %v1671_v17, %v8191_v54  ;;  %v6279_v36 = vadd.f32 %v1779_v14, %v1778_v21 }
 0x2be   :  { %v1871_v28 = vsel %vm873_vm0, %v1747_v51, 0.0  ;;  %v8190_v51 = vld [vmem:[#allocation24_spill] sm:$0xff]  ;;  %8198 = vst [vmem:[#allocation65_spill] sm:$0xff] %v6279_v36 }
 0x2bf   :  { %v1656_v18 = vpop.permute.xlu1 %1655  ;;  %v1873_v39 = vadd.f32 %v1872_v40, %v1871_v28  ;;  %v1601_v43 = vpop.permute.xlu0 %1600  ;;  %v1865_v40 = vrot.slane %v1864_v7, 4  ;;  %v8193_v28 = vld [vmem:[#allocation30_spill] sm:$0xff] }
 0x2c0   :  { %v1749_v33 = vmul.f32 %v1656_v18, %v8190_v51 }
 0x2c1   :  { %v1874_v10 = vrot.slane %v1873_v39, 4 }
 0x2c2   :  { %v1880_v17 = vsel %vm873_vm0, %v1749_v33, 0.0 }
 0x2c3   :  { %v1566_v12 = vpop.permute.xlu1 %1565  ;;  %v1882_v48 = vadd.f32 %v1881_v61, %v1880_v17  ;;  %v6295_v17 = vsel %vm873_vm0, %v6279_v36, -inf }
 0x2c4   :  { %v1731_v32 = vmul.f32 %v1566_v12, %v8186_v62 }
 0x2c6   :  { %v1799_v8 = vsel %vm873_vm0, %v1731_v32, 0.0 }
 0x2c7   :  { %v1801_v27 = vadd.f32 %v1800_v22, %v1799_v8  ;;  %v1576_v12 = vpop.permute.xlu1 %1575  ;;  %v1797_v22 = vrot.slane %v1796_v15, 1  ;;  %v1857_v8 = vadd.f32 %v1856_v57, %v1855_v5 }
 0x2c8   :  { %v1733_v16 = vmul.f32 %v1576_v12, %v8189_v23  ;;  %v6262_v12 = vadd.f32 %v1770_v25, %v1769_v47 }
 0x2c9   :  { %v1802_v58 = vrot.slane %v1801_v27, 4  ;;  %v6272_v47 = vadd.f32 %v1797_v22, %v1796_v15  ;;  %v1858_v60 = vrot.slane %v1857_v8, 2  ;;  %v1899_v15 = vsel %vm873_vm0, %v1754_v59, 0.0 }
 0x2ca   :  { %v1808_v32 = vsel %vm873_vm0, %v1733_v16, 0.0  ;;  %8192 = vst [vmem:[#allocation64_spill] sm:$0xff] %v6262_v12  ;;  %v1890_v16 = vsel %vm873_vm0, %v1752_v11, 0.0  ;;  %v6277_v11 = vsel %vm873_vm0, %v6262_v12, -inf }
 0x2cb   :  { %v1810_v49 = vadd.f32 %v1809_v31, %v1808_v32  ;;  %v1666_v46 = vpop.permute.xlu1 %1665  ;;  %v1803_v5 = vadd.f32 %v1802_v58, %v1801_v27  ;;  %v6270_v31 = vadd.f32 %v1788_v55, %v1787_v6  ;;  %8196 = vst [vmem:[#allocation62_spill] sm:$0xff] %v6272_v47  ;;  %v8199_v27 = vld [vmem:[#allocation43_spill] sm:$0xff]  ;;  %v1875_v6 = vadd.f32 %v1874_v10, %v1873_v39  ;;  %v1691_v55 = vpop.permute.xlu0 %1690  ;;  %v8200_v10 = vld [vmem:[#allocation44_spill] sm:$0xff] }
 0x2cc   :  { %v1751_v18 = vmul.f32 %v1666_v46, %v8193_v28  ;;  %v1866_v46 = vadd.f32 %v1865_v40, %v1864_v7  ;;  %v1736_v58 = vmul.f32 %v1591_v52, %v8199_v27  ;;  %v1859_v21 = vadd.f32 %v1858_v60, %v1857_v8 }
 0x2cd   :  { %v1811_v24 = vrot.slane %v1810_v49, 4  ;;  %8195 = vst [vmem:[#allocation61_spill] sm:$0xff] %v6270_v31  ;;  %v1804_v22 = vrot.slane %v1803_v5, 2  ;;  %v1883_v39 = vrot.slane %v1882_v48, 4 }
 0x2ce   :  { %v1889_v57 = vsel %vm873_vm0, %v1751_v18, 0.0  ;;  %v1867_v52 = vrot.slane %v1866_v46, 2 }
 0x2cf   :  { %v1891_v25 = vadd.f32 %v1890_v16, %v1889_v57  ;;  %v1676_v32 = vpop.permute.xlu1 %1675  ;;  %v1812_v23 = vadd.f32 %v1811_v24, %v1810_v49  ;;  %v6286_v24 = vsel %vm873_vm0, %v6270_v31, -inf  ;;  %v6290_v49 = vsel %vm873_vm0, %v6272_v47, -inf }
 0x2d0   :  { %v1753_v33 = vmul.f32 %v1676_v32, %v8197_v29  ;;  %v1818_v16 = vsel %vm873_vm0, %v1736_v58, 0.0  ;;  %v1876_v57 = vrot.slane %v1875_v6, 2  ;;  %v8201_v32 = vld [vmem:[#allocation47_spill] sm:$0xff]  ;;  %v1805_v27 = vadd.f32 %v1804_v22, %v1803_v5 }
 0x2d1   :  { %v1892_v18 = vrot.slane %v1891_v25, 4  ;;  %v1813_v14 = vrot.slane %v1812_v23, 2  ;;  %v6304_v54 = vadd.f32 %v1867_v52, %v1866_v46  ;;  %v1884_v58 = vadd.f32 %v1883_v39, %v1882_v48 }
 0x2d2   :  { %v1898_v7 = vsel %vm873_vm0, %v1753_v33, 0.0  ;;  %v1738_v33 = vmul.f32 %v1601_v43, %v8201_v32  ;;  %v8202_v43 = vld [vmem:[#allocation48_spill] sm:$0xff]  ;;  %v1806_v60 = vrot.slane %v1805_v27, 1 }
 0x2d3   :  { %v1900_v61 = vadd.f32 %v1899_v15, %v1898_v7  ;;  %v1586_v40 = vpop.permute.xlu1 %1585  ;;  %v1893_v29 = vadd.f32 %v1892_v18, %v1891_v25  ;;  %v1860_v7 = vrot.slane %v1859_v21, 1  ;;  %v1814_v62 = vadd.f32 %v1813_v14, %v1812_v23  ;;  %v8203_v18 = vld [vmem:[#allocation45_spill] sm:$0xff]  ;;  %v8206_v14 = vld [vmem:[#allocation46_spill] sm:$0xff] }
 0x2d4   :  { %v1735_v59 = vmul.f32 %v1586_v40, %v8200_v10  ;;  %v1701_v40 = vpop.permute.xlu0 %1700  ;;  %v1877_v25 = vadd.f32 %v1876_v57, %v1875_v6  ;;  %v1827_v22 = vsel %vm873_vm0, %v1738_v33, 0.0  ;;  %v1885_v6 = vrot.slane %v1884_v58, 2 }
 0x2d5   :  { %v1901_v50 = vrot.slane %v1900_v61, 4  ;;  %v1894_v38 = vrot.slane %v1893_v29, 2  ;;  %v6310_v0 = vadd.f32 %v1860_v7, %v1859_v21  ;;  %v1815_v39 = vrot.slane %v1814_v62, 1 }
 0x2d6   :  { %v1817_v8 = vsel %vm873_vm0, %v1735_v59, 0.0  ;;  %v1756_v59 = vmul.f32 %v1691_v55, %v8203_v18  ;;  %v1878_v55 = vrot.slane %v1877_v25, 1  ;;  %v8210_v18 = vld [vmem:[#allocation50_spill] sm:$0xff] }
 0x2d7   :  { %v1819_v10 = vadd.f32 %v1818_v16, %v1817_v8  ;;  %v1596_v28 = vpop.permute.xlu1 %1595  ;;  %v1902_v51 = vadd.f32 %v1901_v50, %v1900_v61  ;;  %8204 = vst [vmem:[#allocation66_spill] sm:$0xff] %v6310_v0  ;;  %v8205_v16 = vld [vmem:[#allocation49_spill] sm:$0xff]  ;;  %v1895_v21 = vadd.f32 %v1894_v38, %v1893_v29 }
 0x2d8   :  { %v1737_v5 = vmul.f32 %v1596_v28, %v8202_v43  ;;  %v1758_v46 = vmul.f32 %v1701_v40, %v8205_v16  ;;  %v1869_v28 = vrot.slane %v6304_v54, 1  ;;  %v1908_v33 = vsel %vm873_vm0, %v1756_v59, 0.0  ;;  %v1721_v8 = vpop.permute.xlu0 %1720 }
 0x2d9   :  { %v1820_v32 = vrot.slane %v1819_v10, 4  ;;  %v1903_v7 = vrot.slane %v1902_v51, 2  ;;  %v1886_v43 = vadd.f32 %v1885_v6, %v1884_v58  ;;  %v6324_v44 = vadd.f32 %v1878_v55, %v1877_v25  ;;  %v8213_v55 = vld [vmem:[#allocation58_spill] sm:$0xff] }
 0x2da   :  { %v1826_v15 = vsel %vm873_vm0, %v1737_v5, 0.0  ;;  %v6316_v5 = vadd.f32 %v1806_v60, %v1805_v27 }
 0x2db   :  { %v1821_v52 = vadd.f32 %v1820_v32, %v1819_v10  ;;  %v1828_v48 = vadd.f32 %v1827_v22, %v1826_v15  ;;  %v1686_v23 = vpop.permute.xlu1 %1685  ;;  %v1917_v32 = vsel %vm873_vm0, %v1758_v46, 0.0  ;;  %8211 = vst [vmem:[#allocation70_spill] sm:$0xff] %v6324_v44  ;;  %v1896_v46 = vrot.slane %v1895_v21, 1 }
 0x2dc   :  { %v1755_v57 = vmul.f32 %v1686_v23, %v8206_v14  ;;  %8207 = vst [vmem:[#allocation68_spill] sm:$0xff] %v6316_v5  ;;  %v6320_v23 = vadd.f32 %v1815_v39, %v1814_v62  ;;  %v8209_v14 = vld [vmem:[#allocation57_spill] sm:$0xff]  ;;  %v1949_v60 = vsel %vm873_vm0, %v6316_v5, -inf }
 0x2dd   :  { %v1822_v50 = vrot.slane %v1821_v52, 2  ;;  %v1829_v61 = vrot.slane %v1828_v48, 4  ;;  %v1762_v59 = vmul.f32 %v1721_v8, %v8209_v14 }
 0x2de   :  { %v1907_v10 = vsel %vm873_vm0, %v1755_v57, 0.0  ;;  %8208 = vst [vmem:[#allocation69_spill] sm:$0xff] %v6320_v23  ;;  %v1951_v25 = vsel %vm873_vm0, %v6320_v23, -inf }
 0x2df   :  { %v1823_v15 = vadd.f32 %v1822_v50, %v1821_v52  ;;  %v1830_v40 = vadd.f32 %v1829_v61, %v1828_v48  ;;  %v1909_v22 = vadd.f32 %v1908_v33, %v1907_v10  ;;  %v1696_v16 = vpop.permute.xlu1 %1695  ;;  %v1904_v52 = vadd.f32 %v1903_v7, %v1902_v51 }
 0x2e0   :  { %v1757_v34 = vmul.f32 %v1696_v16, %v8210_v18  ;;  %v1887_v33 = vrot.slane %v1886_v43, 1  ;;  %v1935_v16 = vsel %vm873_vm0, %v1762_v59, 0.0  ;;  %v8214_v7 = vmax.f32 %v6277_v11, %v6286_v24 }
 0x2e1   :  { %v1824_v27 = vrot.slane %v1823_v15, 1  ;;  %v1831_v38 = vrot.slane %v1830_v40, 2  ;;  %v1910_v29 = vrot.slane %v1909_v22, 4 }
 0x2e2   :  { %v1916_v48 = vsel %vm873_vm0, %v1757_v34, 0.0  ;;  %v1950_v10 = vmax.f32 %v8214_v7, %v1949_v60 }
 0x2e3   :  { %v6329_v57 = vadd.f32 %v1824_v27, %v1823_v15  ;;  %v1832_v62 = vadd.f32 %v1831_v38, %v1830_v40  ;;  %v1911_v58 = vadd.f32 %v1910_v29, %v1909_v22  ;;  %v1918_v6 = vadd.f32 %v1917_v32, %v1916_v48  ;;  %v1716_v39 = vpop.permute.xlu1 %1715 }
 0x2e4   :  { %v1761_v8 = vmul.f32 %v1716_v39, %v8213_v55  ;;  %v6340_v32 = vadd.f32 %v1896_v46, %v1895_v21  ;;  %v1905_v15 = vrot.slane %v1904_v52, 1  ;;  %v1964_v29 = vsel %vm873_vm0, %v6324_v44, -inf }
 0x2e5   :  { %8212 = vst [vmem:[#allocation71_spill] sm:$0xff] %v6329_v57  ;;  %v1953_v50 = vsel %vm873_vm0, %v6329_v57, -inf  ;;  %v1833_v51 = vrot.slane %v1832_v62, 1  ;;  %v1912_v61 = vrot.slane %v1911_v58, 2  ;;  %v1919_v34 = vrot.slane %v1918_v6, 4 }
 0x2e6   :  { %8215 = vst [vmem:[#allocation72_spill] sm:$0xff] %v6340_v32  ;;  %v1934_v40 = vsel %vm873_vm0, %v1761_v8, 0.0  ;;  %v6347_v48 = vadd.f32 %v1887_v33, %v1886_v43  ;;  %v8218_v39 = vmax.f32 %v6295_v17, %v6290_v49  ;;  %v1954_v24 = vmax.f32 %v1950_v10, %v1953_v50 }
 0x2e7   :  { %v6343_v22 = vadd.f32 %v1833_v51, %v1832_v62  ;;  %v1913_v59 = vadd.f32 %v1912_v61, %v1911_v58  ;;  %v1920_v27 = vadd.f32 %v1919_v34, %v1918_v6  ;;  %v1936_v38 = vadd.f32 %v1935_v16, %v1934_v40 }
 0x2e8   :  { %8217 = vst [vmem:[#allocation74_spill] sm:$0xff] %v6347_v48  ;;  %v1952_v11 = vmax.f32 %v8218_v39, %v1951_v25  ;;  %v1962_v58 = vsel %vm873_vm0, %v6310_v0, -inf  ;;  %v6357_v6 = vadd.f32 %v1869_v28, %v6304_v54  ;;  %v1968_v43 = vsel %vm873_vm0, %v6340_v32, -inf }
 0x2e9   :  { %8216 = vst [vmem:[#allocation73_spill] sm:$0xff] %v6343_v22  ;;  %v1955_v21 = vsel %vm873_vm0, %v6343_v22, -inf  ;;  %v1914_v60 = vrot.slane %v1913_v59, 1  ;;  %v1921_v46 = vrot.slane %v1920_v27, 2  ;;  %v1937_v62 = vrot.slane %v1936_v38, 4 }
 0x2ea   :  { %8219 = vst [vmem:[#allocation75_spill] sm:$0xff] %v6357_v6  ;;  %v1956_v33 = vmax.f32 %v1952_v11, %v1955_v21  ;;  %v6361_v16 = vadd.f32 %v1905_v15, %v1904_v52  ;;  %v1965_v8 = vmax.f32 %v1962_v58, %v1964_v29  ;;  %v1958_v50 = vmax.f32 %v1954_v24, %v6236_v42 }
 0x2eb   :  { %v6363_v49 = vadd.f32 %v1914_v60, %v1913_v59  ;;  %v1922_v17 = vadd.f32 %v1921_v46, %v1920_v27  ;;  %v1938_v25 = vadd.f32 %v1937_v62, %v1936_v38  ;;  %v1966_v61 = vsel %vm873_vm0, %v6347_v48, -inf }
 0x2ec   :  { %8220 = vst [vmem:[#allocation76_spill] sm:$0xff] %v6361_v16  ;;  %v1960_v51 = vmax.f32 %v1956_v33, %v6240_v63  ;;  %v8222_v52 = vrot.slane %v6242_v30, 1  ;;  %v1969_v10 = vmax.f32 %v1965_v8, %v1968_v43  ;;  %v1963_v42 = vsel %vm873_vm0, %v6357_v6, -inf }
 0x2ed   :  { %8221 = vst [vmem:[#allocation77_spill] sm:$0xff] %v6363_v49  ;;  %v1972_v54 = vsel %vm873_vm0, %v6363_v49, -inf  ;;  %v1923_v28 = vrot.slane %v1922_v17, 1  ;;  %v1939_v34 = vrot.slane %v1938_v25, 2  ;;  %v1970_v63 = vsel %vm873_vm0, %v6361_v16, -inf }
 0x2ee   :  { %v6374_v7 = vadd.f32 %v8222_v52, %v6242_v30  ;;  %v1961_v15 = vmax.f32 %v1958_v50, %v1960_v51  ;;  %v1967_v27 = vmax.f32 %v1963_v42, %v1966_v61  ;;  %v1973_v29 = vmax.f32 %v1969_v10, %v1972_v54 }
 0x2ef   :  { %v6380_v40 = vadd.f32 %v1923_v28, %v1922_v17  ;;  %v1940_v59 = vadd.f32 %v1939_v34, %v1938_v25 }
 0x2f0   :  { %8223 = vst [vmem:[#allocation78_spill] sm:$0xff] %v6374_v7  ;;  %v1988_v38 = vsub.f32 %v6343_v22, %v1961_v15  ;;  %v1990_v39 = vsub.f32 %v6225_v20, %v1961_v15  ;;  %v1982_v24 = vsub.f32 %v6279_v36, %v1961_v15  ;;  %v1976_v21 = vsel %vm873_vm0, %v6374_v7, -inf  ;;  %v8253_v36 = vld [vmem:[#allocation59_spill] sm:$0xff] }
 0x2f1   :  { %8224 = vst [vmem:[#allocation79_spill] sm:$0xff] %v6380_v40  ;;  %v1974_v30 = vsel %vm873_vm0, %v6380_v40, -inf  ;;  %v1941_v11 = vrot.slane %v1940_v59, 1  ;;  %v1971_v60 = vmax.f32 %v1967_v27, %v1970_v63  ;;  %v1981_v62 = vsub.f32 %v6262_v12, %v1961_v15  ;;  %v8254_v12 = vld [vmem:[#allocation60_spill] sm:$0xff] }
 0x2f2   :  { %v2015_v46 = vmul.f32 1.442695, %v1988_v38  ;;  %v2019_v58 = vmul.f32 1.442695, %v1990_v39  ;;  %v1983_v33 = vsub.f32 %v6270_v31, %v1961_v15  ;;  %v1984_v17 = vsub.f32 %v6272_v47, %v1961_v15 }
 0x2f3   :  { %v6390_v43 = vadd.f32 %v1941_v11, %v1940_v59  ;;  %v1977_v25 = vmax.f32 %v1973_v29, %v1976_v21  ;;  %v1975_v8 = vmax.f32 %v1971_v60, %v1974_v30  ;;  %v1985_v50 = vsub.f32 %v6316_v5, %v1961_v15 }
 0x2f4   :  { %v1986_v61 = vsub.f32 %v6320_v23, %v1961_v15  ;;  %v2003_v54 = vmul.f32 1.442695, %v1982_v24  ;;  %v2005_v28 = vmul.f32 1.442695, %v1983_v33  ;;  %4765 = vpow2.f32 %v2015_v46 }
 0x2f5   :  { %8225 = vst [vmem:[#allocation80_spill] sm:$0xff] %v6390_v43  ;;  %v1978_v51 = vsel %vm873_vm0, %v6390_v43, -inf  ;;  %v1989_v34 = vsub.f32 %v6223_v1, %v1961_v15  ;;  %v2001_v10 = vmul.f32 1.442695, %v1981_v62  ;;  %4767 = vpow2.f32 %v2019_v58 }
 0x2f6   :  { %v1979_v52 = vmax.f32 %v1975_v8, %v1978_v51  ;;  %v2007_v42 = vmul.f32 1.442695, %v1984_v17  ;;  %4769 = vpow2.f32 %v2003_v54  ;;  %v2009_v59 = vmul.f32 1.442695, %v1985_v50 }
 0x2f7   :  { %v1987_v27 = vsub.f32 %v6329_v57, %v1961_v15  ;;  %4771 = vpow2.f32 %v2005_v28  ;;  %v2011_v38 = vmul.f32 1.442695, %v1986_v61  ;;  %v2017_v29 = vmul.f32 1.442695, %v1989_v34 }
 0x2f8   :  { %v1980_v63 = vmax.f32 %v1977_v25, %v1979_v52  ;;  %4773 = vpow2.f32 %v2001_v10 }
 0x2f9   :  { %4775 = vpow2.f32 %v2007_v42  ;;  %v2013_v15 = vmul.f32 1.442695, %v1987_v27 }
 0x2fa   :  { %v1998_v39 = vsub.f32 %v6380_v40, %v1980_v63  ;;  %v2000_v30 = vsub.f32 %v6390_v43, %v1980_v63  ;;  %v1991_v11 = vsub.f32 %v6310_v0, %v1980_v63  ;;  %v1992_v24 = vsub.f32 %v6357_v6, %v1980_v63 }
 0x2fb   :  { %4777 = vpow2.f32 %v2009_v59  ;;  %v1993_v60 = vsub.f32 %v6324_v44, %v1980_v63  ;;  %v1994_v62 = vsub.f32 %v6347_v48, %v1980_v63  ;;  %v1995_v58 = vsub.f32 %v6340_v32, %v1980_v63 }
 0x2fc   :  { %v2035_v21 = vmul.f32 1.442695, %v1998_v39  ;;  %v2039_v46 = vmul.f32 1.442695, %v2000_v30  ;;  %4779 = vpow2.f32 %v2011_v38  ;;  %v2021_v33 = vmul.f32 1.442695, %v1991_v11 }
 0x2fd   :  { %4781 = vpow2.f32 %v2017_v29  ;;  %v1996_v17 = vsub.f32 %v6361_v16, %v1980_v63  ;;  %v2023_v25 = vmul.f32 1.442695, %v1992_v24  ;;  %v1997_v50 = vsub.f32 %v6363_v49, %v1980_v63 }
 0x2fe   :  { %4783 = vpow2.f32 %v2035_v21  ;;  %v6408_v8 = vpop.eup %4765  ;;  %v2025_v51 = vmul.f32 1.442695, %v1993_v60  ;;  %v1999_v54 = vsub.f32 %v6374_v7, %v1980_v63  ;;  %v2027_v28 = vmul.f32 1.442695, %v1994_v62 }
 0x2ff   :  { %4785 = vpow2.f32 %v2039_v46  ;;  %v6411_v61 = vpop.eup %4767  ;;  %v2029_v52 = vmul.f32 1.442695, %v1995_v58  ;;  %v2031_v59 = vmul.f32 1.442695, %v1996_v17  ;;  %v2033_v38 = vmul.f32 1.442695, %v1997_v50 }
 0x300   :  { %4787 = vpow2.f32 %v2013_v15  ;;  %v6414_v34 = vpop.eup %4769  ;;  %v2037_v63 = vmul.f32 1.442695, %v1999_v54  ;;  %v2075_v62 = vrot.slane %v6411_v61, 7 }
 0x301   :  { %4789 = vpow2.f32 %v2021_v33  ;;  %v6416_v10 = vpop.eup %4771  ;;  %v2061_v42 = vrot.slane %v6414_v34, 7 }
 0x302   :  { %4791 = vpow2.f32 %v2023_v25  ;;  %v6419_v27 = vpop.eup %4773  ;;  %v2063_v29 = vrot.slane %v6416_v10, 6 }
 0x303   :  { %4793 = vpow2.f32 %v2025_v51  ;;  %v6422_v39 = vpop.eup %4775  ;;  %v2062_v30 = vsel %vm1298_vm2, %v2061_v42, %v6419_v27 }
 0x304   :  { %4795 = vpow2.f32 %v2027_v28  ;;  %v2064_v24 = vsel %vm1300_vm3, %v2063_v29, %v2062_v30  ;;  %v2065_v21 = vrot.slane %v6422_v39, 5 }
 0x305   :  { %v6426_v11 = vpop.eup %4777  ;;  %4797 = vpow2.f32 %v2029_v52 }
 0x306   :  { %v6430_v60 = vpop.eup %4779  ;;  %v2067_v46 = vrot.slane %v6426_v11, 4  ;;  %4799 = vpow2.f32 %v2031_v59  ;;  %v2066_v58 = vsel %vm1302_vm4, %v2065_v21, %v2064_v24 }
 0x307   :  { %v6433_v15 = vpop.eup %4781  ;;  %4801 = vpow2.f32 %v2033_v38  ;;  %v2069_v25 = vrot.slane %v6430_v60, 3  ;;  %v2073_v38 = vrot.slane %v6408_v8, 1 }
 0x308   :  { %v6437_v33 = vpop.eup %4783  ;;  %4803 = vpow2.f32 %v2037_v63  ;;  %v2068_v17 = vsel %vm1304_vm5, %v2067_v46, %v2066_v58  ;;  %v2076_v52 = vsel %vm1298_vm2, %v2075_v62, %v6433_v15 }
 0x309   :  { %v6441_v50 = vpop.eup %4785  ;;  %v2070_v54 = vsel %vm1306_vm6, %v2069_v25, %v2068_v17  ;;  %v2099_v21 = vsel %vm2098_vm14, %v2076_v52, 0.0 }
 0x30a   :  { %v6443_v51 = vpop.eup %4787  ;;  %v2091_v17 = vrot.slane %v6441_v50, 7 }
 0x30b   :  { %v6446_v28 = vpop.eup %4789  ;;  %v2071_v42 = vrot.slane %v6443_v51, 2 }
 0x30c   :  { %v6451_v59 = vpop.eup %4791 }
 0x30d   :  { %v6454_v29 = vpop.eup %4793  ;;  %v2072_v63 = vsel %vm1308_vm7, %v2071_v42, %v2070_v54  ;;  %v2077_v30 = vrot.slane %v6451_v59, 7 }
 0x30e   :  { %v6458_v24 = vpop.eup %4795  ;;  %v2074_v46 = vsel %vm1310_vm8, %v2073_v38, %v2072_v63  ;;  %v2079_v62 = vrot.slane %v6454_v29, 6 }
 0x30f   :  { %v6463_v58 = vpop.eup %4797  ;;  %v2097_v25 = vsel %vm873_vm0, %v2074_v46, 0.0  ;;  %v2078_v43 = vsel %vm1298_vm2, %v2077_v30, %v6446_v28  ;;  %v2081_v54 = vrot.slane %v6458_v24, 5 }
 0x310   :  { %v6470_v42 = vpop.eup %4799  ;;  %v2100_v40 = vadd.f32 %v2099_v21, %v2097_v25  ;;  %v2080_v52 = vsel %vm1300_vm3, %v2079_v62, %v2078_v43  ;;  %v2083_v38 = vrot.slane %v6463_v58, 4  ;;  %v2089_v62 = vrot.slane %v6437_v33, 1 }
 0x311   :  { %v6474_v63 = vpop.eup %4801  ;;  %v2082_v7 = vsel %vm1302_vm4, %v2081_v54, %v2080_v52  ;;  %v2085_v49 = vrot.slane %v6470_v42, 3 }
 0x312   :  { %v6478_v16 = vpop.eup %4803  ;;  %v2101_v46 = vrot.slane %v2100_v40, 4  ;;  %v2084_v30 = vsel %vm1304_vm5, %v2083_v38, %v2082_v7  ;;  %v2087_v6 = vrot.slane %v6474_v63, 2 }
 0x313   :  { %v2092_v21 = vsel %vm1298_vm2, %v2091_v17, %v6478_v16  ;;  %v2086_v43 = vsel %vm1306_vm6, %v2085_v49, %v2084_v30 }
 0x314   :  { %v2102_v25 = vadd.f32 %v2101_v46, %v2100_v40  ;;  %v2088_v48 = vsel %vm1308_vm7, %v2087_v6, %v2086_v43  ;;  %v2108_v52 = vsel %vm2098_vm14, %v2092_v21, 0.0 }
 0x315   :  { %v2090_v54 = vsel %vm1310_vm8, %v2089_v62, %v2088_v48 }
 0x316   :  { %v2103_v32 = vrot.slane %v2102_v25, 2  ;;  %v2107_v22 = vsel %vm873_vm0, %v2090_v54, 0.0 }
 0x317   :  { %v2109_v7 = vadd.f32 %v2108_v52, %v2107_v22 }
 0x318   :  { %v2104_v38 = vadd.f32 %v2103_v32, %v2102_v25 }
 0x319   :  { %v2110_v44 = vrot.slane %v2109_v7, 4 }
 0x31a   :  { %v2105_v57 = vrot.slane %v2104_v38, 1 }
 0x31b   :  { %v2111_v23 = vadd.f32 %v2110_v44, %v2109_v7 }
 0x31c   :  { %v2106_v17 = vadd.f32 %v2105_v57, %v2104_v38 }
 0x31d   :  { %v2112_v5 = vrot.slane %v2111_v23, 2 }
 0x31e   :  { %4805 = vrcp.f32 %v2106_v17 }
 0x31f   :  { %v2113_v49 = vadd.f32 %v2112_v5, %v2111_v23 }
 0x321   :  { %v2114_v30 = vrot.slane %v2113_v49, 1 }
 0x323   :  { %v2115_v40 = vadd.f32 %v2114_v30, %v2113_v49 }
 0x325   :  { %4807 = vrcp.f32 %v2115_v40 }
 0x328   :  { %v4806_v6 = vpop.eup %4805 }
 0x329   :  { %v6491_v48 = vrot.slane %v4806_v6, %v5016_v2 }
 0x32b   :  { %v2126_v46 = vmul.f32 %v6419_v27, %v6491_v48  ;;  %v2127_v32 = vmul.f32 %v6414_v34, %v6491_v48  ;;  %v2128_v7 = vmul.f32 %v6416_v10, %v6491_v48 }
 0x32d   :  { %v2149_v22 = vrot.slane %v2126_v46, %v5016_v2  ;;  %v2153_v44 = vrot.slane %v2127_v32, %v5016_v2  ;;  %v2157_v6 = vrot.slane %v2128_v7, %v5016_v2 }
 0x32f   :  { %v4808_v57 = vpop.eup %4807  ;;  %v2227_v5 = vmul.f32 %v2149_v22, %v8168_v53  ;;  %v2226_v23 = vmul.f32 %v2149_v22, %v8167_v19  ;;  %v2228_v27 = vmul.f32 %v2153_v44, %v8176_v4  ;;  %v2229_v34 = vmul.f32 %v2153_v44, %v8173_v41 }
 0x330   :  { %v6502_v21 = vrot.slane %v4808_v57, %v5016_v2  ;;  %v2231_v22 = vmul.f32 %v2157_v6, %v8171_v9  ;;  %v2129_v44 = vmul.f32 %v6422_v39, %v6491_v48 }
 0x331   :  { %v2269_v43 = vsel %vm873_vm0, %v2227_v5, 0.0  ;;  %v2266_v62 = vsel %vm873_vm0, %v2226_v23, 0.0  ;;  %v2272_v38 = vsel %vm873_vm0, %v2228_v27, 0.0  ;;  %v2275_v17 = vsel %vm873_vm0, %v2229_v34, 0.0 }
 0x332   :  { %2270 = vadd.xlane.f32.xlu0 %v2269_v43  ;;  %2267 = vadd.xlane.f32.xlu1 %v2266_v62  ;;  %v2136_v25 = vmul.f32 %v6446_v28, %v6502_v21  ;;  %v2137_v54 = vmul.f32 %v6451_v59, %v6502_v21  ;;  %v2138_v32 = vmul.f32 %v6454_v29, %v6502_v21  ;;  %v2281_v62 = vsel %vm873_vm0, %v2231_v22, 0.0  ;;  %v8230_v22 = vld [vmem:[#allocation28_spill] sm:$0xff] }
 0x333   :  { %v2230_v23 = vmul.f32 %v2157_v6, %v8174_v56  ;;  %v2161_v29 = vrot.slane %v2129_v44, %v5016_v2  ;;  %v6538_v27 = vmul.f32 %v6433_v15, %v6491_v48  ;;  %v6551_v7 = vmul.f32 %v6441_v50, %v6502_v21  ;;  %v8226_v15 = vld [vmem:[#allocation21_spill] sm:$0xff]  ;;  %v8228_v6 = vld [vmem:[#allocation27_spill] sm:$0xff] }
 0x334   :  { %v2189_v52 = vrot.slane %v2136_v25, %v5016_v2  ;;  %v2193_v49 = vrot.slane %v2137_v54, %v5016_v2  ;;  %v2197_v43 = vrot.slane %v2138_v32, %v5016_v2  ;;  %v2139_v54 = vmul.f32 %v6458_v24, %v6502_v21  ;;  %v8227_v24 = vld [vmem:[#allocation22_spill] sm:$0xff] }
 0x335   :  { %v2278_v39 = vsel %vm873_vm0, %v2230_v23, 0.0  ;;  %v2140_v32 = vmul.f32 %v6463_v58, %v6502_v21 }
 0x336   :  { %2273 = vadd.xlane.f32.xlu0 %v2272_v38  ;;  %2276 = vadd.xlane.f32.xlu1 %v2275_v17  ;;  %v2247_v30 = vmul.f32 %v2189_v52, %v8178_v3  ;;  %v2246_v28 = vmul.f32 %v2189_v52, %v8177_v13  ;;  %v2249_v10 = vmul.f32 %v2193_v49, %v8181_v37 }
 0x337   :  { %v2248_v46 = vmul.f32 %v2193_v49, %v8182_v35  ;;  %v2251_v34 = vmul.f32 %v2197_v43, %v8185_v45  ;;  %v2250_v25 = vmul.f32 %v2197_v43, %v8184_v26  ;;  %v6547_v52 = vmul.f32 %v6478_v16, %v6502_v21  ;;  %v8231_v43 = vld [vmem:[#allocation26_spill] sm:$0xff] }
 0x338   :  { %v2329_v40 = vsel %vm873_vm0, %v2247_v30, 0.0  ;;  %v2326_v59 = vsel %vm873_vm0, %v2246_v28, 0.0  ;;  %v2335_v57 = vsel %vm873_vm0, %v2249_v10, 0.0  ;;  %v2233_v38 = vmul.f32 %v2161_v29, %v8226_v15 }
 0x339   :  { %v2332_v5 = vsel %vm873_vm0, %v2248_v46, 0.0  ;;  %v2130_v17 = vmul.f32 %v6426_v11, %v6491_v48  ;;  %v2341_v49 = vsel %vm873_vm0, %v2251_v34, 0.0  ;;  %v2338_v30 = vsel %vm873_vm0, %v2250_v25, 0.0  ;;  %v8229_v46 = vld [vmem:[#allocation24_spill] sm:$0xff]  ;;  %v8232_v25 = vld [vmem:[#allocation29_spill] sm:$0xff] }
 0x33a   :  { %2330 = vadd.xlane.f32.xlu1 %v2329_v40  ;;  %2327 = vadd.xlane.f32.xlu0 %v2326_v59  ;;  %v2232_v28 = vmul.f32 %v2161_v29, %v8227_v24  ;;  %v2201_v40 = vrot.slane %v2139_v54, %v5016_v2  ;;  %v2287_v16 = vsel %vm873_vm0, %v2233_v38, 0.0  ;;  %v2205_v29 = vrot.slane %v2140_v32, %v5016_v2  ;;  %v8233_v38 = vld [vmem:[#allocation30_spill] sm:$0xff] }
 0x33b   :  { %v2165_v50 = vrot.slane %v2130_v17, %v5016_v2  ;;  %v2141_v17 = vmul.f32 %v6470_v42, %v6502_v21 }
 0x33c   :  { %v2284_v59 = vsel %vm873_vm0, %v2232_v28, 0.0  ;;  %v2253_v10 = vmul.f32 %v2201_v40, %v8228_v6  ;;  %v2252_v11 = vmul.f32 %v2201_v40, %v8229_v46  ;;  %v2255_v54 = vmul.f32 %v2205_v29, %v8232_v25 }
 0x33d   :  { %v2235_v44 = vmul.f32 %v2165_v50, %v8230_v22  ;;  %v2132_v28 = vmul.f32 %v6443_v51, %v6491_v48 }
 0x33e   :  { %2336 = vadd.xlane.f32.xlu1 %v2335_v57  ;;  %2333 = vadd.xlane.f32.xlu0 %v2332_v5  ;;  %v2131_v57 = vmul.f32 %v6430_v60, %v6491_v48  ;;  %v2347_v5 = vsel %vm873_vm0, %v2253_v10, 0.0  ;;  %v2344_v23 = vsel %vm873_vm0, %v2252_v11, 0.0  ;;  %v2254_v60 = vmul.f32 %v2205_v29, %v8233_v38 }
 0x33f   :  { %v2353_v40 = vsel %vm873_vm0, %v2255_v54, 0.0  ;;  %v2209_v10 = vrot.slane %v2141_v17, %v5016_v2  ;;  %v2173_v42 = vrot.slane %v2132_v28, %v5016_v2  ;;  %v8239_v54 = vld [vmem:[#allocation44_spill] sm:$0xff] }
 0x340   :  { %v2169_v58 = vrot.slane %v2131_v57, %v5016_v2 }
 0x342   :  { %2282 = vadd.xlane.f32.xlu1 %v2281_v62  ;;  %2279 = vadd.xlane.f32.xlu0 %v2278_v39  ;;  %v2234_v62 = vmul.f32 %v2165_v50, %v8231_v43  ;;  %v2293_v39 = vsel %vm873_vm0, %v2235_v44, 0.0  ;;  %v8235_v50 = vld [vmem:[#allocation40_spill] sm:$0xff]  ;;  %v8236_v44 = vld [vmem:[#allocation41_spill] sm:$0xff] }
 0x343   :  { %v2257_v57 = vmul.f32 %v2209_v10, %v8236_v44 }
 0x344   :  { %v2290_v34 = vsel %vm873_vm0, %v2234_v62, 0.0  ;;  %v8238_v62 = vld [vmem:[#allocation43_spill] sm:$0xff] }
 0x345   :  { %v2239_v29 = vmul.f32 %v2173_v42, %v8238_v62 }
 0x346   :  { %2342 = vadd.xlane.f32.xlu1 %v2341_v49  ;;  %2339 = vadd.xlane.f32.xlu0 %v2338_v30  ;;  %v8234_v49 = vld [vmem:[#allocation39_spill] sm:$0xff] }
 0x347   :  { %v2237_v30 = vmul.f32 %v2169_v58, %v8234_v49 }
 0x349   :  { %v2299_v11 = vsel %vm873_vm0, %v2237_v30, 0.0  ;;  %v2305_v30 = vsel %vm873_vm0, %v2239_v29, 0.0 }
 0x34a   :  { %2288 = vadd.xlane.f32.xlu1 %v2287_v16  ;;  %2285 = vadd.xlane.f32.xlu0 %v2284_v59  ;;  %v2350_v16 = vsel %vm873_vm0, %v2254_v60, 0.0  ;;  %v2236_v59 = vmul.f32 %v2169_v58, %v8235_v50  ;;  %v2359_v58 = vsel %vm873_vm0, %v2257_v57, 0.0  ;;  %v2238_v60 = vmul.f32 %v2173_v42, %v8239_v54 }
 0x34c   :  { %v2296_v32 = vsel %vm873_vm0, %v2236_v59, 0.0  ;;  %v2302_v28 = vsel %vm873_vm0, %v2238_v60, 0.0  ;;  %v8241_v59 = vld [vmem:[#allocation46_spill] sm:$0xff] }
 0x34e   :  { %2348 = vadd.xlane.f32.xlu1 %v2347_v5  ;;  %2345 = vadd.xlane.f32.xlu0 %v2344_v23  ;;  %v8237_v5 = vld [vmem:[#allocation42_spill] sm:$0xff]  ;;  %v2142_v23 = vmul.f32 %v6474_v63, %v6502_v21 }
 0x34f   :  { %v2256_v51 = vmul.f32 %v2209_v10, %v8237_v5  ;;  %v2143_v10 = vmul.f32 %v6437_v33, %v6502_v21  ;;  %v8244_v21 = vld [vmem:[#allocation49_spill] sm:$0xff] }
 0x350   :  { %v2213_v17 = vrot.slane %v2142_v23, %v5016_v2 }
 0x351   :  { %v2217_v29 = vrot.slane %v2143_v10, %v5016_v2 }
 0x352   :  { %2294 = vadd.xlane.f32.xlu1 %v2293_v39  ;;  %2291 = vadd.xlane.f32.xlu0 %v2290_v34  ;;  %v2133_v39 = vmul.f32 %v6408_v8, %v6491_v48  ;;  %v2356_v34 = vsel %vm873_vm0, %v2256_v51, 0.0  ;;  %v2258_v8 = vmul.f32 %v2213_v17, %v8241_v59  ;;  %v8243_v51 = vld [vmem:[#allocation48_spill] sm:$0xff] }
 0x353   :  { %v2260_v60 = vmul.f32 %v2217_v29, %v8210_v18 }
 0x354   :  { %v2177_v63 = vrot.slane %v2133_v39, %v5016_v2  ;;  %v2362_v57 = vsel %vm873_vm0, %v2258_v8, 0.0  ;;  %v8246_v8 = vld [vmem:[#allocation52_spill] sm:$0xff] }
 0x356   :  { %2354 = vadd.xlane.f32.xlu1 %v2353_v40  ;;  %2351 = vadd.xlane.f32.xlu0 %v2350_v16  ;;  %v8240_v40 = vld [vmem:[#allocation45_spill] sm:$0xff]  ;;  %v2240_v23 = vmul.f32 %v2177_v63, %v8243_v51 }
 0x357   :  { %v2259_v16 = vmul.f32 %v2213_v17, %v8240_v40  ;;  %v2135_v17 = vmul.f32 %v6411_v61, %v6491_v48  ;;  %v8247_v48 = vld [vmem:[#allocation53_spill] sm:$0xff] }
 0x358   :  { %v2308_v33 = vsel %vm873_vm0, %v2240_v23, 0.0  ;;  %v8248_v23 = vld [vmem:[#allocation54_spill] sm:$0xff] }
 0x35a   :  { %2300 = vadd.xlane.f32.xlu1 %v2299_v11  ;;  %2297 = vadd.xlane.f32.xlu0 %v2296_v32  ;;  %v8242_v11 = vld [vmem:[#allocation47_spill] sm:$0xff]  ;;  %v2365_v32 = vsel %vm873_vm0, %v2259_v16, 0.0  ;;  %v2368_v16 = vsel %vm873_vm0, %v2260_v60, 0.0 }
 0x35b   :  { %v2241_v42 = vmul.f32 %v2177_v63, %v8242_v11 }
 0x35d   :  { %v2311_v39 = vsel %vm873_vm0, %v2241_v42, 0.0  ;;  %v2221_v42 = vrot.slane %v6547_v52, %v5016_v2  ;;  %v8250_v52 = vld [vmem:[#allocation56_spill] sm:$0xff] }
 0x35e   :  { %2360 = vadd.xlane.f32.xlu1 %v2359_v58  ;;  %2357 = vadd.xlane.f32.xlu0 %v2356_v34  ;;  %v2181_v58 = vrot.slane %v6538_v27, %v5016_v2  ;;  %v2261_v34 = vmul.f32 %v2217_v29, %v8244_v21  ;;  %v2185_v27 = vrot.slane %v2135_v17, %v5016_v2 }
 0x35f   :  { %v2262_v17 = vmul.f32 %v2221_v42, %v8250_v52 }
 0x360   :  { %v2242_v10 = vmul.f32 %v2181_v58, %v8246_v8  ;;  %v2244_v29 = vmul.f32 %v2185_v27, %v8248_v23 }
 0x362   :  { %2306 = vadd.xlane.f32.xlu1 %v2305_v30  ;;  %2303 = vadd.xlane.f32.xlu0 %v2302_v28  ;;  %v8245_v30 = vld [vmem:[#allocation51_spill] sm:$0xff]  ;;  %v2371_v28 = vsel %vm873_vm0, %v2261_v34, 0.0  ;;  %v2314_v61 = vsel %vm873_vm0, %v2242_v10, 0.0 }
 0x363   :  { %v2243_v63 = vmul.f32 %v2181_v58, %v8245_v30  ;;  %v8249_v34 = vld [vmem:[#allocation55_spill] sm:$0xff] }
 0x364   :  { %v2263_v60 = vmul.f32 %v2221_v42, %v8249_v34 }
 0x366   :  { %2366 = vadd.xlane.f32.xlu1 %v2365_v32  ;;  %2363 = vadd.xlane.f32.xlu0 %v2362_v57  ;;  %v2317_v32 = vsel %vm873_vm0, %v2243_v63, 0.0  ;;  %v2245_v57 = vmul.f32 %v2185_v27, %v8247_v48  ;;  %v2377_v63 = vsel %vm873_vm0, %v2263_v60, 0.0 }
 0x368   :  { %v2323_v58 = vsel %vm873_vm0, %v2245_v57, 0.0 }
 0x36a   :  { %2312 = vadd.xlane.f32.xlu1 %v2311_v39  ;;  %2309 = vadd.xlane.f32.xlu0 %v2308_v33  ;;  %v2225_v39 = vrot.slane %v6551_v7, %v5016_v2  ;;  %v2320_v33 = vsel %vm873_vm0, %v2244_v29, 0.0 }
 0x36c   :  { %v2264_v10 = vmul.f32 %v2225_v39, %v8213_v55 }
 0x36e   :  { %2372 = vadd.xlane.f32.xlu1 %v2371_v28  ;;  %2369 = vadd.xlane.f32.xlu0 %v2368_v16  ;;  %v2374_v28 = vsel %vm873_vm0, %v2262_v17, 0.0  ;;  %v2265_v16 = vmul.f32 %v2225_v39, %v8209_v14  ;;  %v2380_v27 = vsel %vm873_vm0, %v2264_v10, 0.0 }
 0x370   :  { %v2383_v7 = vsel %vm873_vm0, %v2265_v16, 0.0 }
 0x372   :  { %2318 = vadd.xlane.f32.xlu1 %v2317_v32  ;;  %2315 = vadd.xlane.f32.xlu0 %v2314_v61 }
 0x376   :  { %2324 = vadd.xlane.f32.xlu1 %v2323_v58  ;;  %2321 = vadd.xlane.f32.xlu0 %v2320_v33 }
 0x37a   :  { %2378 = vadd.xlane.f32.xlu1 %v2377_v63  ;;  %2375 = vadd.xlane.f32.xlu0 %v2374_v28 }
 0x37e   :  { %2384 = vadd.xlane.f32.xlu1 %v2383_v7  ;;  %2381 = vadd.xlane.f32.xlu0 %v2380_v27 }
 0x3bf   :  { %v6645_v32 = vpop.xlane.xlu0 %2270  ;;  %v6647_v42 = vpop.xlane.xlu1 %2267 }
 0x3c0   :  { %v2387_v5 = vmul.f32 %v6645_v32, %v6645_v32  ;;  %v2386_v44 = vmul.f32 %v6647_v42, %v6647_v42 }
 0x3c2   :  { %v2473_v35 = vrot.slane %v2387_v5, %v8254_v12  ;;  %v2469_v45 = vrot.slane %v2386_v44, %v8253_v36 }
 0x3c3   :  { %v6649_v61 = vpop.xlane.xlu0 %2273  ;;  %v6651_v57 = vpop.xlane.xlu1 %2276 }
 0x3c4   :  { %v2388_v11 = vmul.f32 %v6649_v61, %v6649_v61  ;;  %v2389_v54 = vmul.f32 %v6651_v57, %v6651_v57 }
 0x3c6   :  { %v2478_v31 = vrot.slane %v2388_v11, %v8253_v36  ;;  %v2482_v38 = vrot.slane %v2389_v54, %v8254_v12 }
 0x3c7   :  { %v6653_v29 = vpop.xlane.xlu0 %2327  ;;  %v6655_v58 = vpop.xlane.xlu1 %2330 }
 0x3c8   :  { %v2406_v25 = vmul.f32 %v6653_v29, %v6653_v29  ;;  %v2407_v50 = vmul.f32 %v6655_v58, %v6655_v58  ;;  %v2483_v1 = vsel %vm1125_vm1, %v2482_v38, %v2478_v31 }
 0x3ca   :  { %v2559_v13 = vrot.slane %v2406_v25, %v8253_v36  ;;  %v2563_v3 = vrot.slane %v2407_v50, %v8254_v12 }
 0x3cb   :  { %v6657_v39 = vpop.xlane.xlu0 %2333  ;;  %v6659_v33 = vpop.xlane.xlu1 %2336 }
 0x3cc   :  { %v2408_v22 = vmul.f32 %v6657_v39, %v6657_v39  ;;  %v2409_v20 = vmul.f32 %v6659_v33, %v6659_v33 }
 0x3ce   :  { %v2568_v5 = vrot.slane %v2408_v22, %v8253_v36  ;;  %v2572_v56 = vrot.slane %v2409_v20, %v8254_v12 }
 0x3cf   :  { %v6661_v60 = vpop.xlane.xlu0 %2279  ;;  %v6663_v17 = vpop.xlane.xlu1 %2282 }
 0x3d0   :  { %v2390_v11 = vmul.f32 %v6661_v60, %v6661_v60  ;;  %v2391_v54 = vmul.f32 %v6663_v17, %v6663_v17  ;;  %v2573_v34 = vsel %vm1125_vm1, %v2572_v56, %v2568_v5 }
 0x3d2   :  { %v2487_v9 = vrot.slane %v2390_v11, %v8253_v36  ;;  %v2491_v4 = vrot.slane %v2391_v54, %v8254_v12  ;;  %v2474_v54 = vsel %vm1125_vm1, %v2473_v35, %v2469_v45 }
 0x3d3   :  { %v6665_v63 = vpop.xlane.xlu0 %2339  ;;  %v6667_v28 = vpop.xlane.xlu1 %2342 }
 0x3d4   :  { %v2410_v44 = vmul.f32 %v6665_v63, %v6665_v63  ;;  %v2411_v31 = vmul.f32 %v6667_v28, %v6667_v28  ;;  %v2492_v53 = vsel %vm1125_vm1, %v2491_v4, %v2487_v9 }
 0x3d6   :  { %v2577_v19 = vrot.slane %v2410_v44, %v8253_v36 }
 0x3d7   :  { %v6669_v16 = vpop.xlane.xlu0 %2285  ;;  %v6671_v10 = vpop.xlane.xlu1 %2288 }
 0x3d8   :  { %v2392_v46 = vmul.f32 %v6669_v16, %v6669_v16  ;;  %v2393_v6 = vmul.f32 %v6671_v10, %v6671_v10 }
 0x3da   :  { %v2496_v25 = vrot.slane %v2392_v46, %v8253_v36  ;;  %v2500_v38 = vrot.slane %v2393_v6, %v8254_v12  ;;  %v2646_v46 = vsel %vm1298_vm2, %v2483_v1, %v2474_v54  ;;  %v2564_v6 = vsel %vm1125_vm1, %v2563_v3, %v2559_v13 }
 0x3db   :  { %v6673_v7 = vpop.xlane.xlu0 %2345  ;;  %v6675_v27 = vpop.xlane.xlu1 %2348 }
 0x3dc   :  { %v2412_v50 = vmul.f32 %v6673_v7, %v6673_v7  ;;  %v2413_v20 = vmul.f32 %v6675_v27, %v6675_v27  ;;  %v2501_v45 = vsel %vm1125_vm1, %v2500_v38, %v2496_v25  ;;  %v2654_v25 = vsel %vm1298_vm2, %v2573_v34, %v2564_v6 }
 0x3dd   :  { %v2647_v38 = vsel %vm1300_vm3, %v2492_v53, %v2646_v46 }
 0x3de   :  { %v2586_v1 = vrot.slane %v2412_v50, %v8253_v36  ;;  %v2590_v13 = vrot.slane %v2413_v20, %v8254_v12  ;;  %v2648_v23 = vsel %vm1302_vm4, %v2501_v45, %v2647_v38 }
 0x3df   :  { %v6677_v55 = vpop.xlane.xlu0 %2291  ;;  %v6679_v14 = vpop.xlane.xlu1 %2294 }
 0x3e0   :  { %v2394_v37 = vmul.f32 %v6677_v55, %v6677_v55  ;;  %v2395_v26 = vmul.f32 %v6679_v14, %v6679_v14  ;;  %v2591_v34 = vsel %vm1125_vm1, %v2590_v13, %v2586_v1 }
 0x3e2   :  { %v2505_v22 = vrot.slane %v2394_v37, %v8253_v36  ;;  %v2509_v11 = vrot.slane %v2395_v26, %v8254_v12  ;;  %v2581_v37 = vrot.slane %v2411_v31, %v8254_v12 }
 0x3e3   :  { %v6681_v18 = vpop.xlane.xlu0 %2351  ;;  %v6683_v21 = vpop.xlane.xlu1 %2354 }
 0x3e4   :  { %v2510_v56 = vsel %vm1125_vm1, %v2509_v11, %v2505_v22  ;;  %v2414_v22 = vmul.f32 %v6681_v18, %v6681_v18  ;;  %v2582_v48 = vsel %vm1125_vm1, %v2581_v37, %v2577_v19  ;;  %v2415_v53 = vmul.f32 %v6683_v21, %v6683_v21 }
 0x3e5   :  { %v2649_v46 = vsel %vm1304_vm5, %v2510_v56, %v2648_v23 }
 0x3e6   :  { %v2595_v13 = vrot.slane %v2414_v22, %v8253_v36 }
 0x3e7   :  { %v6685_v59 = vpop.xlane.xlu0 %2297  ;;  %v6687_v40 = vpop.xlane.xlu1 %2300 }
 0x3e8   :  { %v2396_v26 = vmul.f32 %v6685_v59, %v6685_v59  ;;  %v2397_v35 = vmul.f32 %v6687_v40, %v6687_v40 }
 0x3ea   :  { %v2514_v11 = vrot.slane %v2396_v26, %v8253_v36  ;;  %v2518_v54 = vrot.slane %v2397_v35, %v8254_v12 }
 0x3eb   :  { %v6689_v0 = vpop.xlane.xlu0 %2357  ;;  %v6691_v51 = vpop.xlane.xlu1 %2360 }
 0x3ec   :  { %v2416_v56 = vmul.f32 %v6689_v0, %v6689_v0 }
 0x3ef   :  { %v6697_v62 = vpop.xlane.xlu0 %2303  ;;  %v6699_v47 = vpop.xlane.xlu1 %2306 }
 0x3f0   :  { %8251 = vst [vmem:[#allocation81_spill] sm:$0xff] %v6697_v62  ;;  %8252 = vst [vmem:[#allocation82_spill] sm:$0xff] %v6699_v47  ;;  %v2398_v9 = vmul.f32 %v6697_v62, %v6697_v62  ;;  %v2399_v4 = vmul.f32 %v6699_v47, %v6699_v47 }
 0x3f2   :  { %v2523_v6 = vrot.slane %v2398_v9, %v8253_v36  ;;  %v2527_v8 = vrot.slane %v2399_v4, %v8254_v12  ;;  %v2417_v9 = vmul.f32 %v6691_v51, %v6691_v51  ;;  %v2519_v4 = vsel %vm1125_vm1, %v2518_v54, %v2514_v11 }
 0x3f3   :  { %v6711_v49 = vpop.xlane.xlu0 %2363  ;;  %v6713_v43 = vpop.xlane.xlu1 %2366 }
 0x3f4   :  { %8255 = vst [vmem:[#allocation83_spill] sm:$0xff] %v6711_v49  ;;  %8256 = vst [vmem:[#allocation84_spill] sm:$0xff] %v6713_v43  ;;  %v2528_v11 = vsel %vm1125_vm1, %v2527_v8, %v2523_v6  ;;  %v2650_v8 = vsel %vm1306_vm6, %v2519_v4, %v2649_v46 }
 0x3f5   :  { %v2651_v47 = vsel %vm1308_vm7, %v2528_v11, %v2650_v8 }
 0x3f7   :  { %v6736_v24 = vpop.xlane.xlu0 %2309  ;;  %v6738_v15 = vpop.xlane.xlu1 %2312 }
 0x3f8   :  { %8257 = vst [vmem:[#allocation85_spill] sm:$0xff] %v6736_v24  ;;  %8258 = vst [vmem:[#allocation86_spill] sm:$0xff] %v6738_v15  ;;  %v2400_v3 = vmul.f32 %v6736_v24, %v6736_v24  ;;  %v2401_v5 = vmul.f32 %v6738_v15, %v6738_v15 }
 0x3fa   :  { %v2532_v30 = vrot.slane %v2400_v3, %v8253_v36  ;;  %v2536_v26 = vrot.slane %v2401_v5, %v8254_v12  ;;  %v2418_v3 = vmul.f32 %v6711_v49, %v6711_v49  ;;  %v2419_v5 = vmul.f32 %v6713_v43, %v6713_v43 }
 0x3fb   :  { %v6757_v41 = vpop.xlane.xlu0 %2369  ;;  %v6759_v52 = vpop.xlane.xlu1 %2372  ;;  %v2604_v43 = vrot.slane %v2416_v56, %v8253_v36 }
 0x3fc   :  { %8259 = vst [vmem:[#allocation87_spill] sm:$0xff] %v6757_v41  ;;  %8260 = vst [vmem:[#allocation88_spill] sm:$0xff] %v6759_v52  ;;  %v2421_v22 = vmul.f32 %v6759_v52, %v6759_v52  ;;  %v2537_v54 = vsel %vm1125_vm1, %v2536_v26, %v2532_v30  ;;  %v2599_v52 = vrot.slane %v2415_v53, %v8254_v12 }
 0x3fd   :  { %v2608_v30 = vrot.slane %v2417_v9, %v8254_v12  ;;  %v2613_v6 = vrot.slane %v2418_v3, %v8253_v36  ;;  %v2652_v46 = vsel %vm1310_vm8, %v2537_v54, %v2651_v47  ;;  %v2655_v3 = vsel %vm1300_vm3, %v2582_v48, %v2654_v25 }
 0x3fe   :  { %v2626_v53 = vrot.slane %v2421_v22, %v8254_v12  ;;  %v2666_v47 = vsel %vm1325_vm9, %v2652_v46, 0.0  ;;  %v2656_v11 = vsel %vm1302_vm4, %v2591_v34, %v2655_v3 }
 0x3ff   :  { %v6783_v44 = vpop.xlane.xlu0 %2315  ;;  %v6785_v31 = vpop.xlane.xlu1 %2318 }
 0x400   :  { %v2402_v50 = vmul.f32 %v6783_v44, %v6783_v44  ;;  %v2403_v20 = vmul.f32 %v6785_v31, %v6785_v31 }
 0x402   :  { %v2541_v19 = vrot.slane %v2402_v50, %v8253_v36  ;;  %v2545_v37 = vrot.slane %v2403_v20, %v8254_v12  ;;  %v2420_v20 = vmul.f32 %v6757_v41, %v6757_v41 }
 0x403   :  { %v6807_v35 = vpop.xlane.xlu0 %2321  ;;  %v6809_v45 = vpop.xlane.xlu1 %2324 }
 0x404   :  { %v2404_v1 = vmul.f32 %v6807_v35, %v6807_v35  ;;  %v2405_v23 = vmul.f32 %v6809_v45, %v6809_v45 }
 0x406   :  { %v2550_v38 = vrot.slane %v2404_v1, %v8253_v36  ;;  %v2554_v50 = vrot.slane %v2405_v23, %v8254_v12  ;;  %v2546_v23 = vsel %vm1125_vm1, %v2545_v37, %v2541_v19  ;;  %v2617_v19 = vrot.slane %v2419_v5, %v8254_v12 }
 0x407   :  { %v6833_v24 = vpop.xlane.xlu0 %2375  ;;  %v6835_v15 = vpop.xlane.xlu1 %2378  ;;  %v2622_v37 = vrot.slane %v2420_v20, %v8253_v36  ;;  %v2600_v5 = vsel %vm1125_vm1, %v2599_v52, %v2595_v13 }
 0x408   :  { %v2422_v49 = vmul.f32 %v6833_v24, %v6833_v24  ;;  %v2423_v1 = vmul.f32 %v6835_v15, %v6835_v15  ;;  %v2555_v41 = vsel %vm1125_vm1, %v2554_v50, %v2550_v38  ;;  %v2618_v22 = vsel %vm1125_vm1, %v2617_v19, %v2613_v6 }
 0x409   :  { %v2653_v62 = vsel %vm1298_vm2, %v2555_v41, %v2546_v23  ;;  %v2627_v48 = vsel %vm1125_vm1, %v2626_v53, %v2622_v37  ;;  %v2657_v52 = vsel %vm1304_vm5, %v2600_v5, %v2656_v11 }
 0x40a   :  { %v2669_v26 = vsel %vm1329_vm10, %v2653_v62, 0.0  ;;  %v2631_v56 = vrot.slane %v2422_v49, %v8253_v36  ;;  %v2635_v9 = vrot.slane %v2423_v1, %v8254_v12  ;;  %v2609_v49 = vsel %vm1125_vm1, %v2608_v30, %v2604_v43 }
 0x40b   :  { %v6856_v38 = vpop.xlane.xlu0 %2381  ;;  %2670 = vadd.xlane.f32.xlu0 %v2669_v26  ;;  %v6858_v41 = vpop.xlane.xlu1 %2384  ;;  %v2658_v13 = vsel %vm1306_vm6, %v2609_v49, %v2657_v52  ;;  %v8261_v52 = vld [vmem:[#allocation12_spill] sm:$0xff] }
 0x40c   :  { %v2424_v62 = vmul.f32 %v6856_v38, %v6856_v38  ;;  %v2425_v4 = vmul.f32 %v6858_v41, %v6858_v41  ;;  %v2636_v54 = vsel %vm1125_vm1, %v2635_v9, %v2631_v56  ;;  %v2659_v43 = vsel %vm1308_vm7, %v2618_v22, %v2658_v13 }
 0x40d   :  { %v2660_v8 = vsel %vm1310_vm8, %v2627_v48, %v2659_v43 }
 0x40e   :  { %v2640_v50 = vrot.slane %v2424_v62, %v8253_v36  ;;  %v2644_v20 = vrot.slane %v2425_v4, %v8254_v12  ;;  %v2672_v34 = vsel %vm1325_vm9, %v2660_v8, 0.0 }
 0x40f   :  { %2667 = vadd.xlane.f32.xlu0 %v2666_v47 }
 0x410   :  { %v2645_v1 = vsel %vm1125_vm1, %v2644_v20, %v2640_v50 }
 0x411   :  { %v2661_v25 = vsel %vm1298_vm2, %v2645_v1, %v2636_v54 }
 0x412   :  { %v2675_v23 = vsel %vm1329_vm10, %v2661_v25, 0.0 }
 0x413   :  { %2676 = vadd.xlane.f32.xlu1 %v2675_v23 }
 0x417   :  { %2673 = vadd.xlane.f32.xlu1 %v2672_v34 }
 0x498   :  { %v2671_v30 = vpop.xlane.xlu0 %2670 }
 0x499   :  { %4809 = vrsqrt.f32 %v2671_v30  ;;  %v2707_v6 = vadd.f32 1.0, %v2671_v30  ;;  %vm2687_vm15 = vcmp.eq.f32.partialorder %v2671_v30, inf  ;;  %v2690_v9 = vand.u32 2147483648, %v2671_v30 }
 0x49a   :  { %vm2689_vm11 = vcmp.eq.f32.partialorder %v2671_v30, 0.0 }
 0x49b   :  { %4811 = vrcp.f32 %v2707_v6 }
 0x49c   :  { %v2668_v26 = vpop.xlane.xlu0 %2667 }
 0x49d   :  { %4813 = vrsqrt.f32 %v2668_v26  ;;  %v2706_v37 = vadd.f32 1.0, %v2668_v26  ;;  %vm2680_vm12 = vcmp.eq.f32.partialorder %v2668_v26, inf  ;;  %v2683_v54 = vand.u32 2147483648, %v2668_v26 }
 0x49e   :  { %vm2682_vm13 = vcmp.eq.f32.partialorder %v2668_v26, 0.0 }
 0x4a0   :  { %v2677_v19 = vpop.xlane.xlu1 %2676 }
 0x4a1   :  { %4815 = vrsqrt.f32 %v2677_v19  ;;  %v2709_v53 = vadd.f32 1.0, %v2677_v19  ;;  %v2704_v43 = vand.u32 2147483648, %v2677_v19 }
 0x4a2   :  { %4817 = vrcp.f32 %v2706_v37 }
 0x4a3   :  { %v4810_v46 = vpop.eup %4809  ;;  %4819 = vrcp.f32 %v2709_v53 }
 0x4a4   :  { %v2686_v56 = vmul.f32 %v4810_v46, %v2671_v30  ;;  %v2674_v5 = vpop.xlane.xlu1 %2673 }
 0x4a5   :  { %v4812_v62 = vpop.eup %4811  ;;  %4821 = vrsqrt.f32 %v2674_v5 }
 0x4a6   :  { %v2688_v4 = vsel %vm2687_vm15, %v2671_v30, %v2686_v56  ;;  %vm2701_vm15 = vcmp.eq.f32.partialorder %v2677_v19, inf }
 0x4a7   :  { %v4814_v3 = vpop.eup %4813  ;;  %v2691_v50 = vsel %vm2689_vm11, %v2690_v9, %v2688_v4  ;;  %vm2703_vm11 = vcmp.eq.f32.partialorder %v2677_v19, 0.0 }
 0x4a8   :  { %v2679_v20 = vmul.f32 %v4814_v3, %v2668_v26  ;;  %v2715_v47 = vmul.f32 %v4812_v62, %v2691_v50 }
 0x4aa   :  { %v2757_v49 = vrot.slane %v2715_v47, %v5016_v2  ;;  %v2681_v11 = vsel %vm2680_vm12, %v2668_v26, %v2679_v20  ;;  %v2761_v25 = vrot.slane %v2715_v47, %v8261_v52  ;;  %v2708_v26 = vadd.f32 1.0, %v2674_v5  ;;  %v8262_v47 = vld [vmem:[#allocation13_spill] sm:$0xff] }
 0x4ab   :  { %v4816_v22 = vpop.eup %4815  ;;  %v2684_v23 = vsel %vm2682_vm13, %v2683_v54, %v2681_v11  ;;  %vm2694_vm12 = vcmp.eq.f32.partialorder %v2674_v5, inf  ;;  %vm2696_vm13 = vcmp.eq.f32.partialorder %v2674_v5, 0.0 }
 0x4ac   :  { %v2839_v1 = vmul.f32 %v2757_v49, %v6785_v31  ;;  %v2838_v48 = vmul.f32 %v2757_v49, %v6783_v44  ;;  %v2700_v13 = vmul.f32 %v4816_v22, %v2677_v19  ;;  %v4818_v8 = vpop.eup %4817  ;;  %v2841_v6 = vmul.f32 %v2761_v25, %v6809_v45 }
 0x4ad   :  { %v4820_v30 = vpop.eup %4819  ;;  %v2840_v37 = vmul.f32 %v2761_v25, %v6807_v35  ;;  %v6891_v53 = vmul.f32 %v4818_v8, %v2684_v23  ;;  %4823 = vrcp.f32 %v2708_v26  ;;  %v8264_v8 = vld [vmem:[#allocation15_spill] sm:$0xff]  ;;  %v8266_v26 = vld [vmem:[#allocation17_spill] sm:$0xff] }
 0x4ae   :  { %2949 = vperm.xlu0 %4748, %v2839_v1   ;;  %2944 = vperm.xlu1 %4747, %v2838_v48   ;;  %v2702_v34 = vsel %vm2701_vm15, %v2677_v19, %v2700_v13  ;;  %v8263_v1 = vld [vmem:[#allocation14_spill] sm:$0xff] }
 0x4af   :  { %v2705_v31 = vsel %vm2703_vm11, %v2704_v43, %v2702_v34  ;;  %v4822_v56 = vpop.eup %4821  ;;  %v2725_v45 = vrot.slane %v6891_v53, %v5016_v2  ;;  %v2729_v3 = vrot.slane %v6891_v53, %v8261_v52  ;;  %v2733_v49 = vrot.slane %v6891_v53, %v8262_v47 }
 0x4b0   :  { %v6893_v44 = vmul.f32 %v4820_v30, %v2705_v31  ;;  %v2693_v35 = vmul.f32 %v4822_v56, %v2674_v5  ;;  %v8265_v30 = vld [vmem:[#allocation16_spill] sm:$0xff] }
 0x4b1   :  { %v2822_v62 = vmul.f32 %v2725_v45, %v6647_v42  ;;  %v2823_v4 = vmul.f32 %v2725_v45, %v6645_v32  ;;  %v2824_v20 = vmul.f32 %v2729_v3, %v6649_v61  ;;  %v2827_v11 = vmul.f32 %v2733_v49, %v6663_v17  ;;  %v8270_v45 = vld [vmem:[#allocation86_spill] sm:$0xff] }
 0x4b2   :  { %2959 = vperm.xlu0 %4748, %v2841_v6   ;;  %2954 = vperm.xlu1 %4747, %v2840_v37   ;;  %v2797_v46 = vrot.slane %v6893_v44, %v5016_v2  ;;  %v2695_v50 = vsel %vm2694_vm12, %v2674_v5, %v2693_v35  ;;  %v2826_v54 = vmul.f32 %v2733_v49, %v6661_v60  ;;  %v8275_v49 = vld [vmem:[#allocation87_spill] sm:$0xff] }
 0x4b4   :  { %v2859_v9 = vmul.f32 %v2797_v46, %v6835_v15  ;;  %v2858_v19 = vmul.f32 %v2797_v46, %v6833_v24  ;;  %v2697_v15 = vand.u32 2147483648, %v2674_v5  ;;  %v2825_v24 = vmul.f32 %v2729_v3, %v6651_v57  ;;  %v8267_v46 = vld [vmem:[#allocation82_spill] sm:$0xff] }
 0x4b5   :  { %v2737_v5 = vrot.slane %v6891_v53, %v8263_v1 }
 0x4b6   :  { %3049 = vperm.xlu0 %4748, %v2859_v9   ;;  %3044 = vperm.xlu1 %4747, %v2858_v19   ;;  %v2698_v22 = vsel %vm2696_vm13, %v2697_v15, %v2695_v50  ;;  %v8268_v9 = vld [vmem:[#allocation81_spill] sm:$0xff]  ;;  %v8269_v19 = vld [vmem:[#allocation18_spill] sm:$0xff]  ;;  %v8273_v50 = vld [vmem:[#allocation83_spill] sm:$0xff] }
 0x4b7   :  { %v4824_v32 = vpop.eup %4823  ;;  %v2829_v61 = vmul.f32 %v2737_v5, %v6671_v10  ;;  %v2828_v57 = vmul.f32 %v2737_v5, %v6669_v16 }
 0x4b8   :  { %v6909_v42 = vmul.f32 %v4824_v32, %v2698_v22  ;;  %v2801_v32 = vrot.slane %v6893_v44, %v8261_v52 }
 0x4ba   :  { %2864 = vperm.xlu0 %4748, %v2822_v62   ;;  %2869 = vperm.xlu1 %4747, %v2823_v4   ;;  %v2765_v48 = vrot.slane %v6909_v42, %v5016_v2  ;;  %v2769_v60 = vrot.slane %v6909_v42, %v8261_v52  ;;  %v2773_v16 = vrot.slane %v6909_v42, %v8262_v47  ;;  %v8271_v62 = vld [vmem:[#allocation85_spill] sm:$0xff]  ;;  %v8272_v4 = vld [vmem:[#allocation84_spill] sm:$0xff] }
 0x4bc   :  { %v2843_v25 = vmul.f32 %v2765_v48, %v6655_v58  ;;  %v2842_v17 = vmul.f32 %v2765_v48, %v6653_v29  ;;  %v2845_v13 = vmul.f32 %v2769_v60, %v6659_v33  ;;  %v2844_v10 = vmul.f32 %v2769_v60, %v6657_v39  ;;  %v8276_v48 = vld [vmem:[#allocation51_spill] sm:$0xff] }
 0x4bd   :  { %v2847_v23 = vmul.f32 %v2773_v16, %v6667_v28  ;;  %v2846_v58 = vmul.f32 %v2773_v16, %v6665_v63  ;;  %v2777_v29 = vrot.slane %v6909_v42, %v8263_v1  ;;  %v2741_v39 = vrot.slane %v6891_v53, %v8264_v8 }
 0x4be   :  { %2879 = vperm.xlu0 %4748, %v2825_v24   ;;  %2874 = vperm.xlu1 %4747, %v2824_v20   ;;  %v2745_v63 = vrot.slane %v6891_v53, %v8265_v30  ;;  %v2793_v24 = vrot.slane %v6909_v42, %v8269_v19 }
 0x4bf   :  { %v2849_v43 = vmul.f32 %v2777_v29, %v6675_v27  ;;  %v2848_v33 = vmul.f32 %v2777_v29, %v6673_v7  ;;  %v2831_v34 = vmul.f32 %v2741_v39, %v6679_v14  ;;  %v2830_v28 = vmul.f32 %v2741_v39, %v6677_v55 }
 0x4c0   :  { %v2833_v6 = vmul.f32 %v2745_v63, %v6687_v40  ;;  %v2832_v27 = vmul.f32 %v2745_v63, %v6685_v59  ;;  %v2781_v7 = vrot.slane %v6909_v42, %v8264_v8  ;;  %v2785_v55 = vrot.slane %v6909_v42, %v8265_v30 }
 0x4c1   :  { %v2749_v59 = vrot.slane %v6891_v53, %v8266_v26  ;;  %v2856_v22 = vmul.f32 %v2793_v24, %v8275_v49 }
 0x4c2   :  { %2889 = vperm.xlu0 %4748, %v2827_v11   ;;  %2884 = vperm.xlu1 %4747, %v2826_v54   ;;  %v2851_v37 = vmul.f32 %v2781_v7, %v6683_v21  ;;  %v2850_v14 = vmul.f32 %v2781_v7, %v6681_v18  ;;  %v2853_v31 = vmul.f32 %v2785_v55, %v6691_v51  ;;  %v8281_v7 = vld [vmem:[#allocation38_spill] sm:$0xff] }
 0x4c3   :  { %v2852_v40 = vmul.f32 %v2785_v55, %v6689_v0  ;;  %v2835_v56 = vmul.f32 %v2749_v59, %v8267_v46  ;;  %v2834_v21 = vmul.f32 %v2749_v59, %v8268_v9  ;;  %v2753_v18 = vrot.slane %v6891_v53, %v8269_v19  ;;  %v8274_v53 = vld [vmem:[#allocation88_spill] sm:$0xff]  ;;  %v8282_v59 = vld [vmem:[#allocation55_spill] sm:$0xff]  ;;  %v8301_v19 = vld [vmem:[#allocation26_spill] sm:$0xff] }
 0x4c4   :  { %v2789_v0 = vrot.slane %v6909_v42, %v8266_v26  ;;  %v2857_v20 = vmul.f32 %v2793_v24, %v8274_v53  ;;  %v2861_v11 = vmul.f32 %v2801_v32, %v6858_v41  ;;  %v2860_v54 = vmul.f32 %v2801_v32, %v6856_v38 }
 0x4c5   :  { %v2837_v35 = vmul.f32 %v2753_v18, %v8270_v45  ;;  %v2836_v51 = vmul.f32 %v2753_v18, %v8271_v62  ;;  %v8284_v62 = vld [vmem:[#allocation37_spill] sm:$0xff] }
 0x4c6   :  { %2899 = vperm.xlu0 %4748, %v2829_v61   ;;  %2894 = vperm.xlu1 %4747, %v2828_v57   ;;  %v2855_v3 = vmul.f32 %v2789_v0, %v8272_v4  ;;  %v2854_v15 = vmul.f32 %v2789_v0, %v8273_v50  ;;  %v8285_v0 = vld [vmem:[#allocation35_spill] sm:$0xff] }
 0x4ca   :  { %2969 = vperm.xlu0 %4748, %v2843_v25   ;;  %2964 = vperm.xlu1 %4747, %v2842_v17   ;;  %v8277_v17 = vld [vmem:[#allocation52_spill] sm:$0xff] }
 0x4ce   :  { %2979 = vperm.xlu0 %4748, %v2845_v13   ;;  %2974 = vperm.xlu1 %4747, %v2844_v10   ;;  %v8278_v10 = vld [vmem:[#allocation53_spill] sm:$0xff] }
 0x4d2   :  { %2989 = vperm.xlu0 %4748, %v2847_v23   ;;  %2984 = vperm.xlu1 %4747, %v2846_v58   ;;  %v8279_v23 = vld [vmem:[#allocation54_spill] sm:$0xff] }
 0x4d6   :  { %2999 = vperm.xlu0 %4748, %v2849_v43   ;;  %2994 = vperm.xlu1 %4747, %v2848_v33  }
 0x4da   :  { %2909 = vperm.xlu0 %4748, %v2831_v34   ;;  %2904 = vperm.xlu1 %4747, %v2830_v28  }
 0x4de   :  { %2919 = vperm.xlu0 %4748, %v2833_v6   ;;  %2914 = vperm.xlu1 %4747, %v2832_v27   ;;  %v8280_v6 = vld [vmem:[#allocation36_spill] sm:$0xff] }
 0x4e2   :  { %3009 = vperm.xlu0 %4748, %v2851_v37   ;;  %3004 = vperm.xlu1 %4747, %v2850_v14  }
 0x4e6   :  { %3019 = vperm.xlu0 %4748, %v2853_v31   ;;  %3014 = vperm.xlu1 %4747, %v2852_v40  }
 0x4ea   :  { %2929 = vperm.xlu0 %4748, %v2835_v56   ;;  %2924 = vperm.xlu1 %4747, %v2834_v21   ;;  %v8283_v56 = vld [vmem:[#allocation56_spill] sm:$0xff] }
 0x4ee   :  { %2939 = vperm.xlu0 %4748, %v2837_v35   ;;  %2934 = vperm.xlu1 %4747, %v2836_v51  }
 0x4f2   :  { %3029 = vperm.xlu0 %4748, %v2855_v3   ;;  %3024 = vperm.xlu1 %4747, %v2854_v15   ;;  %v8286_v3 = vld [vmem:[#allocation31_spill] sm:$0xff]  ;;  %v8287_v15 = vld [vmem:[#allocation33_spill] sm:$0xff] }
 0x4f6   :  { %3039 = vperm.xlu0 %4748, %v2857_v20   ;;  %3034 = vperm.xlu1 %4747, %v2856_v22  }
 0x4fa   :  { %3059 = vperm.xlu0 %4748, %v2861_v11   ;;  %3054 = vperm.xlu1 %4747, %v2860_v54  }
 0x52d   :  { %v2950_v5 = vpop.permute.xlu0 %2949  ;;  %v2945_v61 = vpop.permute.xlu1 %2944 }
 0x52e   :  { %v3079_v25 = vmul.f32 %v2950_v5, %v8276_v48  ;;  %v3078_v60 = vmul.f32 %v2945_v61, %v8277_v17 }
 0x530   :  { %v3175_v13 = vsel %vm873_vm0, %v3079_v25, 0.0  ;;  %v3174_v44 = vsel %vm873_vm0, %v3078_v60, 0.0  ;;  %v8288_v25 = vld [vmem:[#allocation21_spill] sm:$0xff] }
 0x531   :  { %v2960_v42 = vpop.permute.xlu0 %2959  ;;  %v2955_v57 = vpop.permute.xlu1 %2954  ;;  %v3176_v29 = vadd.f32 %v3175_v13, %v3174_v44  ;;  %v8289_v13 = vld [vmem:[#allocation22_spill] sm:$0xff] }
 0x532   :  { %v3081_v16 = vmul.f32 %v2960_v42, %v8278_v10  ;;  %v3080_v41 = vmul.f32 %v2955_v57, %v8279_v23 }
 0x533   :  { %v3177_v28 = vrot.slane %v3176_v29, 4 }
 0x534   :  { %v3184_v43 = vsel %vm873_vm0, %v3081_v16, 0.0  ;;  %v3183_v33 = vsel %vm873_vm0, %v3080_v41, 0.0 }
 0x535   :  { %v3050_v58 = vpop.permute.xlu0 %3049  ;;  %v3045_v38 = vpop.permute.xlu1 %3044  ;;  %v3185_v63 = vadd.f32 %v3184_v43, %v3183_v33  ;;  %v3178_v31 = vadd.f32 %v3177_v28, %v3176_v29 }
 0x536   :  { %v3099_v46 = vmul.f32 %v3050_v58, %v8282_v59  ;;  %v3098_v9 = vmul.f32 %v3045_v38, %v8283_v56 }
 0x537   :  { %v3186_v40 = vrot.slane %v3185_v63, 4  ;;  %v3179_v53 = vrot.slane %v3178_v31, 2 }
 0x538   :  { %v3265_v32 = vsel %vm873_vm0, %v3099_v46, 0.0  ;;  %v3264_v11 = vsel %vm873_vm0, %v3098_v9, 0.0 }
 0x539   :  { %v2865_v39 = vpop.permute.xlu0 %2864  ;;  %v2870_v34 = vpop.permute.xlu1 %2869  ;;  %v3187_v22 = vadd.f32 %v3186_v40, %v3185_v63  ;;  %v3180_v41 = vadd.f32 %v3179_v53, %v3178_v31  ;;  %v3266_v58 = vadd.f32 %v3265_v32, %v3264_v11  ;;  %v8290_v31 = vld [vmem:[#allocation32_spill] sm:$0xff] }
 0x53a   :  { %v3062_v27 = vmul.f32 %v2865_v39, %v8280_v6  ;;  %v3063_v37 = vmul.f32 %v2870_v34, %v8281_v7 }
 0x53b   :  { %v3188_v43 = vrot.slane %v3187_v22, 2 }
 0x53c   :  { %v3102_v21 = vsel %vm873_vm0, %v3062_v27, 0.0  ;;  %v3103_v18 = vsel %vm873_vm0, %v3063_v37, 0.0  ;;  %v3181_v37 = vrot.slane %v3180_v41, 1 }
 0x53d   :  { %v2880_v14 = vpop.permute.xlu0 %2879  ;;  %v2875_v55 = vpop.permute.xlu1 %2874  ;;  %v3104_v54 = vadd.f32 %v3103_v18, %v3102_v21 }
 0x53e   :  { %v3065_v51 = vmul.f32 %v2880_v14, %v8284_v62  ;;  %v3064_v4 = vmul.f32 %v2875_v55, %v8285_v0  ;;  %v3267_v14 = vrot.slane %v3266_v58, 4  ;;  %v3189_v55 = vadd.f32 %v3188_v43, %v3187_v22  ;;  %v8293_v43 = vld [vmem:[#allocation34_spill] sm:$0xff] }
 0x53f   :  { %v3105_v33 = vrot.slane %v3104_v54, 4 }
 0x540   :  { %v3112_v42 = vsel %vm873_vm0, %v3065_v51, 0.0  ;;  %v3111_v57 = vsel %vm873_vm0, %v3064_v4, 0.0  ;;  %v3190_v53 = vrot.slane %v3189_v55, 1 }
 0x541   :  { %v2890_v45 = vpop.permute.xlu0 %2889  ;;  %v2885_v35 = vpop.permute.xlu1 %2884  ;;  %v3113_v39 = vadd.f32 %v3112_v42, %v3111_v57  ;;  %v3106_v40 = vadd.f32 %v3105_v33, %v3104_v54  ;;  %v8292_v42 = vld [vmem:[#allocation67_spill] sm:$0xff] }
 0x542   :  { %v3067_v50 = vmul.f32 %v2890_v45, %v8286_v3  ;;  %v3066_v24 = vmul.f32 %v2885_v35, %v8287_v15  ;;  %v8291_v45 = vld [vmem:[#allocation19_spill] sm:$0xff] }
 0x543   :  { %v3114_v46 = vrot.slane %v3113_v39, 4 }
 0x544   :  { %v3121_v20 = vsel %vm873_vm0, %v3067_v50, 0.0  ;;  %v3120_v49 = vsel %vm873_vm0, %v3066_v24, 0.0  ;;  %v3182_v50 = vadd.f32 %v3181_v37, %v3180_v41  ;;  %v3268_v24 = vadd.f32 %v3267_v14, %v3266_v58  ;;  %v8295_v37 = vld [vmem:[#allocation20_spill] sm:$0xff] }
 0x545   :  { %v2900_v5 = vpop.permute.xlu0 %2899  ;;  %v2895_v61 = vpop.permute.xlu1 %2894  ;;  %v3122_v16 = vadd.f32 %v3121_v20, %v3120_v49  ;;  %v3107_v20 = vrot.slane %v3106_v40, 2  ;;  %v3115_v49 = vadd.f32 %v3114_v46, %v3113_v39  ;;  %v8294_v39 = vld [vmem:[#allocation25_spill] sm:$0xff]  ;;  %v8296_v46 = vld [vmem:[#allocation23_spill] sm:$0xff] }
 0x546   :  { %v3069_v60 = vmul.f32 %v2900_v5, %v8288_v25  ;;  %v3068_v44 = vmul.f32 %v2895_v61, %v8289_v13  ;;  %v7002_v57 = vadd.f32 %v3182_v50, %v8292_v42 }
 0x547   :  { %v3123_v63 = vrot.slane %v3122_v16, 4 }
 0x548   :  { %v3130_v38 = vsel %vm873_vm0, %v3069_v60, 0.0  ;;  %v3129_v29 = vsel %vm873_vm0, %v3068_v44, 0.0  ;;  %v3269_v60 = vrot.slane %v3268_v24, 2  ;;  %v3191_v44 = vadd.f32 %v3190_v53, %v3189_v55  ;;  %v8299_v53 = vld [vmem:[#allocation63_spill] sm:$0xff] }
 0x549   :  { %v2970_v34 = vpop.permute.xlu0 %2969  ;;  %v2965_v28 = vpop.permute.xlu1 %2964  ;;  %v3131_v27 = vadd.f32 %v3130_v38, %v3129_v29  ;;  %v3124_v51 = vadd.f32 %v3123_v63, %v3122_v16  ;;  %v3108_v16 = vadd.f32 %v3107_v20, %v3106_v40  ;;  %v3116_v38 = vrot.slane %v3115_v49, 2  ;;  %v8297_v40 = vld [vmem:[#allocation27_spill] sm:$0xff] }
 0x54a   :  { %v3083_v18 = vmul.f32 %v2970_v34, %v8290_v31  ;;  %v3082_v35 = vmul.f32 %v2965_v28, %v8291_v45  ;;  %v3270_v55 = vadd.f32 %v3269_v60, %v3268_v24  ;;  %v7015_v20 = vadd.f32 %v3191_v44, %v8299_v53 }
 0x54b   :  { %v3132_v4 = vrot.slane %v3131_v27, 4  ;;  %v3125_v54 = vrot.slane %v3124_v51, 2 }
 0x54c   :  { %v3193_v5 = vsel %vm873_vm0, %v3083_v18, 0.0  ;;  %v3192_v22 = vsel %vm873_vm0, %v3082_v35, 0.0  ;;  %v7010_v18 = vsel %vm873_vm0, %v7002_v57, -inf  ;;  %v3271_v26 = vrot.slane %v3270_v55, 1 }
 0x54d   :  { %v2980_v9 = vpop.permute.xlu0 %2979  ;;  %v2975_v21 = vpop.permute.xlu1 %2974  ;;  %v3133_v61 = vadd.f32 %v3132_v4, %v3131_v27  ;;  %v3194_v41 = vadd.f32 %v3193_v5, %v3192_v22  ;;  %v3126_v28 = vadd.f32 %v3125_v54, %v3124_v51  ;;  %v8298_v4 = vld [vmem:[#allocation24_spill] sm:$0xff] }
 0x54e   :  { %v3085_v14 = vmul.f32 %v2980_v9, %v8295_v37  ;;  %v3084_v27 = vmul.f32 %v2975_v21, %v8296_v46  ;;  %v8300_v54 = vld [vmem:[#allocation28_spill] sm:$0xff] }
 0x54f   :  { %v3134_v63 = vrot.slane %v3133_v61, 2  ;;  %v3195_v51 = vrot.slane %v3194_v41, 4  ;;  %v3127_v60 = vrot.slane %v3126_v28, 1 }
 0x550   :  { %v3201_v44 = vsel %vm873_vm0, %v3084_v27, 0.0 }
 0x551   :  { %v2990_v32 = vpop.permute.xlu0 %2989  ;;  %v2985_v11 = vpop.permute.xlu1 %2984  ;;  %v3128_v12 = vadd.f32 %v3127_v60, %v3126_v28  ;;  %v8306_v60 = vld [vmem:[#allocation64_spill] sm:$0xff] }
 0x552   :  { %v3087_v33 = vmul.f32 %v2990_v32, %v8293_v43  ;;  %v3086_v34 = vmul.f32 %v2985_v11, %v8294_v39  ;;  %v3109_v32 = vrot.slane %v3108_v16, 1  ;;  %v3117_v11 = vadd.f32 %v3116_v38, %v3115_v49 }
 0x554   :  { %v3211_v9 = vsel %vm873_vm0, %v3087_v33, 0.0  ;;  %v3210_v21 = vsel %vm873_vm0, %v3086_v34, 0.0  ;;  %v3196_v34 = vadd.f32 %v3195_v51, %v3194_v41 }
 0x555   :  { %v3000_v58 = vpop.permute.xlu0 %2999  ;;  %v2995_v29 = vpop.permute.xlu1 %2994  ;;  %v3212_v30 = vadd.f32 %v3211_v9, %v3210_v21  ;;  %v7035_v9 = vadd.f32 %v3271_v26, %v3270_v55 }
 0x556   :  { %v3089_v35 = vmul.f32 %v3000_v58, %v8297_v40  ;;  %v3088_v50 = vmul.f32 %v2995_v29, %v8298_v4  ;;  %v3135_v58 = vadd.f32 %v3134_v63, %v3133_v61  ;;  %v3202_v29 = vsel %vm873_vm0, %v3085_v14, 0.0  ;;  %v8302_v14 = vld [vmem:[#allocation39_spill] sm:$0xff]  ;;  %v8322_v4 = vld [vmem:[#allocation50_spill] sm:$0xff] }
 0x557   :  { %v7029_v61 = vsel %vm873_vm0, %v7015_v20, -inf  ;;  %v3118_v63 = vrot.slane %v3117_v11, 1  ;;  %v3203_v47 = vadd.f32 %v3202_v29, %v3201_v44  ;;  %v3197_v21 = vrot.slane %v3196_v34, 2  ;;  %v8305_v29 = vld [vmem:[#allocation30_spill] sm:$0xff] }
 0x558   :  { %v3220_v53 = vsel %vm873_vm0, %v3089_v35, 0.0  ;;  %v3219_v49 = vsel %vm873_vm0, %v3088_v50, 0.0  ;;  %v8303_v35 = vld [vmem:[#allocation40_spill] sm:$0xff]  ;;  %v3136_v50 = vrot.slane %v3135_v58, 1 }
 0x559   :  { %v2910_v5 = vpop.permute.xlu0 %2909  ;;  %v2905_v22 = vpop.permute.xlu1 %2904 }
 0x55a   :  { %v3071_v42 = vmul.f32 %v2910_v5, %v8300_v54  ;;  %v3070_v24 = vmul.f32 %v2905_v22, %v8301_v19 }
 0x55c   :  { %v3139_v38 = vsel %vm873_vm0, %v3071_v42, 0.0  ;;  %v3138_v33 = vsel %vm873_vm0, %v3070_v24, 0.0  ;;  %v3221_v42 = vadd.f32 %v3220_v53, %v3219_v49  ;;  %v3110_v24 = vadd.f32 %v3109_v32, %v3108_v16 }
 0x55d   :  { %v3140_v5 = vadd.f32 %v3139_v38, %v3138_v33  ;;  %v2920_v8 = vpop.permute.xlu0 %2919  ;;  %v2915_v22 = vpop.permute.xlu1 %2914  ;;  %v3213_v38 = vrot.slane %v3212_v30, 4  ;;  %v3137_v53 = vadd.f32 %v3136_v50, %v3135_v58  ;;  %v3204_v16 = vrot.slane %v3203_v47, 4  ;;  %v8308_v58 = vld [vmem:[#allocation65_spill] sm:$0xff] }
 0x55e   :  { %v3073_v27 = vmul.f32 %v2920_v8, %v8302_v14  ;;  %v3072_v1 = vmul.f32 %v2915_v22, %v8303_v35  ;;  %v3119_v8 = vadd.f32 %v3118_v63, %v3117_v11  ;;  %v8304_v22 = vld [vmem:[#allocation29_spill] sm:$0xff]  ;;  %v3222_v28 = vrot.slane %v3221_v42, 4  ;;  %v8315_v14 = vld [vmem:[#allocation48_spill] sm:$0xff] }
 0x55f   :  { %v3141_v52 = vrot.slane %v3140_v5, 4  ;;  %v7040_v49 = vadd.f32 %v3110_v24, %v8306_v60  ;;  %v3198_v11 = vadd.f32 %v3197_v21, %v3196_v34  ;;  %v8310_v60 = vld [vmem:[#allocation42_spill] sm:$0xff] }
 0x560   :  { %v3148_v41 = vsel %vm873_vm0, %v3073_v27, 0.0  ;;  %v3147_v51 = vsel %vm873_vm0, %v3072_v1, 0.0  ;;  %v8307_v1 = vld [vmem:[#allocation61_spill] sm:$0xff]  ;;  %v7048_v50 = vadd.f32 %v3119_v8, %v8308_v58  ;;  %v3223_v17 = vadd.f32 %v3222_v28, %v3221_v42  ;;  %v8312_v28 = vld [vmem:[#allocation43_spill] sm:$0xff] }
 0x561   :  { %v3149_v33 = vadd.f32 %v3148_v41, %v3147_v51  ;;  %v3010_v36 = vpop.permute.xlu0 %3009  ;;  %v3005_v56 = vpop.permute.xlu1 %3004  ;;  %v3142_v59 = vadd.f32 %v3141_v52, %v3140_v5  ;;  %v7043_v26 = vadd.f32 %v3128_v12, %v8307_v1  ;;  %v3214_v52 = vadd.f32 %v3213_v38, %v3212_v30  ;;  %v8309_v51 = vld [vmem:[#allocation41_spill] sm:$0xff]  ;;  %v8311_v12 = vld [vmem:[#allocation62_spill] sm:$0xff] }
 0x562   :  { %v3091_v23 = vmul.f32 %v3010_v36, %v8304_v22  ;;  %v3090_v44 = vmul.f32 %v3005_v56, %v8305_v29  ;;  %v7053_v1 = vadd.f32 %v3137_v53, %v8311_v12  ;;  %v7057_v30 = vsel %vm873_vm0, %v7040_v49, -inf }
 0x563   :  { %v3150_v32 = vrot.slane %v3149_v33, 4  ;;  %v3143_v41 = vrot.slane %v3142_v59, 2  ;;  %v3199_v8 = vrot.slane %v3198_v11, 1  ;;  %v7069_v58 = vsel %vm873_vm0, %v7048_v50, -inf }
 0x564   :  { %v3229_v55 = vsel %vm873_vm0, %v3091_v23, 0.0  ;;  %v3228_v27 = vsel %vm873_vm0, %v3090_v44, 0.0  ;;  %v3205_v23 = vadd.f32 %v3204_v16, %v3203_v47  ;;  %v3224_v12 = vrot.slane %v3223_v17, 2 }
 0x565   :  { %v3151_v5 = vadd.f32 %v3150_v32, %v3149_v33  ;;  %v3230_v36 = vadd.f32 %v3229_v55, %v3228_v27  ;;  %v3020_v63 = vpop.permute.xlu0 %3019  ;;  %v3015_v56 = vpop.permute.xlu1 %3014  ;;  %v7063_v33 = vsel %vm873_vm0, %v7043_v26, -inf  ;;  %v3215_v32 = vrot.slane %v3214_v52, 2 }
 0x566   :  { %v3093_v24 = vmul.f32 %v3020_v63, %v8309_v51  ;;  %v3092_v10 = vmul.f32 %v3015_v56, %v8310_v60  ;;  %v3144_v42 = vadd.f32 %v3143_v41, %v3142_v59  ;;  %v8313_v63 = vld [vmem:[#allocation44_spill] sm:$0xff]  ;;  %v3200_v41 = vadd.f32 %v3199_v8, %v3198_v11  ;;  %v8314_v51 = vld [vmem:[#allocation47_spill] sm:$0xff]  ;;  %v8316_v8 = vld [vmem:[#allocation66_spill] sm:$0xff] }
 0x567   :  { %v3152_v44 = vrot.slane %v3151_v5, 2  ;;  %v3231_v34 = vrot.slane %v3230_v36, 4  ;;  %v3225_v22 = vadd.f32 %v3224_v12, %v3223_v17 }
 0x568   :  { %v3238_v21 = vsel %vm873_vm0, %v3093_v24, 0.0  ;;  %v3237_v38 = vsel %vm873_vm0, %v3092_v10, 0.0  ;;  %v7073_v10 = vsel %vm873_vm0, %v7053_v1, -inf  ;;  %v3206_v24 = vrot.slane %v3205_v23, 2 }
 0x569   :  { %v3239_v53 = vadd.f32 %v3238_v21, %v3237_v38  ;;  %v2930_v55 = vpop.permute.xlu0 %2929  ;;  %v2925_v47 = vpop.permute.xlu1 %2924  ;;  %v3153_v16 = vadd.f32 %v3152_v44, %v3151_v5  ;;  %v3232_v48 = vadd.f32 %v3231_v34, %v3230_v36  ;;  %v3216_v44 = vadd.f32 %v3215_v32, %v3214_v52 }
 0x56a   :  { %v3075_v27 = vmul.f32 %v2930_v55, %v8312_v28  ;;  %v3074_v56 = vmul.f32 %v2925_v47, %v8313_v63  ;;  %v3145_v28 = vrot.slane %v3144_v42, 1  ;;  %v7083_v34 = vadd.f32 %v3206_v24, %v3205_v23  ;;  %v8317_v23 = vld [vmem:[#allocation45_spill] sm:$0xff] }
 0x56b   :  { %v3240_v21 = vrot.slane %v3239_v53, 4  ;;  %v3154_v60 = vrot.slane %v3153_v16, 1  ;;  %v3233_v5 = vrot.slane %v3232_v48, 2  ;;  %v7088_v32 = vadd.f32 %v3200_v41, %v8316_v8 }
 0x56c   :  { %v3157_v38 = vsel %vm873_vm0, %v3075_v27, 0.0  ;;  %v3156_v59 = vsel %vm873_vm0, %v3074_v56, 0.0  ;;  %v3208_v17 = vrot.slane %v7083_v34, 1 }
 0x56d   :  { %v3158_v55 = vadd.f32 %v3157_v38, %v3156_v59  ;;  %v2940_v47 = vpop.permute.xlu0 %2939  ;;  %v2935_v63 = vpop.permute.xlu1 %2934  ;;  %v3241_v27 = vadd.f32 %v3240_v21, %v3239_v53  ;;  %v3217_v38 = vrot.slane %v3216_v44, 1  ;;  %v3155_v36 = vadd.f32 %v3154_v60, %v3153_v16  ;;  %v8318_v53 = vld [vmem:[#allocation46_spill] sm:$0xff] }
 0x56e   :  { %v3077_v35 = vmul.f32 %v2940_v47, %v8314_v51  ;;  %v3076_v29 = vmul.f32 %v2935_v63, %v8315_v14  ;;  %v3146_v51 = vadd.f32 %v3145_v28, %v3144_v42  ;;  %v3234_v54 = vadd.f32 %v3233_v5, %v3232_v48  ;;  %v8319_v28 = vld [vmem:[#allocation68_spill] sm:$0xff] }
 0x56f   :  { %v3159_v56 = vrot.slane %v3158_v55, 4  ;;  %v3242_v12 = vrot.slane %v3241_v27, 2 }
 0x570   :  { %v3166_v11 = vsel %vm873_vm0, %v3077_v35, 0.0  ;;  %v3165_v52 = vsel %vm873_vm0, %v3076_v29, 0.0  ;;  %v3226_v29 = vrot.slane %v3225_v22, 1  ;;  %v7096_v8 = vadd.f32 %v3146_v51, %v8319_v28 }
 0x571   :  { %v3160_v59 = vadd.f32 %v3159_v56, %v3158_v55  ;;  %v3167_v47 = vadd.f32 %v3166_v11, %v3165_v52  ;;  %v3030_v63 = vpop.permute.xlu0 %3029  ;;  %v3025_v14 = vpop.permute.xlu1 %3024  ;;  %v3218_v56 = vadd.f32 %v3217_v38, %v3216_v44  ;;  %v3243_v5 = vadd.f32 %v3242_v12, %v3241_v27  ;;  %v8323_v12 = vld [vmem:[#allocation57_spill] sm:$0xff] }
 0x572   :  { %v3095_v24 = vmul.f32 %v3030_v63, %v8317_v23  ;;  %v3094_v21 = vmul.f32 %v3025_v14, %v8318_v53  ;;  %v8320_v14 = vld [vmem:[#allocation69_spill] sm:$0xff]  ;;  %v3227_v44 = vadd.f32 %v3226_v29, %v3225_v22  ;;  %v3235_v38 = vrot.slane %v3234_v54, 1  ;;  %v8324_v22 = vld [vmem:[#allocation58_spill] sm:$0xff] }
 0x573   :  { %v3161_v35 = vrot.slane %v3160_v59, 2  ;;  %v3168_v19 = vrot.slane %v3167_v47, 4  ;;  %v7099_v63 = vadd.f32 %v3155_v36, %v8320_v14  ;;  %v8321_v53 = vld [vmem:[#allocation49_spill] sm:$0xff]  ;;  %v3244_v28 = vrot.slane %v3243_v5, 1 }
 0x574   :  { %v3247_v41 = vsel %vm873_vm0, %v3095_v24, 0.0  ;;  %v3246_v55 = vsel %vm873_vm0, %v3094_v21, 0.0 }
 0x575   :  { %v3162_v11 = vadd.f32 %v3161_v35, %v3160_v59  ;;  %v3169_v52 = vadd.f32 %v3168_v19, %v3167_v47  ;;  %v3248_v42 = vadd.f32 %v3247_v41, %v3246_v55  ;;  %v3040_v60 = vpop.permute.xlu0 %3039  ;;  %v3035_v16 = vpop.permute.xlu1 %3034  ;;  %v3310_v27 = vsel %vm873_vm0, %v7099_v63, -inf }
 0x576   :  { %v3097_v23 = vmul.f32 %v3040_v60, %v8321_v53  ;;  %v3096_v48 = vmul.f32 %v3035_v16, %v8322_v4  ;;  %v3308_v60 = vsel %vm873_vm0, %v7096_v8, -inf }
 0x577   :  { %v3163_v24 = vrot.slane %v3162_v11, 1  ;;  %v3170_v40 = vrot.slane %v3169_v52, 2  ;;  %v3249_v21 = vrot.slane %v3248_v42, 4 }
 0x578   :  { %v3256_v19 = vsel %vm873_vm0, %v3097_v23, 0.0  ;;  %v3255_v59 = vsel %vm873_vm0, %v3096_v48, 0.0  ;;  %v8325_v23 = vld [vmem:[#allocation71_spill] sm:$0xff] }
 0x579   :  { %v3164_v47 = vadd.f32 %v3163_v24, %v3162_v11  ;;  %v3171_v51 = vadd.f32 %v3170_v40, %v3169_v52  ;;  %v3250_v35 = vadd.f32 %v3249_v21, %v3248_v42  ;;  %v3257_v41 = vadd.f32 %v3256_v19, %v3255_v59  ;;  %v3060_v36 = vpop.permute.xlu0 %3059  ;;  %v3055_v55 = vpop.permute.xlu1 %3054 }
 0x57a   :  { %v3101_v16 = vmul.f32 %v3060_v36, %v8323_v12  ;;  %v3100_v29 = vmul.f32 %v3055_v55, %v8324_v22  ;;  %v3236_v52 = vadd.f32 %v3235_v38, %v3234_v54  ;;  %v3209_v55 = vadd.f32 %v3208_v17, %v7083_v34  ;;  %v8326_v22 = vld [vmem:[#allocation70_spill] sm:$0xff] }
 0x57b   :  { %v7112_v14 = vadd.f32 %v3164_v47, %v8325_v23  ;;  %v3172_v11 = vrot.slane %v3171_v51, 1  ;;  %v3251_v40 = vrot.slane %v3250_v35, 2  ;;  %v3258_v42 = vrot.slane %v3257_v41, 4 }
 0x57c   :  { %v3274_v48 = vsel %vm873_vm0, %v3101_v16, 0.0  ;;  %v3273_v24 = vsel %vm873_vm0, %v3100_v29, 0.0  ;;  %v7120_v12 = vadd.f32 %v3218_v56, %v8326_v22  ;;  %v8327_v47 = vmax.f32 %v7057_v30, %v7063_v33  ;;  %v8328_v16 = vld [vmem:[#allocation73_spill] sm:$0xff]  ;;  %v8331_v56 = vld [vmem:[#allocation74_spill] sm:$0xff] }
 0x57d   :  { %v3312_v21 = vsel %vm873_vm0, %v7112_v14, -inf  ;;  %v3173_v19 = vadd.f32 %v3172_v11, %v3171_v51  ;;  %v3252_v59 = vadd.f32 %v3251_v40, %v3250_v35  ;;  %v3275_v36 = vadd.f32 %v3274_v48, %v3273_v24  ;;  %v8330_v11 = vld [vmem:[#allocation72_spill] sm:$0xff]  ;;  %v8334_v48 = vld [vmem:[#allocation77_spill] sm:$0xff] }
 0x57e   :  { %v3309_v54 = vmax.f32 %v8327_v47, %v3308_v60  ;;  %v3259_v38 = vadd.f32 %v3258_v42, %v3257_v41  ;;  %v3245_v23 = vadd.f32 %v3244_v28, %v3243_v5  ;;  %v8329_v51 = vmax.f32 %v7069_v58, %v7073_v10 }
 0x57f   :  { %v3289_v4 = vadd.f32 %v3173_v19, %v8328_v16  ;;  %v3253_v29 = vrot.slane %v3252_v59, 1  ;;  %v3276_v53 = vrot.slane %v3275_v36, 4  ;;  %v7130_v40 = vadd.f32 %v3236_v52, %v8330_v11  ;;  %v8333_v52 = vld [vmem:[#allocation76_spill] sm:$0xff] }
 0x580   :  { %v3311_v35 = vmax.f32 %v8329_v51, %v3310_v27  ;;  %v3313_v34 = vmax.f32 %v3309_v54, %v3312_v21  ;;  %v3260_v17 = vrot.slane %v3259_v38, 2  ;;  %v7133_v22 = vadd.f32 %v3227_v44, %v8331_v56  ;;  %v8332_v27 = vld [vmem:[#allocation75_spill] sm:$0xff] }
 0x581   :  { %v3314_v30 = vsel %vm873_vm0, %v3289_v4, -inf  ;;  %v3254_v33 = vadd.f32 %v3253_v29, %v3252_v59  ;;  %v3277_v5 = vadd.f32 %v3276_v53, %v3275_v36  ;;  %v3321_v41 = vsel %vm873_vm0, %v7088_v32, -inf  ;;  %v8336_v56 = vld [vmem:[#allocation79_spill] sm:$0xff] }
 0x582   :  { %v3323_v60 = vsel %vm873_vm0, %v7120_v12, -inf  ;;  %v3315_v58 = vmax.f32 %v3311_v35, %v3314_v30  ;;  %v3261_v10 = vadd.f32 %v3260_v17, %v3259_v38  ;;  %v7141_v28 = vadd.f32 %v3209_v55, %v8332_v27  ;;  %v8337_v27 = vld [vmem:[#allocation80_spill] sm:$0xff] }
 0x583   :  { %v3297_v42 = vadd.f32 %v3245_v23, %v8333_v52  ;;  %v3298_v44 = vadd.f32 %v3254_v33, %v8334_v48  ;;  %v3278_v24 = vrot.slane %v3277_v5, 2  ;;  %v3327_v21 = vsel %vm873_vm0, %v7130_v40, -inf }
 0x584   :  { %v3317_v53 = vmax.f32 %v3313_v34, %v7010_v18  ;;  %v3319_v19 = vmax.f32 %v3315_v58, %v7029_v61  ;;  %v3262_v59 = vrot.slane %v3261_v10, 1  ;;  %v3324_v36 = vmax.f32 %v3321_v41, %v3323_v60  ;;  %v8335_v18 = vld [vmem:[#allocation78_spill] sm:$0xff] }
 0x585   :  { %v3325_v47 = vsel %vm873_vm0, %v7133_v22, -inf  ;;  %v3279_v54 = vadd.f32 %v3278_v24, %v3277_v5  ;;  %v3331_v38 = vsel %vm873_vm0, %v3298_v44, -inf  ;;  %v3322_v16 = vsel %vm873_vm0, %v7141_v28, -inf }
 0x586   :  { %v3320_v55 = vmax.f32 %v3317_v53, %v3319_v19  ;;  %v3263_v23 = vadd.f32 %v3262_v59, %v3261_v10  ;;  %v3328_v29 = vmax.f32 %v3324_v36, %v3327_v21  ;;  %v3329_v51 = vsel %vm873_vm0, %v3297_v42, -inf }
 0x587   :  { %v3280_v35 = vrot.slane %v3279_v54, 1  ;;  %v7157_v61 = vadd.f32 %v7035_v9, %v8335_v18  ;;  %v3326_v11 = vmax.f32 %v3322_v16, %v3325_v47 }
 0x588   :  { %v3347_v34 = vsub.f32 %v3289_v4, %v3320_v55  ;;  %v3332_v17 = vmax.f32 %v3328_v29, %v3331_v38  ;;  %v7160_v30 = vadd.f32 %v3263_v23, %v8336_v56  ;;  %v3340_v41 = vsub.f32 %v7040_v49, %v3320_v55 }
 0x589   :  { %v3281_v33 = vadd.f32 %v3280_v35, %v3279_v54  ;;  %v3330_v5 = vmax.f32 %v3326_v11, %v3329_v51  ;;  %v3341_v60 = vsub.f32 %v7048_v50, %v3320_v55  ;;  %v3342_v9 = vsub.f32 %v7043_v26, %v3320_v55 }
 0x58a   :  { %v3374_v58 = vmul.f32 1.442695, %v3347_v34  ;;  %v3333_v10 = vsel %vm873_vm0, %v7160_v30, -inf  ;;  %v3335_v4 = vsel %vm873_vm0, %v7157_v61, -inf  ;;  %v3343_v24 = vsub.f32 %v7053_v1, %v3320_v55 }
 0x58b   :  { %v3301_v52 = vadd.f32 %v3281_v33, %v8337_v27  ;;  %v3334_v48 = vmax.f32 %v3330_v5, %v3333_v10  ;;  %v3344_v21 = vsub.f32 %v7096_v8, %v3320_v55  ;;  %v3349_v49 = vsub.f32 %v7015_v20, %v3320_v55 }
 0x58c   :  { %v3336_v53 = vmax.f32 %v3332_v17, %v3335_v4  ;;  %v3345_v19 = vsub.f32 %v7099_v63, %v3320_v55  ;;  %v3360_v36 = vmul.f32 1.442695, %v3340_v41  ;;  %v3362_v47 = vmul.f32 1.442695, %v3341_v60 }
 0x58d   :  { %v3337_v50 = vsel %vm873_vm0, %v3301_v52, -inf  ;;  %v3364_v54 = vmul.f32 1.442695, %v3342_v9  ;;  %v3348_v26 = vsub.f32 %v7002_v57, %v3320_v55  ;;  %4825 = vpow2.f32 %v3374_v58 }
 0x58e   :  { %v3338_v59 = vmax.f32 %v3334_v48, %v3337_v50  ;;  %v3366_v38 = vmul.f32 1.442695, %v3343_v24  ;;  %4827 = vpow2.f32 %v3362_v47  ;;  %v3368_v1 = vmul.f32 1.442695, %v3344_v21 }
 0x58f   :  { %v3378_v16 = vmul.f32 1.442695, %v3349_v49  ;;  %4829 = vpow2.f32 %v3364_v54  ;;  %v3370_v29 = vmul.f32 1.442695, %v3345_v19  ;;  %v3346_v51 = vsub.f32 %v7112_v14, %v3320_v55 }
 0x590   :  { %v3339_v23 = vmax.f32 %v3336_v53, %v3338_v59  ;;  %4831 = vpow2.f32 %v3360_v36  ;;  %v3376_v63 = vmul.f32 1.442695, %v3348_v26 }
 0x591   :  { %4833 = vpow2.f32 %v3366_v38 }
 0x592   :  { %v3355_v8 = vsub.f32 %v3297_v42, %v3339_v23  ;;  %v3356_v20 = vsub.f32 %v3298_v44, %v3339_v23  ;;  %v3359_v35 = vsub.f32 %v3301_v52, %v3339_v23  ;;  %4835 = vpow2.f32 %v3368_v1 }
 0x593   :  { %v3350_v57 = vsub.f32 %v7088_v32, %v3339_v23  ;;  %4837 = vpow2.f32 %v3378_v16  ;;  %v3351_v34 = vsub.f32 %v7141_v28, %v3339_v23  ;;  %v3352_v42 = vsub.f32 %v7120_v12, %v3339_v23 }
 0x594   :  { %v3390_v18 = vmul.f32 1.442695, %v3355_v8  ;;  %v3392_v11 = vmul.f32 1.442695, %v3356_v20  ;;  %v3398_v17 = vmul.f32 1.442695, %v3359_v35  ;;  %4839 = vpow2.f32 %v3370_v29 }
 0x595   :  { %v3372_v44 = vmul.f32 1.442695, %v3346_v51  ;;  %4841 = vpow2.f32 %v3376_v63  ;;  %v3353_v56 = vsub.f32 %v7133_v22, %v3339_v23  ;;  %v3354_v14 = vsub.f32 %v7130_v40, %v3339_v23 }
 0x596   :  { %4843 = vpow2.f32 %v3390_v18  ;;  %v3380_v55 = vmul.f32 1.442695, %v3350_v57  ;;  %v3357_v32 = vsub.f32 %v7160_v30, %v3339_v23  ;;  %v3382_v5 = vmul.f32 1.442695, %v3351_v34 }
 0x597   :  { %v7182_v33 = vpop.eup %4825  ;;  %4845 = vpow2.f32 %v3392_v11  ;;  %v3384_v28 = vmul.f32 1.442695, %v3352_v42  ;;  %v3358_v12 = vsub.f32 %v7157_v61, %v3339_v23  ;;  %v3386_v40 = vmul.f32 1.442695, %v3353_v56 }
 0x598   :  { %v7185_v41 = vpop.eup %4827  ;;  %4847 = vpow2.f32 %v3398_v17  ;;  %v3388_v30 = vmul.f32 1.442695, %v3354_v14  ;;  %v3394_v52 = vmul.f32 1.442695, %v3357_v32  ;;  %v3432_v51 = vrot.slane %v7182_v33, 1 }
 0x599   :  { %v7187_v60 = vpop.eup %4829  ;;  %4849 = vpow2.f32 %v3372_v44  ;;  %v3420_v22 = vrot.slane %v7185_v41, 7  ;;  %v3396_v21 = vmul.f32 1.442695, %v3358_v12 }
 0x59a   :  { %v7191_v58 = vpop.eup %4831  ;;  %v3422_v10 = vrot.slane %v7187_v60, 6  ;;  %4851 = vpow2.f32 %v3380_v55 }
 0x59b   :  { %v7194_v27 = vpop.eup %4833  ;;  %v3421_v9 = vsel %vm1298_vm2, %v3420_v22, %v7191_v58  ;;  %4853 = vpow2.f32 %v3382_v5 }
 0x59c   :  { %v7198_v4 = vpop.eup %4835  ;;  %v3423_v61 = vsel %vm1300_vm3, %v3422_v10, %v3421_v9  ;;  %v3424_v48 = vrot.slane %v7194_v27, 5  ;;  %4855 = vpow2.f32 %v3384_v28 }
 0x59d   :  { %v7202_v24 = vpop.eup %4837  ;;  %4857 = vpow2.f32 %v3386_v40  ;;  %v3426_v50 = vrot.slane %v7198_v4, 4 }
 0x59e   :  { %v7204_v49 = vpop.eup %4839  ;;  %v3425_v53 = vsel %vm1302_vm4, %v3424_v48, %v3423_v61  ;;  %4859 = vpow2.f32 %v3388_v30  ;;  %v3434_v47 = vrot.slane %v7202_v24, 7 }
 0x59f   :  { %v7208_v19 = vpop.eup %4841  ;;  %4861 = vpow2.f32 %v3394_v52  ;;  %v3427_v36 = vsel %vm1304_vm5, %v3426_v50, %v3425_v53  ;;  %v3428_v26 = vrot.slane %v7204_v49, 3 }
 0x5a0   :  { %v7210_v59 = vpop.eup %4843  ;;  %4863 = vpow2.f32 %v3396_v21  ;;  %v3435_v20 = vsel %vm1298_vm2, %v3434_v47, %v7208_v19 }
 0x5a1   :  { %v7214_v54 = vpop.eup %4845  ;;  %v3429_v1 = vsel %vm1306_vm6, %v3428_v26, %v3427_v36  ;;  %v3457_v34 = vsel %vm2098_vm14, %v3435_v20, 0.0  ;;  %v3444_v40 = vrot.slane %v7210_v59, 3 }
 0x5a2   :  { %v7217_v38 = vpop.eup %4847  ;;  %v3446_v9 = vrot.slane %v7214_v54, 2 }
 0x5a3   :  { %v7219_v23 = vpop.eup %4849  ;;  %v3450_v44 = vrot.slane %v7217_v38, 7 }
 0x5a4   :  { %v7222_v16 = vpop.eup %4851  ;;  %v3430_v8 = vrot.slane %v7219_v23, 2 }
 0x5a5   :  { %v4854_v29 = vpop.eup %4853 }
 0x5a6   :  { %v7228_v63 = vpop.eup %4855  ;;  %v3431_v35 = vsel %vm1308_vm7, %v3430_v8, %v3429_v1  ;;  %v3436_v18 = vrot.slane %v4854_v29, 7 }
 0x5a7   :  { %v7231_v57 = vpop.eup %4857  ;;  %v3433_v11 = vsel %vm1310_vm8, %v3432_v51, %v3431_v35  ;;  %v3438_v17 = vrot.slane %v7228_v63, 6 }
 0x5a8   :  { %v7236_v42 = vpop.eup %4859  ;;  %v3456_v56 = vsel %vm873_vm0, %v3433_v11, 0.0  ;;  %v3437_v14 = vsel %vm1298_vm2, %v3436_v18, %v7222_v16  ;;  %v3440_v55 = vrot.slane %v7231_v57, 5 }
 0x5a9   :  { %v7243_v32 = vpop.eup %4861  ;;  %v3458_v5 = vadd.f32 %v3457_v34, %v3456_v56  ;;  %v3439_v28 = vsel %vm1300_vm3, %v3438_v17, %v3437_v14  ;;  %v3442_v12 = vrot.slane %v7236_v42, 4 }
 0x5aa   :  { %v3441_v22 = vsel %vm1302_vm4, %v3440_v55, %v3439_v28  ;;  %v7249_v10 = vpop.eup %4863  ;;  %v3448_v21 = vrot.slane %v7243_v32, 1 }
 0x5ab   :  { %v3459_v30 = vrot.slane %v3458_v5, 4  ;;  %v3443_v52 = vsel %vm1304_vm5, %v3442_v12, %v3441_v22  ;;  %v3451_v61 = vsel %vm1298_vm2, %v3450_v44, %v7249_v10 }
 0x5ac   :  { %v3445_v48 = vsel %vm1306_vm6, %v3444_v40, %v3443_v52  ;;  %v3466_v47 = vsel %vm2098_vm14, %v3451_v61, 0.0 }
 0x5ad   :  { %v3460_v53 = vadd.f32 %v3459_v30, %v3458_v5  ;;  %v3447_v50 = vsel %vm1308_vm7, %v3446_v9, %v3445_v48 }
 0x5ae   :  { %v3449_v36 = vsel %vm1310_vm8, %v3448_v21, %v3447_v50 }
 0x5af   :  { %v3461_v26 = vrot.slane %v3460_v53, 2  ;;  %v3465_v1 = vsel %vm873_vm0, %v3449_v36, 0.0 }
 0x5b0   :  { %v3467_v8 = vadd.f32 %v3466_v47, %v3465_v1 }
 0x5b1   :  { %v3462_v20 = vadd.f32 %v3461_v26, %v3460_v53 }
 0x5b2   :  { %v3468_v51 = vrot.slane %v3467_v8, 4 }
 0x5b3   :  { %v3463_v35 = vrot.slane %v3462_v20, 1 }
 0x5b4   :  { %v3469_v18 = vadd.f32 %v3468_v51, %v3467_v8 }
 0x5b5   :  { %v3464_v11 = vadd.f32 %v3463_v35, %v3462_v20 }
 0x5b6   :  { %v3470_v34 = vrot.slane %v3469_v18, 2 }
 0x5b7   :  { %4865 = vrcp.f32 %v3464_v11 }
 0x5b8   :  { %v3471_v17 = vadd.f32 %v3470_v34, %v3469_v18 }
 0x5ba   :  { %v3472_v44 = vrot.slane %v3471_v17, 1 }
 0x5bc   :  { %v3473_v56 = vadd.f32 %v3472_v44, %v3471_v17 }
 0x5be   :  { %4867 = vrcp.f32 %v3473_v56 }
 0x5c1   :  { %v4866_v14 = vpop.eup %4865 }
 0x5c2   :  { %v7262_v55 = vrot.slane %v4866_v14, %v5016_v2 }
 0x5c4   :  { %v3484_v5 = vmul.f32 %v7191_v58, %v7262_v55  ;;  %v3485_v28 = vmul.f32 %v7185_v41, %v7262_v55  ;;  %v3486_v53 = vmul.f32 %v7187_v60, %v7262_v55 }
 0x5c6   :  { %v3507_v12 = vrot.slane %v3484_v5, %v5016_v2  ;;  %v3511_v22 = vrot.slane %v3485_v28, %v5016_v2  ;;  %v3515_v26 = vrot.slane %v3486_v53, %v5016_v2  ;;  %v8339_v28 = vld [vmem:[#allocation24_spill] sm:$0xff]  ;;  %v8343_v53 = vld [vmem:[#allocation30_spill] sm:$0xff] }
 0x5c8   :  { %v4868_v40 = vpop.eup %4867  ;;  %v3585_v30 = vmul.f32 %v3507_v12, %v8281_v7  ;;  %v3584_v52 = vmul.f32 %v3507_v12, %v8280_v6  ;;  %v3586_v58 = vmul.f32 %v3511_v22, %v8285_v0  ;;  %v3587_v41 = vmul.f32 %v3511_v22, %v8284_v62 }
 0x5c9   :  { %v7273_v9 = vrot.slane %v4868_v40, %v5016_v2  ;;  %v3589_v20 = vmul.f32 %v3515_v26, %v8286_v3  ;;  %v3588_v35 = vmul.f32 %v3515_v26, %v8287_v15  ;;  %v7308_v3 = vmul.f32 %v7208_v19, %v7262_v55 }
 0x5ca   :  { %v3627_v61 = vsel %vm873_vm0, %v3585_v30, 0.0  ;;  %v3624_v48 = vsel %vm873_vm0, %v3584_v52, 0.0  ;;  %v3630_v50 = vsel %vm873_vm0, %v3586_v58, 0.0  ;;  %v3633_v36 = vsel %vm873_vm0, %v3587_v41, 0.0 }
 0x5cb   :  { %3628 = vadd.xlane.f32.xlu0 %v3627_v61  ;;  %3625 = vadd.xlane.f32.xlu1 %v3624_v48  ;;  %v3494_v21 = vmul.f32 %v7222_v16, %v7273_v9  ;;  %v3495_v7 = vmul.f32 %v4854_v29, %v7273_v9  ;;  %v3496_v8 = vmul.f32 %v7228_v63, %v7273_v9  ;;  %v8341_v61 = vld [vmem:[#allocation26_spill] sm:$0xff] }
 0x5cc   :  { %v3497_v15 = vmul.f32 %v7231_v57, %v7273_v9  ;;  %v7317_v34 = vmul.f32 %v7249_v10, %v7273_v9  ;;  %v7321_v17 = vmul.f32 %v7217_v38, %v7273_v9  ;;  %v3498_v12 = vmul.f32 %v7236_v42, %v7273_v9 }
 0x5cd   :  { %v3547_v6 = vrot.slane %v3494_v21, %v5016_v2  ;;  %v3551_v0 = vrot.slane %v3495_v7, %v5016_v2  ;;  %v3489_v40 = vmul.f32 %v7204_v49, %v7262_v55  ;;  %v8342_v7 = vld [vmem:[#allocation29_spill] sm:$0xff] }
 0x5ce   :  { %v3559_v56 = vrot.slane %v3497_v15, %v5016_v2  ;;  %v3563_v58 = vrot.slane %v3498_v12, %v5016_v2 }
 0x5cf   :  { %3631 = vadd.xlane.f32.xlu0 %v3630_v50  ;;  %3634 = vadd.xlane.f32.xlu1 %v3633_v36  ;;  %v3605_v62 = vmul.f32 %v3547_v6, %v8290_v31  ;;  %v3604_v47 = vmul.f32 %v3547_v6, %v8291_v45  ;;  %v3607_v60 = vmul.f32 %v3551_v0, %v8295_v37  ;;  %v8344_v36 = vld [vmem:[#allocation39_spill] sm:$0xff] }
 0x5d0   :  { %v3606_v1 = vmul.f32 %v3551_v0, %v8296_v46  ;;  %v3487_v31 = vmul.f32 %v7194_v27, %v7262_v55  ;;  %v3555_v37 = vrot.slane %v3496_v8, %v5016_v2  ;;  %v3639_v46 = vsel %vm873_vm0, %v3589_v20, 0.0  ;;  %v8346_v20 = vld [vmem:[#allocation41_spill] sm:$0xff] }
 0x5d1   :  { %v3687_v16 = vsel %vm873_vm0, %v3605_v62, 0.0  ;;  %v3684_v29 = vsel %vm873_vm0, %v3604_v47, 0.0  ;;  %v3693_v45 = vsel %vm873_vm0, %v3607_v60, 0.0  ;;  %v3636_v27 = vsel %vm873_vm0, %v3588_v35, 0.0  ;;  %v8348_v35 = vld [vmem:[#allocation43_spill] sm:$0xff] }
 0x5d2   :  { %v3690_v51 = vsel %vm873_vm0, %v3606_v1, 0.0  ;;  %v3519_v63 = vrot.slane %v3487_v31, %v5016_v2  ;;  %v3609_v18 = vmul.f32 %v3555_v37, %v8293_v43  ;;  %v3608_v11 = vmul.f32 %v3555_v37, %v8294_v39 }
 0x5d3   :  { %3688 = vadd.xlane.f32.xlu1 %v3687_v16  ;;  %3685 = vadd.xlane.f32.xlu0 %v3684_v29  ;;  %v3488_v43 = vmul.f32 %v7198_v4, %v7262_v55  ;;  %v3610_v4 = vmul.f32 %v3559_v56, %v8339_v28  ;;  %v3527_v42 = vrot.slane %v3489_v40, %v5016_v2  ;;  %v8345_v29 = vld [vmem:[#allocation40_spill] sm:$0xff]  ;;  %v8355_v40 = vld [vmem:[#allocation50_spill] sm:$0xff] }
 0x5d4   :  { %v3591_v19 = vmul.f32 %v3519_v63, %v8288_v25  ;;  %v3699_v39 = vsel %vm873_vm0, %v3609_v18, 0.0  ;;  %v3696_v44 = vsel %vm873_vm0, %v3608_v11, 0.0  ;;  %v3590_v57 = vmul.f32 %v3519_v63, %v8289_v13  ;;  %v8338_v25 = vld [vmem:[#allocation27_spill] sm:$0xff]  ;;  %v8340_v13 = vld [vmem:[#allocation28_spill] sm:$0xff] }
 0x5d5   :  { %v3523_v38 = vrot.slane %v3488_v43, %v5016_v2  ;;  %v3611_v5 = vmul.f32 %v3559_v56, %v8338_v25  ;;  %v3702_v52 = vsel %vm873_vm0, %v3610_v4, 0.0  ;;  %v3613_v6 = vmul.f32 %v3563_v58, %v8342_v7  ;;  %v8349_v18 = vld [vmem:[#allocation44_spill] sm:$0xff] }
 0x5d6   :  { %v3645_v10 = vsel %vm873_vm0, %v3591_v19, 0.0  ;;  %v3642_v14 = vsel %vm873_vm0, %v3590_v57, 0.0  ;;  %v3612_v49 = vmul.f32 %v3563_v58, %v8343_v53  ;;  %v3499_v50 = vmul.f32 %v7210_v59, %v7273_v9  ;;  %v8351_v57 = vld [vmem:[#allocation46_spill] sm:$0xff] }
 0x5d7   :  { %3694 = vadd.xlane.f32.xlu1 %v3693_v45  ;;  %3691 = vadd.xlane.f32.xlu0 %v3690_v51  ;;  %v3593_v22 = vmul.f32 %v3523_v38, %v8340_v13  ;;  %v3705_v30 = vsel %vm873_vm0, %v3611_v5, 0.0  ;;  %v3592_v48 = vmul.f32 %v3523_v38, %v8341_v61  ;;  %v3595_v0 = vmul.f32 %v3527_v42, %v8344_v36  ;;  %v8347_v45 = vld [vmem:[#allocation42_spill] sm:$0xff]  ;;  %v8353_v5 = vld [vmem:[#allocation48_spill] sm:$0xff]  ;;  %v8356_v61 = vld [vmem:[#allocation51_spill] sm:$0xff] }
 0x5d8   :  { %v3490_v62 = vmul.f32 %v7219_v23, %v7262_v55  ;;  %v3711_v47 = vsel %vm873_vm0, %v3613_v6, 0.0  ;;  %v3708_v16 = vsel %vm873_vm0, %v3612_v49, 0.0  ;;  %v3594_v26 = vmul.f32 %v3527_v42, %v8345_v29  ;;  %v8357_v42 = vld [vmem:[#allocation52_spill] sm:$0xff]  ;;  %v8359_v49 = vld [vmem:[#allocation54_spill] sm:$0xff] }
 0x5d9   :  { %v3651_v41 = vsel %vm873_vm0, %v3593_v22, 0.0  ;;  %v3648_v21 = vsel %vm873_vm0, %v3592_v48, 0.0  ;;  %v3567_v60 = vrot.slane %v3499_v50, %v5016_v2  ;;  %v3657_v1 = vsel %vm873_vm0, %v3595_v0, 0.0 }
 0x5da   :  { %v3531_v59 = vrot.slane %v3490_v62, %v5016_v2  ;;  %v3654_v8 = vsel %vm873_vm0, %v3594_v26, 0.0  ;;  %v3500_v51 = vmul.f32 %v7214_v54, %v7273_v9  ;;  %v3501_v56 = vmul.f32 %v7243_v32, %v7273_v9  ;;  %v8354_v9 = vld [vmem:[#allocation49_spill] sm:$0xff] }
 0x5db   :  { %3640 = vadd.xlane.f32.xlu1 %v3639_v46  ;;  %3637 = vadd.xlane.f32.xlu0 %v3636_v27  ;;  %v3615_v31 = vmul.f32 %v3567_v60, %v8346_v20  ;;  %v3614_v23 = vmul.f32 %v3567_v60, %v8347_v45  ;;  %v3491_v46 = vmul.f32 %v7182_v33, %v7262_v55 }
 0x5dc   :  { %v3597_v37 = vmul.f32 %v3531_v59, %v8348_v35  ;;  %v3596_v11 = vmul.f32 %v3531_v59, %v8349_v18  ;;  %v3571_v15 = vrot.slane %v3500_v51, %v5016_v2  ;;  %v3575_v4 = vrot.slane %v3501_v56, %v5016_v2 }
 0x5dd   :  { %v3717_v63 = vsel %vm873_vm0, %v3615_v31, 0.0  ;;  %v3714_v27 = vsel %vm873_vm0, %v3614_v23, 0.0  ;;  %v3535_v54 = vrot.slane %v3491_v46, %v5016_v2  ;;  %v3539_v13 = vrot.slane %v7308_v3, %v5016_v2 }
 0x5de   :  { %v3663_v19 = vsel %vm873_vm0, %v3597_v37, 0.0  ;;  %v3660_v43 = vsel %vm873_vm0, %v3596_v11, 0.0  ;;  %v3616_v33 = vmul.f32 %v3571_v15, %v8351_v57  ;;  %v3619_v22 = vmul.f32 %v3575_v4, %v8354_v9 }
 0x5df   :  { %3700 = vadd.xlane.f32.xlu1 %v3699_v39  ;;  %3697 = vadd.xlane.f32.xlu0 %v3696_v44  ;;  %v8350_v39 = vld [vmem:[#allocation45_spill] sm:$0xff]  ;;  %v3598_v28 = vmul.f32 %v3535_v54, %v8353_v5  ;;  %v3601_v48 = vmul.f32 %v3539_v13, %v8356_v61  ;;  %v3579_v7 = vrot.slane %v7317_v34, %v5016_v2  ;;  %v8361_v34 = vld [vmem:[#allocation56_spill] sm:$0xff] }
 0x5e0   :  { %v3617_v44 = vmul.f32 %v3571_v15, %v8350_v39  ;;  %v3720_v25 = vsel %vm873_vm0, %v3616_v33, 0.0  ;;  %v3729_v58 = vsel %vm873_vm0, %v3619_v22, 0.0  ;;  %v3583_v36 = vrot.slane %v7321_v17, %v5016_v2  ;;  %v8365_v22 = vld [vmem:[#allocation59_spill] sm:$0xff] }
 0x5e1   :  { %v3666_v32 = vsel %vm873_vm0, %v3598_v28, 0.0  ;;  %v3675_v6 = vsel %vm873_vm0, %v3601_v48, 0.0  ;;  %v3620_v29 = vmul.f32 %v3579_v7, %v8361_v34 }
 0x5e3   :  { %3646 = vadd.xlane.f32.xlu1 %v3645_v10  ;;  %3643 = vadd.xlane.f32.xlu0 %v3642_v14  ;;  %v8352_v10 = vld [vmem:[#allocation47_spill] sm:$0xff]  ;;  %v3723_v14 = vsel %vm873_vm0, %v3617_v44, 0.0  ;;  %v3732_v60 = vsel %vm873_vm0, %v3620_v29, 0.0 }
 0x5e4   :  { %v3599_v38 = vmul.f32 %v3535_v54, %v8352_v10 }
 0x5e6   :  { %v3669_v12 = vsel %vm873_vm0, %v3599_v38, 0.0 }
 0x5e7   :  { %3706 = vadd.xlane.f32.xlu1 %v3705_v30  ;;  %3703 = vadd.xlane.f32.xlu0 %v3702_v52  ;;  %v3618_v30 = vmul.f32 %v3575_v4, %v8355_v40  ;;  %v3493_v52 = vmul.f32 %v7202_v24, %v7262_v55  ;;  %v8358_v55 = vld [vmem:[#allocation53_spill] sm:$0xff] }
 0x5e9   :  { %v3543_v3 = vrot.slane %v3493_v52, %v5016_v2 }
 0x5eb   :  { %3652 = vadd.xlane.f32.xlu1 %v3651_v41  ;;  %3649 = vadd.xlane.f32.xlu0 %v3648_v21  ;;  %v3726_v41 = vsel %vm873_vm0, %v3618_v30, 0.0  ;;  %v3600_v21 = vmul.f32 %v3539_v13, %v8357_v42  ;;  %v3603_v53 = vmul.f32 %v3543_v3, %v8358_v55  ;;  %v3602_v50 = vmul.f32 %v3543_v3, %v8359_v49  ;;  %v8366_v30 = vld [vmem:[#allocation60_spill] sm:$0xff] }
 0x5ed   :  { %v3672_v24 = vsel %vm873_vm0, %v3600_v21, 0.0  ;;  %v3681_v0 = vsel %vm873_vm0, %v3603_v53, 0.0  ;;  %v3678_v62 = vsel %vm873_vm0, %v3602_v50, 0.0 }
 0x5ef   :  { %3712 = vadd.xlane.f32.xlu1 %v3711_v47  ;;  %3709 = vadd.xlane.f32.xlu0 %v3708_v16  ;;  %v8360_v47 = vld [vmem:[#allocation55_spill] sm:$0xff] }
 0x5f0   :  { %v3621_v16 = vmul.f32 %v3579_v7, %v8360_v47 }
 0x5f2   :  { %v3735_v26 = vsel %vm873_vm0, %v3621_v16, 0.0 }
 0x5f3   :  { %3658 = vadd.xlane.f32.xlu1 %v3657_v1  ;;  %3655 = vadd.xlane.f32.xlu0 %v3654_v8  ;;  %v8362_v1 = vld [vmem:[#allocation57_spill] sm:$0xff]  ;;  %v8363_v8 = vld [vmem:[#allocation58_spill] sm:$0xff] }
 0x5f4   :  { %v3623_v59 = vmul.f32 %v3583_v36, %v8362_v1  ;;  %v3622_v20 = vmul.f32 %v3583_v36, %v8363_v8 }
 0x5f6   :  { %v3741_v17 = vsel %vm873_vm0, %v3623_v59, 0.0  ;;  %v3738_v31 = vsel %vm873_vm0, %v3622_v20, 0.0 }
 0x5f7   :  { %3718 = vadd.xlane.f32.xlu1 %v3717_v63  ;;  %3715 = vadd.xlane.f32.xlu0 %v3714_v27 }
 0x5fb   :  { %3664 = vadd.xlane.f32.xlu1 %v3663_v19  ;;  %3661 = vadd.xlane.f32.xlu0 %v3660_v43 }
 0x5ff   :  { %3724 = vadd.xlane.f32.xlu1 %v3723_v14  ;;  %3721 = vadd.xlane.f32.xlu0 %v3720_v25 }
 0x603   :  { %3670 = vadd.xlane.f32.xlu1 %v3669_v12  ;;  %3667 = vadd.xlane.f32.xlu0 %v3666_v32 }
 0x607   :  { %3730 = vadd.xlane.f32.xlu1 %v3729_v58  ;;  %3727 = vadd.xlane.f32.xlu0 %v3726_v41 }
 0x60b   :  { %3676 = vadd.xlane.f32.xlu1 %v3675_v6  ;;  %3673 = vadd.xlane.f32.xlu0 %v3672_v24 }
 0x60f   :  { %3682 = vadd.xlane.f32.xlu1 %v3681_v0  ;;  %3679 = vadd.xlane.f32.xlu0 %v3678_v62 }
 0x613   :  { %3736 = vadd.xlane.f32.xlu1 %v3735_v26  ;;  %3733 = vadd.xlane.f32.xlu0 %v3732_v60 }
 0x617   :  { %3742 = vadd.xlane.f32.xlu1 %v3741_v17  ;;  %3739 = vadd.xlane.f32.xlu0 %v3738_v31 }
 0x658   :  { %v7415_v45 = vpop.xlane.xlu0 %3628  ;;  %v7417_v23 = vpop.xlane.xlu1 %3625 }
 0x659   :  { %v3745_v32 = vmul.f32 %v7415_v45, %v7415_v45  ;;  %v3744_v9 = vmul.f32 %v7417_v23, %v7417_v23 }
 0x65b   :  { %v3831_v55 = vrot.slane %v3745_v32, %v8366_v30  ;;  %v3827_v50 = vrot.slane %v3744_v9, %v8365_v22 }
 0x65c   :  { %v7419_v51 = vpop.xlane.xlu0 %3631  ;;  %v7421_v35 = vpop.xlane.xlu1 %3634 }
 0x65d   :  { %v3746_v28 = vmul.f32 %v7419_v51, %v7419_v51  ;;  %v3747_v4 = vmul.f32 %v7421_v35, %v7421_v35  ;;  %v3832_v32 = vsel %vm1125_vm1, %v3831_v55, %v3827_v50 }
 0x65f   :  { %v3836_v40 = vrot.slane %v3746_v28, %v8365_v22  ;;  %v3840_v52 = vrot.slane %v3747_v4, %v8366_v30 }
 0x660   :  { %v7423_v37 = vpop.xlane.xlu0 %3685  ;;  %v7425_v46 = vpop.xlane.xlu1 %3688 }
 0x661   :  { %v3764_v61 = vmul.f32 %v7423_v37, %v7423_v37  ;;  %v3765_v48 = vmul.f32 %v7425_v46, %v7425_v46  ;;  %v3841_v36 = vsel %vm1125_vm1, %v3840_v52, %v3836_v40 }
 0x662   :  { %v4004_v52 = vsel %vm1298_vm2, %v3841_v36, %v3832_v32 }
 0x663   :  { %v3917_v0 = vrot.slane %v3764_v61, %v8365_v22  ;;  %v3921_v62 = vrot.slane %v3765_v48, %v8366_v30 }
 0x664   :  { %v7427_v63 = vpop.xlane.xlu0 %3691  ;;  %v7429_v27 = vpop.xlane.xlu1 %3694 }
 0x665   :  { %v3766_v42 = vmul.f32 %v7427_v63, %v7427_v63  ;;  %v3767_v21 = vmul.f32 %v7429_v27, %v7429_v27  ;;  %v3922_v61 = vsel %vm1125_vm1, %v3921_v62, %v3917_v0 }
 0x667   :  { %v3926_v34 = vrot.slane %v3766_v42, %v8365_v22  ;;  %v3930_v29 = vrot.slane %v3767_v21, %v8366_v30 }
 0x668   :  { %v7431_v18 = vpop.xlane.xlu0 %3637  ;;  %v7433_v11 = vpop.xlane.xlu1 %3640 }
 0x669   :  { %v3748_v3 = vmul.f32 %v7431_v18, %v7431_v18  ;;  %v3749_v7 = vmul.f32 %v7433_v11, %v7433_v11  ;;  %v3931_v48 = vsel %vm1125_vm1, %v3930_v29, %v3926_v34 }
 0x66b   :  { %v3845_v26 = vrot.slane %v3748_v3, %v8365_v22  ;;  %v3849_v60 = vrot.slane %v3749_v7, %v8366_v30 }
 0x66c   :  { %v7435_v15 = vpop.xlane.xlu0 %3697  ;;  %v7437_v19 = vpop.xlane.xlu1 %3700 }
 0x66d   :  { %v3768_v1 = vmul.f32 %v7435_v15, %v7435_v15  ;;  %v3769_v59 = vmul.f32 %v7437_v19, %v7437_v19  ;;  %v3850_v42 = vsel %vm1125_vm1, %v3849_v60, %v3845_v26  ;;  %v4012_v26 = vsel %vm1298_vm2, %v3931_v48, %v3922_v61 }
 0x66e   :  { %v4005_v60 = vsel %vm1300_vm3, %v3850_v42, %v4004_v52 }
 0x66f   :  { %v3935_v21 = vrot.slane %v3768_v1, %v8365_v22  ;;  %v3939_v3 = vrot.slane %v3769_v59, %v8366_v30 }
 0x670   :  { %v7439_v54 = vpop.xlane.xlu0 %3643  ;;  %v7441_v43 = vpop.xlane.xlu1 %3646 }
 0x671   :  { %v3750_v6 = vmul.f32 %v7439_v54, %v7439_v54  ;;  %v3751_v24 = vmul.f32 %v7441_v43, %v7441_v43 }
 0x673   :  { %v3854_v8 = vrot.slane %v3750_v6, %v8365_v22  ;;  %v3858_v20 = vrot.slane %v3751_v24, %v8366_v30 }
 0x674   :  { %v7443_v39 = vpop.xlane.xlu0 %3703  ;;  %v7445_v44 = vpop.xlane.xlu1 %3706 }
 0x675   :  { %v3770_v17 = vmul.f32 %v7443_v39, %v7443_v39  ;;  %v3771_v31 = vmul.f32 %v7445_v44, %v7445_v44  ;;  %v3859_v24 = vsel %vm1125_vm1, %v3858_v20, %v3854_v8 }
 0x676   :  { %v4006_v8 = vsel %vm1302_vm4, %v3859_v24, %v4005_v60 }
 0x677   :  { %v3944_v55 = vrot.slane %v3770_v17, %v8365_v22 }
 0x678   :  { %v7447_v57 = vpop.xlane.xlu0 %3649  ;;  %v7449_v33 = vpop.xlane.xlu1 %3652 }
 0x679   :  { %v3752_v53 = vmul.f32 %v7447_v57, %v7447_v57  ;;  %v3753_v49 = vmul.f32 %v7449_v33, %v7449_v33 }
 0x67b   :  { %v3863_v28 = vrot.slane %v3752_v53, %v8365_v22  ;;  %v3867_v4 = vrot.slane %v3753_v49, %v8366_v30  ;;  %v3948_v53 = vrot.slane %v3771_v31, %v8366_v30 }
 0x67c   :  { %v7451_v56 = vpop.xlane.xlu0 %3709  ;;  %v7453_v10 = vpop.xlane.xlu1 %3712 }
 0x67d   :  { %v3868_v49 = vsel %vm1125_vm1, %v3867_v4, %v3863_v28  ;;  %v3772_v20 = vmul.f32 %v7451_v56, %v7451_v56  ;;  %v3940_v28 = vsel %vm1125_vm1, %v3939_v3, %v3935_v21  ;;  %v3949_v4 = vsel %vm1125_vm1, %v3948_v53, %v3944_v55 }
 0x67e   :  { %v3773_v32 = vmul.f32 %v7453_v10, %v7453_v10  ;;  %v4007_v52 = vsel %vm1304_vm5, %v3868_v49, %v4006_v8 }
 0x67f   :  { %v3953_v49 = vrot.slane %v3772_v20, %v8365_v22 }
 0x680   :  { %v7455_v38 = vpop.xlane.xlu0 %3655  ;;  %v7457_v14 = vpop.xlane.xlu1 %3658 }
 0x681   :  { %v3754_v7 = vmul.f32 %v7455_v38, %v7455_v38  ;;  %v3755_v6 = vmul.f32 %v7457_v14, %v7457_v14 }
 0x683   :  { %v3872_v17 = vrot.slane %v3754_v7, %v8365_v22  ;;  %v3876_v31 = vrot.slane %v3755_v6, %v8366_v30 }
 0x684   :  { %v7459_v25 = vpop.xlane.xlu0 %3715  ;;  %v7461_v5 = vpop.xlane.xlu1 %3718 }
 0x688   :  { %v7467_v12 = vpop.xlane.xlu0 %3661  ;;  %v7469_v13 = vpop.xlane.xlu1 %3664 }
 0x689   :  { %8364 = vst [vmem:[#allocation82_spill] sm:$0xff] %v7467_v12  ;;  %v3756_v50 = vmul.f32 %v7467_v12, %v7467_v12  ;;  %v3757_v36 = vmul.f32 %v7469_v13, %v7469_v13 }
 0x68b   :  { %v3881_v61 = vrot.slane %v3756_v50, %v8365_v22  ;;  %v3885_v48 = vrot.slane %v3757_v36, %v8366_v30  ;;  %v3877_v50 = vsel %vm1125_vm1, %v3876_v31, %v3872_v17  ;;  %v3774_v36 = vmul.f32 %v7459_v25, %v7459_v25 }
 0x68c   :  { %v7481_v58 = vpop.xlane.xlu0 %3721  ;;  %v7483_v41 = vpop.xlane.xlu1 %3724 }
 0x68d   :  { %8367 = vst [vmem:[#allocation81_spill] sm:$0xff] %v7481_v58  ;;  %8368 = vst [vmem:[#allocation86_spill] sm:$0xff] %v7483_v41  ;;  %v3777_v60 = vmul.f32 %v7483_v41, %v7483_v41  ;;  %v3962_v41 = vrot.slane %v3774_v36, %v8365_v22 }
 0x690   :  { %v7506_v47 = vpop.xlane.xlu0 %3667  ;;  %v7508_v16 = vpop.xlane.xlu1 %3670 }
 0x691   :  { %8369 = vst [vmem:[#allocation85_spill] sm:$0xff] %v7506_v47  ;;  %8370 = vst [vmem:[#allocation84_spill] sm:$0xff] %v7508_v16  ;;  %v3758_v0 = vmul.f32 %v7506_v47, %v7506_v47  ;;  %v3759_v62 = vmul.f32 %v7508_v16, %v7508_v16  ;;  %v3886_v47 = vsel %vm1125_vm1, %v3885_v48, %v3881_v61 }
 0x692   :  { %v4008_v61 = vsel %vm1306_vm6, %v3877_v50, %v4007_v52 }
 0x693   :  { %v3890_v42 = vrot.slane %v3758_v0, %v8365_v22  ;;  %v3894_v24 = vrot.slane %v3759_v62, %v8366_v30  ;;  %v3775_v0 = vmul.f32 %v7461_v5, %v7461_v5  ;;  %v3776_v62 = vmul.f32 %v7481_v58, %v7481_v58 }
 0x694   :  { %v7527_v9 = vpop.xlane.xlu0 %3727  ;;  %v7529_v40 = vpop.xlane.xlu1 %3730 }
 0x695   :  { %8371 = vst [vmem:[#allocation83_spill] sm:$0xff] %v7527_v9  ;;  %8372 = vst [vmem:[#allocation88_spill] sm:$0xff] %v7529_v40  ;;  %v3778_v8 = vmul.f32 %v7527_v9, %v7527_v9  ;;  %v3779_v20 = vmul.f32 %v7529_v40, %v7529_v40  ;;  %v3895_v16 = vsel %vm1125_vm1, %v3894_v24, %v3890_v42 }
 0x696   :  { %v3957_v40 = vrot.slane %v3773_v32, %v8366_v30  ;;  %v3966_v48 = vrot.slane %v3775_v0, %v8366_v30  ;;  %v3971_v42 = vrot.slane %v3776_v62, %v8365_v22  ;;  %v4013_v0 = vsel %vm1300_vm3, %v3940_v28, %v4012_v26 }
 0x697   :  { %v3984_v32 = vrot.slane %v3779_v20, %v8366_v30 }
 0x698   :  { %v7553_v34 = vpop.xlane.xlu0 %3673  ;;  %v7555_v29 = vpop.xlane.xlu1 %3676  ;;  %v3958_v62 = vsel %vm1125_vm1, %v3957_v40, %v3953_v49 }
 0x699   :  { %v3760_v1 = vmul.f32 %v7553_v34, %v7553_v34  ;;  %v3761_v59 = vmul.f32 %v7555_v29, %v7555_v29 }
 0x69b   :  { %v3899_v21 = vrot.slane %v3760_v1, %v8365_v22  ;;  %v3903_v3 = vrot.slane %v3761_v59, %v8366_v30 }
 0x69c   :  { %v7577_v7 = vpop.xlane.xlu0 %3679  ;;  %v7579_v6 = vpop.xlane.xlu1 %3682 }
 0x69d   :  { %v3762_v55 = vmul.f32 %v7577_v7, %v7577_v7  ;;  %v3763_v53 = vmul.f32 %v7579_v6, %v7579_v6 }
 0x69f   :  { %v3908_v1 = vrot.slane %v3762_v55, %v8365_v22  ;;  %v3912_v59 = vrot.slane %v3763_v53, %v8366_v30  ;;  %v3904_v53 = vsel %vm1125_vm1, %v3903_v3, %v3899_v21  ;;  %v3975_v21 = vrot.slane %v3777_v60, %v8366_v30 }
 0x6a0   :  { %v7603_v17 = vpop.xlane.xlu0 %3733  ;;  %v7605_v31 = vpop.xlane.xlu1 %3736  ;;  %v3980_v3 = vrot.slane %v3778_v8, %v8365_v22  ;;  %v3967_v60 = vsel %vm1125_vm1, %v3966_v48, %v3962_v41  ;;  %v4014_v8 = vsel %vm1302_vm4, %v3949_v4, %v4013_v0 }
 0x6a1   :  { %8373 = vst [vmem:[#allocation87_spill] sm:$0xff] %v7603_v17  ;;  %v3780_v58 = vmul.f32 %v7603_v17, %v7603_v17  ;;  %v3781_v55 = vmul.f32 %v7605_v31, %v7605_v31  ;;  %v3913_v9 = vsel %vm1125_vm1, %v3912_v59, %v3908_v1  ;;  %v4009_v17 = vsel %vm1308_vm7, %v3886_v47, %v4008_v61 }
 0x6a2   :  { %v4011_v12 = vsel %vm1298_vm2, %v3913_v9, %v3904_v53  ;;  %v4010_v52 = vsel %vm1310_vm8, %v3895_v16, %v4009_v17  ;;  %v3976_v20 = vsel %vm1125_vm1, %v3975_v21, %v3971_v42  ;;  %v3985_v26 = vsel %vm1125_vm1, %v3984_v32, %v3980_v3 }
 0x6a3   :  { %v4027_v24 = vsel %vm1329_vm10, %v4011_v12, 0.0  ;;  %v3989_v50 = vrot.slane %v3780_v58, %v8365_v22  ;;  %v3993_v36 = vrot.slane %v3781_v55, %v8366_v30  ;;  %v4024_v58 = vsel %vm1325_vm9, %v4010_v52, 0.0 }
 0x6a4   :  { %v7626_v1 = vpop.xlane.xlu0 %3739  ;;  %4028 = vadd.xlane.f32.xlu0 %v4027_v24  ;;  %v7628_v9 = vpop.xlane.xlu1 %3742  ;;  %v4015_v40 = vsel %vm1304_vm5, %v3958_v62, %v4014_v8 }
 0x6a5   :  { %v3782_v12 = vmul.f32 %v7626_v1, %v7626_v1  ;;  %v3783_v47 = vmul.f32 %v7628_v9, %v7628_v9  ;;  %v3994_v17 = vsel %vm1125_vm1, %v3993_v36, %v3989_v50  ;;  %v4016_v28 = vsel %vm1306_vm6, %v3967_v60, %v4015_v40 }
 0x6a6   :  { %v4017_v53 = vsel %vm1308_vm7, %v3976_v20, %v4016_v28  ;;  %v8374_v28 = vld [vmem:[#allocation12_spill] sm:$0xff] }
 0x6a7   :  { %v3998_v59 = vrot.slane %v3782_v12, %v8365_v22  ;;  %v4002_v16 = vrot.slane %v3783_v47, %v8366_v30  ;;  %v4018_v4 = vsel %vm1310_vm8, %v3985_v26, %v4017_v53 }
 0x6a8   :  { %4025 = vadd.xlane.f32.xlu0 %v4024_v58  ;;  %v4030_v61 = vsel %vm1325_vm9, %v4018_v4, 0.0 }
 0x6a9   :  { %v4003_v55 = vsel %vm1125_vm1, %v4002_v16, %v3998_v59 }
 0x6aa   :  { %v4019_v41 = vsel %vm1298_vm2, %v4003_v55, %v3994_v17 }
 0x6ab   :  { %v4033_v49 = vsel %vm1329_vm10, %v4019_v41, 0.0 }
 0x6ac   :  { %4034 = vadd.xlane.f32.xlu1 %v4033_v49 }
 0x6b0   :  { %4031 = vadd.xlane.f32.xlu1 %v4030_v61 }
 0x731   :  { %v4029_v48 = vpop.xlane.xlu0 %4028 }
 0x732   :  { %4869 = vrsqrt.f32 %v4029_v48  ;;  %v4065_v42 = vadd.f32 1.0, %v4029_v48  ;;  %vm4045_vm10 = vcmp.eq.f32.partialorder %v4029_v48, inf  ;;  %v4048_v36 = vand.u32 2147483648, %v4029_v48 }
 0x733   :  { %vm4047_vm14 = vcmp.eq.f32.partialorder %v4029_v48, 0.0 }
 0x734   :  { %4871 = vrcp.f32 %v4065_v42 }
 0x735   :  { %v4026_v24 = vpop.xlane.xlu0 %4025 }
 0x736   :  { %4873 = vrsqrt.f32 %v4026_v24  ;;  %v4064_v21 = vadd.f32 1.0, %v4026_v24  ;;  %vm4038_vm15 = vcmp.eq.f32.partialorder %v4026_v24, inf  ;;  %v4041_v16 = vand.u32 2147483648, %v4026_v24 }
 0x737   :  { %vm4040_vm11 = vcmp.eq.f32.partialorder %v4026_v24, 0.0 }
 0x738   :  { %4875 = vrcp.f32 %v4064_v21 }
 0x739   :  { %v7655_v3 = vpop.xlane.xlu1 %4034 }
 0x73c   :  { %v4870_v32 = vpop.eup %4869 }
 0x73d   :  { %v4044_v52 = vmul.f32 %v4870_v32, %v4029_v48  ;;  %v4032_v50 = vpop.xlane.xlu1 %4031 }
 0x73e   :  { %4877 = vrsqrt.f32 %v4032_v50  ;;  %v4872_v12 = vpop.eup %4871  ;;  %v4066_v58 = vadd.f32 1.0, %v4032_v50  ;;  %vm4052_vm12 = vcmp.eq.f32.partialorder %v4032_v50, inf  ;;  %vm4054_vm13 = vcmp.eq.f32.partialorder %v4032_v50, 0.0 }
 0x73f   :  { %v4046_v47 = vsel %vm4045_vm10, %v4029_v48, %v4044_v52  ;;  %vm4059_vm10 = vcmp.eq.f32.partialorder %v7655_v3, inf }
 0x740   :  { %v4874_v0 = vpop.eup %4873  ;;  %v4049_v62 = vsel %vm4047_vm14, %v4048_v36, %v4046_v47  ;;  %4879 = vrcp.f32 %v4066_v58  ;;  %v8375_v47 = vld [vmem:[#allocation13_spill] sm:$0xff]  ;;  %vm4061_vm14 = vcmp.eq.f32.partialorder %v7655_v3, 0.0 }
 0x741   :  { %v4037_v60 = vmul.f32 %v4874_v0, %v4026_v24  ;;  %v4073_v59 = vmul.f32 %v4872_v12, %v4049_v62  ;;  %4881 = vrsqrt.f32 %v7655_v3 }
 0x742   :  { %v4876_v17 = vpop.eup %4875 }
 0x743   :  { %v4039_v8 = vsel %vm4038_vm15, %v4026_v24, %v4037_v60  ;;  %v4115_v20 = vrot.slane %v4073_v59, %v5016_v2  ;;  %v4119_v49 = vrot.slane %v4073_v59, %v8374_v28 }
 0x744   :  { %v4042_v55 = vsel %vm4040_vm11, %v4041_v16, %v4039_v8  ;;  %v8376_v16 = vld [vmem:[#allocation14_spill] sm:$0xff] }
 0x745   :  { %v7658_v26 = vmul.f32 %v4876_v17, %v4042_v55  ;;  %v4197_v40 = vmul.f32 %v4115_v20, %v7555_v29  ;;  %v4196_v41 = vmul.f32 %v4115_v20, %v7553_v34  ;;  %v4199_v61 = vmul.f32 %v4119_v49, %v7579_v6  ;;  %v8377_v20 = vld [vmem:[#allocation15_spill] sm:$0xff]  ;;  %v8378_v55 = vld [vmem:[#allocation16_spill] sm:$0xff] }
 0x746   :  { %v4198_v48 = vmul.f32 %v4119_v49, %v7577_v7  ;;  %v4055_v29 = vand.u32 2147483648, %v4032_v50  ;;  %v4067_v49 = vadd.f32 1.0, %v7655_v3 }
 0x747   :  { %4312 = vperm.xlu0 %4748, %v4197_v40   ;;  %4309 = vperm.xlu1 %4747, %v4196_v41   ;;  %v4083_v42 = vrot.slane %v7658_v26, %v5016_v2  ;;  %v4087_v32 = vrot.slane %v7658_v26, %v8374_v28  ;;  %v4103_v40 = vrot.slane %v7658_v26, %v8378_v55 }
 0x748   :  { %v4878_v53 = vpop.eup %4877  ;;  %4883 = vrcp.f32 %v4067_v49 }
 0x749   :  { %v4051_v4 = vmul.f32 %v4878_v53, %v4032_v50  ;;  %v4180_v34 = vmul.f32 %v4083_v42, %v7417_v23  ;;  %v4181_v21 = vmul.f32 %v4083_v42, %v7415_v45  ;;  %v4183_v36 = vmul.f32 %v4087_v32, %v7421_v35 }
 0x74a   :  { %v4880_v7 = vpop.eup %4879  ;;  %v4182_v12 = vmul.f32 %v4087_v32, %v7419_v51 }
 0x74b   :  { %v4053_v24 = vsel %vm4052_vm12, %v4032_v50, %v4051_v4  ;;  %4318 = vperm.xlu0 %4748, %v4199_v61   ;;  %4315 = vperm.xlu1 %4747, %v4198_v48   ;;  %v4091_v50 = vrot.slane %v7658_v26, %v8375_v47  ;;  %v4882_v53 = vpop.eup %4881  ;;  %v8379_v4 = vld [vmem:[#allocation17_spill] sm:$0xff]  ;;  %v8380_v48 = vld [vmem:[#allocation82_spill] sm:$0xff] }
 0x74c   :  { %v4056_v52 = vsel %vm4054_vm13, %v4055_v29, %v4053_v24  ;;  %v4107_v61 = vrot.slane %v7658_v26, %v8379_v4  ;;  %v8381_v29 = vld [vmem:[#allocation86_spill] sm:$0xff] }
 0x74d   :  { %v7671_v6 = vmul.f32 %v4880_v7, %v4056_v52  ;;  %v4185_v45 = vmul.f32 %v4091_v50, %v7433_v11  ;;  %v4184_v23 = vmul.f32 %v4091_v50, %v7431_v18  ;;  %v8383_v52 = vld [vmem:[#allocation18_spill] sm:$0xff]  ;;  %v8385_v50 = vld [vmem:[#allocation85_spill] sm:$0xff] }
 0x74e   :  { %v4192_v42 = vmul.f32 %v4107_v61, %v8380_v48 }
 0x74f   :  { %4261 = vperm.xlu0 %4748, %v4180_v34   ;;  %4264 = vperm.xlu1 %4747, %v4181_v21   ;;  %v4123_v0 = vrot.slane %v7671_v6, %v5016_v2  ;;  %v4127_v51 = vrot.slane %v7671_v6, %v8374_v28  ;;  %v4131_v18 = vrot.slane %v7671_v6, %v8375_v47  ;;  %v8382_v21 = vld [vmem:[#allocation81_spill] sm:$0xff] }
 0x750   :  { %v4143_v41 = vrot.slane %v7671_v6, %v8378_v55  ;;  %v4147_v24 = vrot.slane %v7671_v6, %v8379_v4 }
 0x751   :  { %v4201_v62 = vmul.f32 %v4123_v0, %v7425_v46  ;;  %v4200_v35 = vmul.f32 %v4123_v0, %v7423_v37  ;;  %v4203_v60 = vmul.f32 %v4127_v51, %v7429_v27  ;;  %v4202_v11 = vmul.f32 %v4127_v51, %v7427_v63  ;;  %v8387_v51 = vld [vmem:[#allocation83_spill] sm:$0xff] }
 0x752   :  { %v4205_v59 = vmul.f32 %v4131_v18, %v7437_v19  ;;  %v4204_v46 = vmul.f32 %v4131_v18, %v7435_v15  ;;  %v4095_v37 = vrot.slane %v7658_v26, %v8376_v16  ;;  %v4135_v63 = vrot.slane %v7671_v6, %v8376_v16 }
 0x753   :  { %4270 = vperm.xlu0 %4748, %v4183_v36   ;;  %4267 = vperm.xlu1 %4747, %v4182_v12   ;;  %v4099_v15 = vrot.slane %v7658_v26, %v8377_v20  ;;  %v4213_v34 = vmul.f32 %v4147_v24, %v8381_v29  ;;  %v4212_v32 = vmul.f32 %v4147_v24, %v8382_v21  ;;  %v4884_v36 = vpop.eup %4883  ;;  %v8384_v12 = vld [vmem:[#allocation84_spill] sm:$0xff] }
 0x754   :  { %v4187_v58 = vmul.f32 %v4095_v37, %v7441_v43  ;;  %v4186_v27 = vmul.f32 %v4095_v37, %v7439_v54  ;;  %v4207_v8 = vmul.f32 %v4135_v63, %v7445_v44  ;;  %v4206_v19 = vmul.f32 %v4135_v63, %v7443_v39 }
 0x755   :  { %v4189_v17 = vmul.f32 %v4099_v15, %v7449_v33  ;;  %v4188_v43 = vmul.f32 %v4099_v15, %v7447_v57  ;;  %v4139_v54 = vrot.slane %v7671_v6, %v8377_v20  ;;  %v4191_v33 = vmul.f32 %v4103_v40, %v7457_v14 }
 0x756   :  { %v4190_v57 = vmul.f32 %v4103_v40, %v7455_v38  ;;  %v4058_v14 = vmul.f32 %v4882_v53, %v7655_v3  ;;  %v4193_v38 = vmul.f32 %v4107_v61, %v7469_v13  ;;  %v4111_v13 = vrot.slane %v7658_v26, %v8383_v52 }
 0x757   :  { %4276 = vperm.xlu0 %4748, %v4185_v45   ;;  %4273 = vperm.xlu1 %4747, %v4184_v23   ;;  %v4209_v44 = vmul.f32 %v4139_v54, %v7453_v10  ;;  %v4208_v39 = vmul.f32 %v4139_v54, %v7451_v56  ;;  %v4211_v10 = vmul.f32 %v4143_v41, %v7461_v5  ;;  %v4062_v5 = vand.u32 2147483648, %v7655_v3 }
 0x758   :  { %v4210_v56 = vmul.f32 %v4143_v41, %v7459_v25  ;;  %v4060_v25 = vsel %vm4059_vm10, %v7655_v3, %v4058_v14  ;;  %v4195_v47 = vmul.f32 %v4111_v13, %v8384_v12  ;;  %v4194_v45 = vmul.f32 %v4111_v13, %v8385_v50 }
 0x759   :  { %v4063_v7 = vsel %vm4061_vm14, %v4062_v5, %v4060_v25  ;;  %v4151_v23 = vrot.slane %v7671_v6, %v8383_v52  ;;  %v4962_v52 = vmov 1983009808  }
 0x75a   :  { %v4075_v0 = vmul.f32 %v4884_v36, %v4063_v7  ;;  %v4580_v13 = vunpack.c.l.s4 %v4962_v52 }
 0x75b   :  { %4324 = vperm.xlu0 %4748, %v4201_v62   ;;  %4321 = vperm.xlu1 %4747, %v4200_v35   ;;  %v8386_v62 = vld [vmem:[#allocation88_spill] sm:$0xff]  ;;  %v4214_v26 = vmul.f32 %v4151_v23, %v8387_v51 }
 0x75c   :  { %v4215_v35 = vmul.f32 %v4151_v23, %v8386_v62  ;;  %v4155_v3 = vrot.slane %v4075_v0, %v5016_v2  ;;  %v4581_v62 = vunpack.c.0.s8 %v4580_v13 }
 0x75f   :  { %4330 = vperm.xlu0 %4748, %v4203_v60   ;;  %4327 = vperm.xlu1 %4747, %v4202_v11   ;;  %v4217_v60 = vmul.f32 %v4155_v3, %v7605_v31  ;;  %v8388_v11 = vld [vmem:[#allocation87_spill] sm:$0xff] }
 0x760   :  { %v4216_v18 = vmul.f32 %v4155_v3, %v8388_v11 }
 0x763   :  { %4336 = vperm.xlu0 %4748, %v4205_v59   ;;  %4333 = vperm.xlu1 %4747, %v4204_v46   ;;  %v4159_v59 = vrot.slane %v4075_v0, %v8374_v28 }
 0x765   :  { %v4219_v6 = vmul.f32 %v4159_v59, %v7628_v9  ;;  %v4218_v46 = vmul.f32 %v4159_v59, %v7626_v1 }
 0x767   :  { %4282 = vperm.xlu0 %4748, %v4187_v58   ;;  %4279 = vperm.xlu1 %4747, %v4186_v27  }
 0x76b   :  { %4342 = vperm.xlu0 %4748, %v4207_v8   ;;  %4339 = vperm.xlu1 %4747, %v4206_v19  }
 0x76f   :  { %4288 = vperm.xlu0 %4748, %v4189_v17   ;;  %4285 = vperm.xlu1 %4747, %v4188_v43  }
 0x773   :  { %4348 = vperm.xlu0 %4748, %v4209_v44   ;;  %4345 = vperm.xlu1 %4747, %v4208_v39  }
 0x777   :  { %4294 = vperm.xlu0 %4748, %v4191_v33   ;;  %4291 = vperm.xlu1 %4747, %v4190_v57  }
 0x77b   :  { %4354 = vperm.xlu0 %4748, %v4211_v10   ;;  %4351 = vperm.xlu1 %4747, %v4210_v56  }
 0x77f   :  { %4300 = vperm.xlu0 %4748, %v4193_v38   ;;  %4297 = vperm.xlu1 %4747, %v4192_v42  }
 0x783   :  { %4360 = vperm.xlu0 %4748, %v4213_v34   ;;  %4357 = vperm.xlu1 %4747, %v4212_v32  }
 0x787   :  { %4306 = vperm.xlu0 %4748, %v4195_v47   ;;  %4303 = vperm.xlu1 %4747, %v4194_v45  }
 0x78b   :  { %4366 = vperm.xlu0 %4748, %v4215_v35   ;;  %4363 = vperm.xlu1 %4747, %v4214_v26   ;;  %v4963_v35 = vmov 1934713408  }
 0x78c   :  { %v7771_v51 = vunpack.c.l.s4 %v4963_v35 }
 0x78f   :  { %4372 = vperm.xlu0 %4748, %v4217_v60   ;;  %4369 = vperm.xlu1 %4747, %v4216_v18  }
 0x793   :  { %4378 = vperm.xlu0 %4748, %v4219_v6   ;;  %4375 = vperm.xlu1 %4747, %v4218_v46  }
 0x7c6   :  { %v4313_v16 = vpop.permute.xlu0 %4312  ;;  %v4310_v37 = vpop.permute.xlu1 %4309 }
 0x7c7   :  { %v4459_v2 = vrot.slane %v4313_v16, %v8366_v30  ;;  %v4455_v58 = vrot.slane %v4310_v37, %v8365_v22 }
 0x7c9   :  { %v4460_v31 = vsel %vm1125_vm1, %v4459_v2, %v4455_v58 }
 0x7ca   :  { %v4319_v27 = vpop.permute.xlu0 %4318  ;;  %v4316_v63 = vpop.permute.xlu1 %4315 }
 0x7cb   :  { %v4468_v28 = vrot.slane %v4319_v27, %v8366_v30  ;;  %v4464_v8 = vrot.slane %v4316_v63, %v8365_v22 }
 0x7cd   :  { %v4469_v9 = vsel %vm1125_vm1, %v4468_v28, %v4464_v8 }
 0x7ce   :  { %v7751_v1 = vsel %vm1298_vm2, %v4469_v9, %v4460_v31  ;;  %v4262_v19 = vpop.permute.xlu0 %4261  ;;  %v4265_v20 = vpop.permute.xlu1 %4264 }
 0x7cf   :  { %v4383_v25 = vrot.slane %v4262_v19, %v8365_v22  ;;  %v4387_v5 = vrot.slane %v4265_v20, %v8366_v30 }
 0x7d1   :  { %v4388_v36 = vsel %vm1125_vm1, %v4387_v5, %v4383_v25 }
 0x7d2   :  { %v4271_v15 = vpop.permute.xlu0 %4270  ;;  %v4268_v17 = vpop.permute.xlu1 %4267 }
 0x7d3   :  { %v4396_v42 = vrot.slane %v4271_v15, %v8366_v30  ;;  %v4392_v24 = vrot.slane %v4268_v17, %v8365_v22 }
 0x7d5   :  { %v4397_v7 = vsel %vm1125_vm1, %v4396_v42, %v4392_v24 }
 0x7d6   :  { %v4277_v43 = vpop.permute.xlu0 %4276  ;;  %v4274_v54 = vpop.permute.xlu1 %4273  ;;  %v4560_v23 = vsel %vm1298_vm2, %v4397_v7, %v4388_v36  ;;  %v4612_v7 = vunpack.c.0.s8 %v7771_v51 }
 0x7d7   :  { %v4405_v21 = vrot.slane %v4277_v43, %v8366_v30  ;;  %v4401_v32 = vrot.slane %v4274_v54, %v8365_v22 }
 0x7d9   :  { %v4406_v0 = vsel %vm1125_vm1, %v4405_v21, %v4401_v32 }
 0x7da   :  { %v4325_v44 = vpop.permute.xlu0 %4324  ;;  %v4322_v39 = vpop.permute.xlu1 %4321  ;;  %v4561_v16 = vsel %vm1300_vm3, %v4406_v0, %v4560_v23 }
 0x7db   :  { %v4477_v26 = vrot.slane %v4325_v44, %v8366_v30  ;;  %v4473_v3 = vrot.slane %v4322_v39, %v8365_v22 }
 0x7dd   :  { %v4478_v19 = vsel %vm1125_vm1, %v4477_v26, %v4473_v3 }
 0x7de   :  { %v4331_v55 = vpop.permute.xlu0 %4330  ;;  %v4328_v40 = vpop.permute.xlu1 %4327 }
 0x7df   :  { %v4486_v60 = vrot.slane %v4331_v55, %v8366_v30  ;;  %v4482_v11 = vrot.slane %v4328_v40, %v8365_v22 }
 0x7e1   :  { %v4487_v20 = vsel %vm1125_vm1, %v4486_v60, %v4482_v11 }
 0x7e2   :  { %v4337_v33 = vpop.permute.xlu0 %4336  ;;  %v4334_v57 = vpop.permute.xlu1 %4333 }
 0x7e3   :  { %v4495_v18 = vrot.slane %v4337_v33, %v8366_v30  ;;  %v4491_v59 = vrot.slane %v4334_v57, %v8365_v22 }
 0x7e5   :  { %v4496_v43 = vsel %vm1125_vm1, %v4495_v18, %v4491_v59 }
 0x7e6   :  { %v4283_v41 = vpop.permute.xlu0 %4282  ;;  %v4280_v49 = vpop.permute.xlu1 %4279 }
 0x7e7   :  { %v4414_v12 = vrot.slane %v4283_v41, %v8366_v30  ;;  %v4410_v47 = vrot.slane %v4280_v49, %v8365_v22 }
 0x7e9   :  { %v4415_v37 = vsel %vm1125_vm1, %v4414_v12, %v4410_v47 }
 0x7ea   :  { %v7753_v53 = vpop.permute.xlu0 %4342  ;;  %v4340_v10 = vpop.permute.xlu1 %4339  ;;  %v4562_v55 = vsel %vm1302_vm4, %v4415_v37, %v4561_v16 }
 0x7eb   :  { %v4504_v63 = vrot.slane %v7753_v53, %v8366_v30  ;;  %v4500_v28 = vrot.slane %v4340_v10, %v8365_v22 }
 0x7ed   :  { %v4505_v53 = vsel %vm1125_vm1, %v4504_v63, %v4500_v28 }
 0x7ee   :  { %v4289_v56 = vpop.permute.xlu0 %4288  ;;  %v4286_v4 = vpop.permute.xlu1 %4285 }
 0x7ef   :  { %v4423_v6 = vrot.slane %v4289_v56, %v8366_v30  ;;  %v4419_v46 = vrot.slane %v4286_v4, %v8365_v22 }
 0x7f1   :  { %v4424_v54 = vsel %vm1125_vm1, %v4423_v6, %v4419_v46 }
 0x7f2   :  { %v7755_v61 = vpop.permute.xlu0 %4348  ;;  %v7757_v14 = vpop.permute.xlu1 %4345 }
 0x7f3   :  { %v4513_v15 = vrot.slane %v7755_v61, %v8366_v30  ;;  %v4509_v17 = vrot.slane %v7757_v14, %v8365_v22  ;;  %v4568_v61 = vsel %vm1298_vm2, %v4487_v20, %v4478_v19  ;;  %v4563_v14 = vsel %vm1304_vm5, %v4424_v54, %v4562_v55 }
 0x7f4   :  { %v4569_v24 = vsel %vm1300_vm3, %v4496_v43, %v4568_v61  ;;  %vm4693_vm3 = vcmask 654336  }
 0x7f6   :  { %v4295_v38 = vpop.permute.xlu0 %4294  ;;  %v4292_v48 = vpop.permute.xlu1 %4291 }
 0x7f7   :  { %v4432_v2 = vrot.slane %v4295_v38, %v8366_v30  ;;  %v4428_v58 = vrot.slane %v4292_v48, %v8365_v22  ;;  %v4514_v38 = vsel %vm1125_vm1, %v4513_v15, %v4509_v17  ;;  %v8389_v48 = vld [vmem:[#allocation11_spill] sm:$0xff] }
 0x7f8   :  { %v7812_v42 = vsub.s32 %v4581_v62, %v8389_v48  ;;  %v4964_v62 = vmov 0.0   ;;  %v4615_v59 = vsub.s32 %v4612_v7, %v8389_v48 }
 0x7f9   :  { %v4433_v40 = vsel %vm1125_vm1, %v4432_v2, %v4428_v58 }
 0x7fa   :  { %v4355_v29 = vpop.permute.xlu0 %4354  ;;  %v4352_v34 = vpop.permute.xlu1 %4351  ;;  %v4564_v25 = vsel %vm1306_vm6, %v4433_v40, %v4563_v14 }
 0x7fb   :  { %v4522_v44 = vrot.slane %v4355_v29, %v8366_v30  ;;  %v4518_v39 = vrot.slane %v4352_v34, %v8365_v22  ;;  %v4570_v34 = vsel %vm1302_vm4, %v4505_v53, %v4569_v24  ;;  %vm4695_vm4 = vcmask 785408  }
 0x7fc   :  { %v4571_v36 = vsel %vm1304_vm5, %v4514_v38, %v4570_v34  ;;  %vm4697_vm5 = vcmask 916480  }
 0x7fd   :  { %v4523_v5 = vsel %vm1125_vm1, %v4522_v44, %v4518_v39 }
 0x7fe   :  { %v4301_v50 = vpop.permute.xlu0 %4300  ;;  %v4298_v45 = vpop.permute.xlu1 %4297 }
 0x7ff   :  { %v4441_v8 = vrot.slane %v4301_v50, %v8366_v30  ;;  %v4437_v9 = vrot.slane %v4298_v45, %v8365_v22  ;;  %v4572_v45 = vsel %vm1306_vm6, %v4523_v5, %v4571_v36  ;;  %vm4711_vm6 = vcmask 1041408  }
 0x801   :  { %v4442_v10 = vsel %vm1125_vm1, %v4441_v8, %v4437_v9 }
 0x802   :  { %v4361_v31 = vpop.permute.xlu0 %4360  ;;  %v4358_v27 = vpop.permute.xlu1 %4357  ;;  %v4565_v21 = vsel %vm1308_vm7, %v4442_v10, %v4564_v25 }
 0x803   :  { %v4531_v33 = vrot.slane %v4361_v31, %v8366_v30  ;;  %v4527_v57 = vrot.slane %v4358_v27, %v8365_v22 }
 0x805   :  { %v4532_v32 = vsel %vm1125_vm1, %v4531_v33, %v4527_v57 }
 0x806   :  { %v4307_v41 = vpop.permute.xlu0 %4306  ;;  %v4304_v49 = vpop.permute.xlu1 %4303  ;;  %v4573_v23 = vsel %vm1308_vm7, %v4532_v32, %v4572_v45  ;;  %vm4712_vm7 = vcmask 257026  }
 0x807   :  { %v4450_v56 = vrot.slane %v4307_v41, %v8366_v30  ;;  %v4446_v4 = vrot.slane %v4304_v49, %v8365_v22 }
 0x809   :  { %v4451_v29 = vsel %vm1125_vm1, %v4450_v56, %v4446_v4 }
 0x80a   :  { %v4367_v52 = vpop.permute.xlu0 %4366  ;;  %v4364_v13 = vpop.permute.xlu1 %4363  ;;  %v4566_v12 = vsel %vm1310_vm8, %v4451_v29, %v4565_v21 }
 0x80b   :  { %v4540_v47 = vrot.slane %v4367_v52, %v8366_v30  ;;  %v4536_v50 = vrot.slane %v4364_v13, %v8365_v22  ;;  %v4578_v35 = vcombine.high %v4566_v12, %v4964_v62  ;;  %v4585_v60 = vrot.slane %v4566_v12, %v7812_v42 }
 0x80d   :  { %v4541_v0 = vsel %vm1125_vm1, %v4540_v47, %v4536_v50  ;;  %v4592_v58 = vrot.slane %v4578_v35, %v7812_v42 }
 0x80e   :  { %v4574_v26 = vsel %vm1310_vm8, %v4541_v0, %v4573_v23  ;;  %v4373_v3 = vpop.permute.xlu0 %4372  ;;  %v4370_v51 = vpop.permute.xlu1 %4369 }
 0x80f   :  { %v4593_v11 = vcombine.high %v4574_v26, %v4964_v62  ;;  %v4600_v18 = vrot.slane %v4574_v26, %v7812_v42  ;;  %v4549_v6 = vrot.slane %v4373_v3, %v8366_v30  ;;  %v4545_v37 = vrot.slane %v4370_v51, %v8365_v22 }
 0x811   :  { %v4607_v46 = vrot.slane %v4593_v11, %v7812_v42  ;;  %v4608_v16 = vcombine.low %v4585_v60, %v4600_v18  ;;  %v4609_v2 = vcombine.high %v4585_v60, %v4600_v18  ;;  %v4550_v20 = vsel %vm1125_vm1, %v4549_v6, %v4545_v37 }
 0x812   :  { %v4379_v31 = vpop.permute.xlu0 %4378  ;;  %v4376_v27 = vpop.permute.xlu1 %4375 }
 0x813   :  { %v4558_v63 = vrot.slane %v4379_v31, %v8366_v30  ;;  %v4554_v28 = vrot.slane %v4376_v27, %v8365_v22  ;;  %v4623_v8 = vrot.slane %v4609_v2, %v4615_v59  ;;  %v4616_v9 = vrot.slane %v4608_v16, %v4615_v59 }
 0x814   :  { %v4624_v19 = vcombine.low %v4592_v58, %v4607_v46  ;;  %v4625_v30 = vcombine.high %v4592_v58, %v4607_v46 }
 0x815   :  { %v4559_v15 = vsel %vm1125_vm1, %v4558_v63, %v4554_v28  ;;  %4660 = vrot.lane.b32.xlu0 %v4623_v8, %s4965_s1  ;;  %v4640_v17 = vcombine.high %v4616_v9, %v4964_v62  ;;  %v4641_v22 = vcombine.high %v4623_v8, %v4964_v62  ;;  %vm4689_vm1 = vcmask 392192  }
 0x816   :  { %v4575_v43 = vsel %vm1298_vm2, %v4559_v15, %v4550_v20  ;;  %v4632_v44 = vrot.slane %v4624_v19, %v4615_v59  ;;  %v4639_v39 = vrot.slane %v4625_v30, %v4615_v59  ;;  %vm4691_vm2 = vcmask 523264  }
 0x817   :  { %v4646_v54 = vcombine.low %v7751_v1, %v4575_v43  ;;  %4656 = vrot.lane.b32.xlu1 %v4640_v17, %s4966_s6 }
 0x818   :  { %v4642_v40 = vcombine.high %v4632_v44, %v4964_v62  ;;  %v4643_v57 = vcombine.high %v4639_v39, %v4964_v62 }
 0x819   :  { %4668 = vrot.lane.b32.xlu0 %v4632_v44, %s4967_s7  ;;  %v4653_v55 = vrot.slane %v4646_v54, %v4615_v59 }
 0x81b   :  { %4664 = vrot.lane.b32.xlu1 %v4641_v22, %s4968_s8  ;;  %v4654_v33 = vcombine.high %v4653_v55, %v4964_v62 }
 0x81d   :  { %4676 = vrot.lane.b32.xlu0 %v4639_v39, %s4969_s9 }
 0x81f   :  { %4672 = vrot.lane.b32.xlu1 %v4642_v40, %s4970_s10 }
 0x821   :  { %4684 = vrot.lane.b32.xlu0 %v4654_v33, %s4966_s6 }
 0x823   :  { %4680 = vrot.lane.b32.xlu1 %v4643_v57, %s4971_s11 }
 0x887   :  { %v4661_v1 = vpop.permute.xlu0 %4660 }
 0x889   :  { %v4657_v41 = vpop.permute.xlu1 %4656 }
 0x88a   :  { %v4687_v49 = vsel %vm1325_vm9, %v4616_v9, %v4657_v41 }
 0x88b   :  { %v4669_v53 = vpop.permute.xlu0 %4668  ;;  %v4688_v10 = vsel %vm873_vm0, %v4687_v49, %v4661_v1  ;;  %vm4713_vm0 = vmor %vm4712_vm7, %vm4711_vm6 }
 0x88d   :  { %v4665_v56 = vpop.permute.xlu1 %4664 }
 0x88e   :  { %v4690_v4 = vsel %vm4689_vm1, %v4688_v10, %v4665_v56 }
 0x88f   :  { %v4677_v61 = vpop.permute.xlu0 %4676  ;;  %v4692_v14 = vsel %vm4691_vm2, %v4690_v4, %v4669_v53 }
 0x891   :  { %v4673_v38 = vpop.permute.xlu1 %4672 }
 0x892   :  { %v4694_v48 = vsel %vm4693_vm3, %v4692_v14, %v4673_v38 }
 0x893   :  { %v4685_v24 = vpop.permute.xlu0 %4684  ;;  %v4696_v25 = vsel %vm4695_vm4, %v4694_v48, %v4677_v61 }
 0x894   :  { %v4699_v29 = vsel %vm1325_vm9, %v4653_v55, %v4685_v24 }
 0x895   :  { %v4681_v5 = vpop.permute.xlu1 %4680 }
 0x896   :  { %v4698_v34 = vsel %vm4697_vm5, %v4696_v25, %v4681_v5 }
 0x897   :  { %v4702_v21 = vcombine.low %v4698_v34, %v4699_v29 }
 0x899   :  { %v4709_v32 = vrot.slane %v4702_v21, %v7812_v42 }
 0x89b   :  { %4714 = vst.msk [vmem:[#allocation7] sm:$0xf] %vm4713_vm0, %v4709_v32 }
 0x89c   :  { %4940 = shalt.err (!%p4937_p6)
}
 0x89d   :  { %s4941_s17 = scalar_lea.hbm %s7861_s2, 64 }
 0x89e   :  { %p4942_p7 = scmp.ne.s32.totalorder %s7861_s2, %s4941_s17  ;;  %p4945_p8 = scmp.lt.u32.totalorder %s4941_s17, %s7861_s2 }
 0x8a0   :  { %p4947_p9 = pnand %p4945_p8, %p4942_p7 }
 0x8a2   :  { %4950 = shalt.err (!%p4947_p9)
}
 0x8a3   :  { %4724 = dma.vmem_to_hbm [thread:$0]  %s4722_s13, 64, %s7861_s2, [#allocation4]  }
 0x8a4   :  { %4955 = dma.done.wait [#allocation4], 64  }
 0x8a5   :  { %4956 = vsyncadd [#allocation4], 4294967232 }
 0x8a6   :  { %4728 = vsyncpa [#allocation3], 1 }
 0x8a7   :  { %4729 = vsyncpa [#allocation6], 1 }
 0x8a8   :  { %4730 = vsyncpa [#allocation4], 1 }

</bundles_post_ra>
